<compile_context>
chip_gen: v5e
topology: v5e:2x2
jax: 0.10.0
libtpu: 0.0.40
codegen_flags: <defaults>
</compile_context>

<pallas_src>
import functools
import math

import jax
import jax.numpy as jnp
from jax import lax
from jax.experimental import pallas as pl
from jax.experimental.pallas import tpu as pltpu

HEAD_WIDTH = 128     # lane-dense head slab: [value | action_logits | pad]


def _round_up(x, m):
    return (x + m - 1) // m * m


# ----------------------------------------------------------------------------
# Kernel 1: fused conv trunk, one sample per grid step, VMEM-resident
# intermediates.  Spatial sizes are fixed by the module (84x84 input).
# ----------------------------------------------------------------------------
def _conv_trunk_kernel(xe_ref, xo_ref, w1_ref, b1_ref, w2_ref, b2_ref,
                       w3_ref, b3_ref, out_ref, h1e_ref, h1o_ref, h2_ref):
    f32 = jnp.float32

    # ---- conv1: 2x2 stride-1 over space-to-depth input -> 20x20x32 ----------
    # Output is written column-parity-split (even cols -> h1e, odd -> h1o) so
    # that conv2's stride-2 column access becomes contiguous slices.
    b1 = b1_ref[...]

    def conv1_row(oy, c):
        acc_e = jnp.zeros((10, w1_ref.shape[2]), f32)
        acc_o = jnp.zeros((10, w1_ref.shape[2]), f32)
        for p in range(2):
            xe0 = xe_ref[0, oy + p, 0:10, :]      # even input cols 0..18
            xe1 = xe_ref[0, oy + p, 1:11, :]      # even input cols 2..20
            xo0 = xo_ref[0, oy + p, 0:10, :]      # odd  input cols 1..19
            w_q0 = w1_ref[p * 2 + 0]
            w_q1 = w1_ref[p * 2 + 1]
            acc_e += jnp.dot(xe0, w_q0, preferred_element_type=f32)
            acc_e += jnp.dot(xo0, w_q1, preferred_element_type=f32)
            acc_o += jnp.dot(xo0, w_q0, preferred_element_type=f32)
            acc_o += jnp.dot(xe1, w_q1, preferred_element_type=f32)
        h1e_ref[oy] = jnp.maximum(acc_e + b1, 0.0).astype(h1e_ref.dtype)
        h1o_ref[oy] = jnp.maximum(acc_o + b1, 0.0).astype(h1o_ref.dtype)
        return c

    lax.fori_loop(0, 20, conv1_row, 0)

    # ---- conv2: 4x4 stride-2 -> 9x9x64 --------------------------------------
    b2 = b2_ref[...]

    def conv2_row(oy, c):
        acc = jnp.zeros((9, w2_ref.shape[2]), f32)
        for p in range(4):
            r = 2 * oy + p
            for q in range(4):
                u = q // 2
                if q % 2 == 0:
                    sl = h1e_ref[r, u:u + 9, :]   # even conv1 columns
                else:
                    sl = h1o_ref[r, u:u + 9, :]   # odd conv1 columns
                acc += jnp.dot(sl, w2_ref[p * 4 + q], preferred_element_type=f32)
        h2_ref[oy] = jnp.maximum(acc + b2, 0.0).astype(h2_ref.dtype)
        return c

    lax.fori_loop(0, 9, conv2_row, 0)

    # ---- conv3: 3x3 stride-1 -> 7x7x32 --------------------------------------
    b3 = b3_ref[...]

    def conv3_row(oy, c):
        acc = jnp.zeros((7, w3_ref.shape[2]), f32)
        for p in range(3):
            for q in range(3):
                sl = h2_ref[oy + p, q:q + 7, :]
                acc += jnp.dot(sl, w3_ref[p * 3 + q], preferred_element_type=f32)
        out_ref[0, oy] = jnp.maximum(acc + b3, 0.0).astype(out_ref.dtype)
        return c

    lax.fori_loop(0, 7, conv3_row, 0)


def conv_trunk(xe, xo, w1, b1, w2, b2, w3, b3):
    """xe/xo: column-parity-split s2d input, bf16.  Returns [B,7,7,32] bf16."""
    bsz = xe.shape[0]
    c1 = xe.shape[3]
    return pl.pallas_call(
        _conv_trunk_kernel,
        out_shape=jax.ShapeDtypeStruct((bsz, 7, 7, 32), jnp.bfloat16),
        grid=(bsz,),
        in_specs=[
            pl.BlockSpec((1, 21, 11, c1), lambda b: (b, 0, 0, 0)),
            pl.BlockSpec((1, 21, 10, c1), lambda b: (b, 0, 0, 0)),
            pl.BlockSpec((4, c1, 32), lambda b: (0, 0, 0)),    # conv1 weights
            pl.BlockSpec((1, 32), lambda b: (0, 0)),
            pl.BlockSpec((16, 32, 64), lambda b: (0, 0, 0)),   # conv2 weights
            pl.BlockSpec((1, 64), lambda b: (0, 0)),
            pl.BlockSpec((9, 64, 32), lambda b: (0, 0, 0)),    # conv3 weights
            pl.BlockSpec((1, 32), lambda b: (0, 0)),
        ],
        out_specs=pl.BlockSpec((1, 7, 7, 32), lambda b: (b, 0, 0, 0)),
        scratch_shapes=[
            pltpu.VMEM((20, 10, 32), jnp.bfloat16),   # conv1 out, even cols
            pltpu.VMEM((20, 10, 32), jnp.bfloat16),   # conv1 out, odd cols
            pltpu.VMEM((9, 9, 64), jnp.bfloat16),     # conv2 out
        ],
        compiler_params=pltpu.CompilerParams(
            dimension_semantics=("parallel",)),
    )(xe, xo, w1, b1, w2, b2, w3, b3)


# ----------------------------------------------------------------------------
# Kernel 2: fused trunk FC(+ReLU) + merged actor/critic heads, lane-dense out.
# ----------------------------------------------------------------------------
def _head_kernel(feat_ref, wfc_ref, bfc_ref, whead_ref, bhead_ref, out_ref):
    h = jnp.dot(feat_ref[...], wfc_ref[...], preferred_element_type=jnp.float32)
    h = jnp.maximum(h + bfc_ref[...], 0.0)
    out = jnp.dot(h.astype(whead_ref.dtype), whead_ref[...],
                  preferred_element_type=jnp.float32)
    out_ref[...] = (out + bhead_ref[...]).astype(out_ref.dtype)


def fused_head(feat, wfc, bfc, whead, bhead, num_outputs):
    b, f = feat.shape
    hidden = wfc.shape[1]
    bp = _round_up(b, 8)
    if bp <= 8:
        tb = bp
    else:
        # >= 2 grid steps so v7x's second TensorCore gets work.
        tb = min(256, _round_up(bp // 2, 8))
        bp = _round_up(bp, tb)
    if bp != b:
        feat = jnp.pad(feat, ((0, bp - b), (0, 0)))
    out = pl.pallas_call(
        _head_kernel,
        out_shape=jax.ShapeDtypeStruct((bp, HEAD_WIDTH), jnp.float32),
        grid=(bp // tb,),
        in_specs=[
            pl.BlockSpec((tb, f), lambda i: (i, 0)),
            pl.BlockSpec((f, hidden), lambda i: (0, 0)),       # weights stay
            pl.BlockSpec((1, hidden), lambda i: (0, 0)),       # resident
            pl.BlockSpec((hidden, HEAD_WIDTH), lambda i: (0, 0)),
            pl.BlockSpec((1, HEAD_WIDTH), lambda i: (0, 0)),
        ],
        out_specs=pl.BlockSpec((tb, HEAD_WIDTH), lambda i: (i, 0)),
        compiler_params=pltpu.CompilerParams(
            dimension_semantics=("parallel",),
            vmem_limit_bytes=32 * 1024 * 1024),   # headroom under v5e default
    )(feat, wfc, bfc, whead, bhead)
    value = out[:b, :1]
    logits = out[:b, 1:1 + num_outputs]
    return value, logits


# ----------------------------------------------------------------------------
# Wrapper: cheap input reshaping (XLA) + the two Pallas kernels
# ----------------------------------------------------------------------------
def _split_space_to_depth(x_nhwc):
    """[B,84,84,C] -> (even-col, odd-col) space-to-depth(4) tensors [B,21,*,16C]."""
    bsz, h, w, c = x_nhwc.shape
    xs = x_nhwc.reshape(bsz, h // 4, 4, w // 4, 4, c)
    xs = xs.transpose(0, 1, 3, 2, 4, 5).reshape(bsz, h // 4, w // 4, 16 * c)
    return xs[:, :, 0::2, :], xs[:, :, 1::2, :]


def _conv1_weight_s2d(w1_flat, num_channels):
    """(8*8*C,32) rows ordered (kh,kw,c) -> (4, 16C, 32) matching s2d channels."""
    c = num_channels
    w = w1_flat.reshape(2, 4, 2, 4, c, 32).transpose(0, 2, 1, 3, 4, 5)
    return w.reshape(4, 16 * c, 32)


def cnn_base_forward(x_nchw, params, num_outputs):
    """x: [B, C, 84, 84] (PyTorch layout). Returns (value [B,1], logits [B,O])."""
    assert x_nchw.shape[2] == 84 and x_nchw.shape[3] == 84
    x = jnp.transpose(x_nchw, (0, 2, 3, 1))               # NHWC
    bsz, c = x.shape[0], x.shape[3]
    bf = jnp.bfloat16

    xe, xo = _split_space_to_depth(x)
    h3 = conv_trunk(
        xe.astype(bf), xo.astype(bf),
        _conv1_weight_s2d(params["w1"], c).astype(bf), params["b1"],
        params["w2"].reshape(16, 32, 64).astype(bf), params["b2"],
        params["w3"].reshape(9, 64, 32).astype(bf), params["b3"])

    feat = h3.reshape(bsz, 7 * 7 * 32)                     # (h, w, c) order
    value, logits = fused_head(
        feat, params["wfc"].astype(bf), params["bfc"],
        params["whead"].astype(bf), params["bhead"], num_outputs)
    return value, logits


# `dist` is an externally supplied distribution head in the PyTorch module.
# TODO(synk): actual `dist` module is not defined here; identity pass-through.
def identity_dist(logits):
    return logits


def cnn_base(x, params, num_outputs):
    value, action_logits = cnn_base_forward(x, params, num_outputs)
    return value, identity_dist(action_logits)


# ----------------------------------------------------------------------------
# Deterministic parameter construction (orthogonal init, zero bias)
# ----------------------------------------------------------------------------
def _orthogonal(key, shape, gain=1.0):
    rows, cols = shape
    a = jax.random.normal(key, shape, dtype=jnp.float32)
    if rows < cols:
        a = a.T
    q, r = jnp.linalg.qr(a)
    d = jnp.diag(r)
    q = q * jnp.where(d >= 0.0, 1.0, -1.0)
    if rows < cols:
        q = q.T
    return (gain * q).astype(jnp.float32)


def make_params(key, num_channels, num_outputs, hidden_size=512):
    assert 1 + num_outputs <= HEAD_WIDTH
    gain_relu = math.sqrt(2.0)                # nn.init.calculate_gain('relu')
    ks = jax.random.split(key, 6)
    w1 = _orthogonal(ks[0], (8 * 8 * num_channels, 32), gain_relu)
    w2 = _orthogonal(ks[1], (4 * 4 * 32, 64), gain_relu)
    w3 = _orthogonal(ks[2], (3 * 3 * 64, 32), gain_relu)
    wfc = _orthogonal(ks[3], (32 * 7 * 7, hidden_size), gain_relu)
    wc = _orthogonal(ks[4], (hidden_size, 1), 1.0)             # critic, gain 1
    wa = _orthogonal(ks[5], (hidden_size, num_outputs), 1.0)   # actor, gain 1
    bc = jnp.zeros((1, 1), jnp.float32)
    ba = jnp.zeros((1, num_outputs), jnp.float32)
    pad = HEAD_WIDTH - 1 - num_outputs
    whead = jnp.concatenate([wc, wa, jnp.zeros((hidden_size, pad), jnp.float32)], 1)
    bhead = jnp.concatenate([bc, ba, jnp.zeros((1, pad), jnp.float32)], 1)
    return {
        "w1": w1, "b1": jnp.zeros((1, 32), jnp.float32),
        "w2": w2, "b2": jnp.zeros((1, 64), jnp.float32),
        "w3": w3, "b3": jnp.zeros((1, 32), jnp.float32),
        "wfc": wfc, "bfc": jnp.zeros((1, hidden_size), jnp.float32),
        "wc": wc, "bc": bc, "wa": wa, "ba": ba,
        "whead": whead, "bhead": bhead,
    }


# ----------------------------------------------------------------------------
# Pure-JAX reference (same parameterization) for correctness check
# ----------------------------------------------------------------------------
def ref_forward(x_nhwc, params):
    def conv(x, w_mat, b, kh, kw, stride):
        cin = x.shape[-1]
        w = w_mat.reshape(kh, kw, cin, -1)         # HWIO, rows (kh, kw, cin)
        y = jax.lax.conv_general_dilated(
            x, w, window_strides=(stride, stride), padding="VALID",
            dimension_numbers=("NHWC", "HWIO", "NHWC"))
        return jax.nn.relu(y + b.reshape(1, 1, 1, -1))

    h = conv(x_nhwc, params["w1"], params["b1"], 8, 8, 4)
    h = conv(h, params["w2"], params["b2"], 4, 4, 2)
    h = conv(h, params["w3"], params["b3"], 3, 3, 1)
    feat = h.reshape(h.shape[0], -1)               # (h, w, c) order
    hid = jax.nn.relu(feat @ params["wfc"] + params["bfc"])
    value = hid @ params["wc"] + params["bc"]
    logits = hid @ params["wa"] + params["ba"]
    return value, logits


if __name__ == "__main__":
    key = jax.random.PRNGKey(0)
    k_param, k_x = jax.random.split(key)

    batch, num_channels, num_outputs, hidden_size = 2, 4, 6, 512
    params = make_params(k_param, num_channels, num_outputs, hidden_size)
    x = jax.random.normal(k_x, (batch, num_channels, 84, 84), dtype=jnp.float32)

    fwd = jax.jit(functools.partial(cnn_base, params=params,
                                    num_outputs=num_outputs))
    value, dist_out = fwd(x)
    jax.block_until_ready((value, dist_out))

    assert value.shape == (batch, 1)
    assert dist_out.shape == (batch, num_outputs)

    # Tolerance covers bf16 matmul operands (accumulation is f32); logic bugs
    # would produce O(1) errors.
    v_ref, l_ref = ref_forward(jnp.transpose(x, (0, 2, 3, 1)), params)
    assert jnp.allclose(value, v_ref, atol=3e-2, rtol=3e-2), (
        float(jnp.max(jnp.abs(value - v_ref))))
    assert jnp.allclose(dist_out, l_ref, atol=3e-2, rtol=3e-2), (
        float(jnp.max(jnp.abs(dist_out - l_ref))))

    print("KERNEL_OK")
</pallas_src>

<mosaic_0001>
module attributes {stable_mosaic.version = 11 : i64} {
  func.func @_conv_trunk_kernel(%arg0: i32, %arg1: memref<1x21x11x64xbf16, #tpu.memory_space<vmem>>, %arg2: memref<1x21x10x64xbf16, #tpu.memory_space<vmem>>, %arg3: memref<4x64x32xbf16, #tpu.memory_space<vmem>>, %arg4: memref<1x32xf32, #tpu.memory_space<vmem>>, %arg5: memref<16x32x64xbf16, #tpu.memory_space<vmem>>, %arg6: memref<1x64xf32, #tpu.memory_space<vmem>>, %arg7: memref<9x64x32xbf16, #tpu.memory_space<vmem>>, %arg8: memref<1x32xf32, #tpu.memory_space<vmem>>, %arg9: memref<1x7x7x32xbf16, #tpu.memory_space<vmem>>, %arg10: memref<20x10x32xbf16, #tpu.memory_space<vmem>>, %arg11: memref<20x10x32xbf16, #tpu.memory_space<vmem>>, %arg12: memref<9x9x64xbf16, #tpu.memory_space<vmem>>) attributes {dimension_semantics = [#tpu.dimension_semantics<parallel>], iteration_bounds = array<i64: 2>, scalar_prefetch = 0 : i64, scratch_operands = 3 : i64, tpu.core_type = #tpu.core_type<tc>, window_params = [{transform_indices = @transform_0, window_bounds = array<i64: 1, 21, 11, 64>}, {transform_indices = @transform_1, window_bounds = array<i64: 1, 21, 10, 64>}, {pipeline_mode = #tpu.pipeline_mode<synchronous>, transform_indices = @transform_2, window_bounds = array<i64: 4, 64, 32>}, {pipeline_mode = #tpu.pipeline_mode<synchronous>, transform_indices = @transform_3, window_bounds = array<i64: 1, 32>}, {pipeline_mode = #tpu.pipeline_mode<synchronous>, transform_indices = @transform_4, window_bounds = array<i64: 16, 32, 64>}, {pipeline_mode = #tpu.pipeline_mode<synchronous>, transform_indices = @transform_5, window_bounds = array<i64: 1, 64>}, {pipeline_mode = #tpu.pipeline_mode<synchronous>, transform_indices = @transform_6, window_bounds = array<i64: 9, 64, 32>}, {pipeline_mode = #tpu.pipeline_mode<synchronous>, transform_indices = @transform_7, window_bounds = array<i64: 1, 32>}, {transform_indices = @transform_8, window_bounds = array<i64: 1, 7, 7, 32>}]} {
    %c0 = arith.constant 0 : index
    %c0_0 = arith.constant 0 : index
    %0 = vector.load %arg4[%c0, %c0_0] : memref<1x32xf32, #tpu.memory_space<vmem>>, vector<1x32xf32>
    %c0_i32 = arith.constant 0 : i32
    %c20_i32 = arith.constant 20 : i32
    %1 = arith.addi %c0_i32, %c20_i32 : i32
    %c1_i32 = arith.constant 1 : i32
    scf.for %arg13 = %c0_i32 to %1 step %c1_i32  : i32 {
      %cst = arith.constant 0.000000e+00 : f32
      %6 = vector.broadcast %cst : f32 to vector<10x32xf32>
      %cst_12 = arith.constant 0.000000e+00 : f32
      %7 = vector.broadcast %cst_12 : f32 to vector<10x32xf32>
      %c0_i32_13 = arith.constant 0 : i32
      %8 = arith.addi %arg13, %c0_i32_13 : i32
      %c0_14 = arith.constant 0 : index
      %9 = arith.index_cast %8 : i32 to index
      %c0_15 = arith.constant 0 : index
      %c0_16 = arith.constant 0 : index
      %10 = vector.load %arg1[%c0_14, %9, %c0_15, %c0_16] : memref<1x21x11x64xbf16, #tpu.memory_space<vmem>>, vector<1x1x10x64xbf16>
      %11 = vector.shape_cast %10 : vector<1x1x10x64xbf16> to vector<10x64xbf16>
      %c0_i32_17 = arith.constant 0 : i32
      %12 = arith.addi %arg13, %c0_i32_17 : i32
      %c0_18 = arith.constant 0 : index
      %13 = arith.index_cast %12 : i32 to index
      %c1 = arith.constant 1 : index
      %c0_19 = arith.constant 0 : index
      %14 = vector.load %arg1[%c0_18, %13, %c1, %c0_19] : memref<1x21x11x64xbf16, #tpu.memory_space<vmem>>, vector<1x1x10x64xbf16>
      %15 = vector.shape_cast %14 : vector<1x1x10x64xbf16> to vector<10x64xbf16>
      %c0_i32_20 = arith.constant 0 : i32
      %16 = arith.addi %arg13, %c0_i32_20 : i32
      %c0_21 = arith.constant 0 : index
      %17 = arith.index_cast %16 : i32 to index
      %c0_22 = arith.constant 0 : index
      %c0_23 = arith.constant 0 : index
      %18 = vector.load %arg2[%c0_21, %17, %c0_22, %c0_23] : memref<1x21x10x64xbf16, #tpu.memory_space<vmem>>, vector<1x1x10x64xbf16>
      %19 = vector.shape_cast %18 : vector<1x1x10x64xbf16> to vector<10x64xbf16>
      %c0_24 = arith.constant 0 : index
      %c0_25 = arith.constant 0 : index
      %c0_26 = arith.constant 0 : index
      %20 = vector.load %arg3[%c0_24, %c0_25, %c0_26] : memref<4x64x32xbf16, #tpu.memory_space<vmem>>, vector<1x64x32xbf16>
      %21 = vector.shape_cast %20 : vector<1x64x32xbf16> to vector<64x32xbf16>
      %c1_27 = arith.constant 1 : index
      %c0_28 = arith.constant 0 : index
      %c0_29 = arith.constant 0 : index
      %22 = vector.load %arg3[%c1_27, %c0_28, %c0_29] : memref<4x64x32xbf16, #tpu.memory_space<vmem>>, vector<1x64x32xbf16>
      %23 = vector.shape_cast %22 : vector<1x64x32xbf16> to vector<64x32xbf16>
      %cst_30 = arith.constant dense<0.000000e+00> : vector<10x32xf32>
      %24 = tpu.matmul %11, %21, %cst_30 {dimension_numbers = #tpu.dot_dimension_numbers<[1], [0], [0], [1], [0, 0, 1, 1], [], []>} : vector<10x64xbf16>, vector<64x32xbf16>, vector<10x32xf32> -> vector<10x32xf32>
      %25 = arith.addf %6, %24 : vector<10x32xf32>
      %cst_31 = arith.constant dense<0.000000e+00> : vector<10x32xf32>
      %26 = tpu.matmul %19, %23, %cst_31 {dimension_numbers = #tpu.dot_dimension_numbers<[1], [0], [0], [1], [0, 0, 1, 1], [], []>} : vector<10x64xbf16>, vector<64x32xbf16>, vector<10x32xf32> -> vector<10x32xf32>
      %27 = arith.addf %25, %26 : vector<10x32xf32>
      %cst_32 = arith.constant dense<0.000000e+00> : vector<10x32xf32>
      %28 = tpu.matmul %19, %21, %cst_32 {dimension_numbers = #tpu.dot_dimension_numbers<[1], [0], [0], [1], [0, 0, 1, 1], [], []>} : vector<10x64xbf16>, vector<64x32xbf16>, vector<10x32xf32> -> vector<10x32xf32>
      %29 = arith.addf %7, %28 : vector<10x32xf32>
      %cst_33 = arith.constant dense<0.000000e+00> : vector<10x32xf32>
      %30 = tpu.matmul %15, %23, %cst_33 {dimension_numbers = #tpu.dot_dimension_numbers<[1], [0], [0], [1], [0, 0, 1, 1], [], []>} : vector<10x64xbf16>, vector<64x32xbf16>, vector<10x32xf32> -> vector<10x32xf32>
      %31 = arith.addf %29, %30 : vector<10x32xf32>
      %c1_i32_34 = arith.constant 1 : i32
      %32 = arith.addi %arg13, %c1_i32_34 : i32
      %c0_35 = arith.constant 0 : index
      %33 = arith.index_cast %32 : i32 to index
      %c0_36 = arith.constant 0 : index
      %c0_37 = arith.constant 0 : index
      %34 = vector.load %arg1[%c0_35, %33, %c0_36, %c0_37] : memref<1x21x11x64xbf16, #tpu.memory_space<vmem>>, vector<1x1x10x64xbf16>
      %35 = vector.shape_cast %34 : vector<1x1x10x64xbf16> to vector<10x64xbf16>
      %c1_i32_38 = arith.constant 1 : i32
      %36 = arith.addi %arg13, %c1_i32_38 : i32
      %c0_39 = arith.constant 0 : index
      %37 = arith.index_cast %36 : i32 to index
      %c1_40 = arith.constant 1 : index
      %c0_41 = arith.constant 0 : index
      %38 = vector.load %arg1[%c0_39, %37, %c1_40, %c0_41] : memref<1x21x11x64xbf16, #tpu.memory_space<vmem>>, vector<1x1x10x64xbf16>
      %39 = vector.shape_cast %38 : vector<1x1x10x64xbf16> to vector<10x64xbf16>
      %c1_i32_42 = arith.constant 1 : i32
      %40 = arith.addi %arg13, %c1_i32_42 : i32
      %c0_43 = arith.constant 0 : index
      %41 = arith.index_cast %40 : i32 to index
      %c0_44 = arith.constant 0 : index
      %c0_45 = arith.constant 0 : index
      %42 = vector.load %arg2[%c0_43, %41, %c0_44, %c0_45] : memref<1x21x10x64xbf16, #tpu.memory_space<vmem>>, vector<1x1x10x64xbf16>
      %43 = vector.shape_cast %42 : vector<1x1x10x64xbf16> to vector<10x64xbf16>
      %c2 = arith.constant 2 : index
      %c0_46 = arith.constant 0 : index
      %c0_47 = arith.constant 0 : index
      %44 = vector.load %arg3[%c2, %c0_46, %c0_47] : memref<4x64x32xbf16, #tpu.memory_space<vmem>>, vector<1x64x32xbf16>
      %45 = vector.shape_cast %44 : vector<1x64x32xbf16> to vector<64x32xbf16>
      %c3 = arith.constant 3 : index
      %c0_48 = arith.constant 0 : index
      %c0_49 = arith.constant 0 : index
      %46 = vector.load %arg3[%c3, %c0_48, %c0_49] : memref<4x64x32xbf16, #tpu.memory_space<vmem>>, vector<1x64x32xbf16>
      %47 = vector.shape_cast %46 : vector<1x64x32xbf16> to vector<64x32xbf16>
      %cst_50 = arith.constant dense<0.000000e+00> : vector<10x32xf32>
      %48 = tpu.matmul %35, %45, %cst_50 {dimension_numbers = #tpu.dot_dimension_numbers<[1], [0], [0], [1], [0, 0, 1, 1], [], []>} : vector<10x64xbf16>, vector<64x32xbf16>, vector<10x32xf32> -> vector<10x32xf32>
      %49 = arith.addf %27, %48 : vector<10x32xf32>
      %cst_51 = arith.constant dense<0.000000e+00> : vector<10x32xf32>
      %50 = tpu.matmul %43, %47, %cst_51 {dimension_numbers = #tpu.dot_dimension_numbers<[1], [0], [0], [1], [0, 0, 1, 1], [], []>} : vector<10x64xbf16>, vector<64x32xbf16>, vector<10x32xf32> -> vector<10x32xf32>
      %51 = arith.addf %49, %50 : vector<10x32xf32>
      %cst_52 = arith.constant dense<0.000000e+00> : vector<10x32xf32>
      %52 = tpu.matmul %43, %45, %cst_52 {dimension_numbers = #tpu.dot_dimension_numbers<[1], [0], [0], [1], [0, 0, 1, 1], [], []>} : vector<10x64xbf16>, vector<64x32xbf16>, vector<10x32xf32> -> vector<10x32xf32>
      %53 = arith.addf %31, %52 : vector<10x32xf32>
      %cst_53 = arith.constant dense<0.000000e+00> : vector<10x32xf32>
      %54 = tpu.matmul %39, %47, %cst_53 {dimension_numbers = #tpu.dot_dimension_numbers<[1], [0], [0], [1], [0, 0, 1, 1], [], []>} : vector<10x64xbf16>, vector<64x32xbf16>, vector<10x32xf32> -> vector<10x32xf32>
      %55 = arith.addf %53, %54 : vector<10x32xf32>
      %56 = vector.broadcast %0 : vector<1x32xf32> to vector<10x32xf32>
      %57 = arith.addf %51, %56 : vector<10x32xf32>
      %cst_54 = arith.constant 0.000000e+00 : f32
      %58 = vector.broadcast %cst_54 : f32 to vector<10x32xf32>
      %59 = arith.maximumf %57, %58 : vector<10x32xf32>
      %60 = arith.truncf %59 : vector<10x32xf32> to vector<10x32xbf16>
      %61 = arith.index_cast %arg13 : i32 to index
      %c0_55 = arith.constant 0 : index
      %c0_56 = arith.constant 0 : index
      %62 = vector.load %arg10[%61, %c0_55, %c0_56] : memref<20x10x32xbf16, #tpu.memory_space<vmem>>, vector<1x10x32xbf16>
      %63 = vector.shape_cast %62 : vector<1x10x32xbf16> to vector<10x32xbf16>
      %64 = vector.shape_cast %60 : vector<10x32xbf16> to vector<1x10x32xbf16>
      tpu.vector_store %arg10[%61, %c0_55, %c0_56], %64 {strides = array<i32>} : memref<20x10x32xbf16, #tpu.memory_space<vmem>>, vector<1x10x32xbf16>,
      %65 = vector.broadcast %0 : vector<1x32xf32> to vector<10x32xf32>
      %66 = arith.addf %55, %65 : vector<10x32xf32>
      %cst_57 = arith.constant 0.000000e+00 : f32
      %67 = vector.broadcast %cst_57 : f32 to vector<10x32xf32>
      %68 = arith.maximumf %66, %67 : vector<10x32xf32>
      %69 = arith.truncf %68 : vector<10x32xf32> to vector<10x32xbf16>
      %70 = arith.index_cast %arg13 : i32 to index
      %c0_58 = arith.constant 0 : index
      %c0_59 = arith.constant 0 : index
      %71 = vector.load %arg11[%70, %c0_58, %c0_59] : memref<20x10x32xbf16, #tpu.memory_space<vmem>>, vector<1x10x32xbf16>
      %72 = vector.shape_cast %71 : vector<1x10x32xbf16> to vector<10x32xbf16>
      %73 = vector.shape_cast %69 : vector<10x32xbf16> to vector<1x10x32xbf16>
      tpu.vector_store %arg11[%70, %c0_58, %c0_59], %73 {strides = array<i32>} : memref<20x10x32xbf16, #tpu.memory_space<vmem>>, vector<1x10x32xbf16>,
    }
    %c20_i32_1 = arith.constant 20 : i32
    %c0_2 = arith.constant 0 : index
    %c0_3 = arith.constant 0 : index
    %2 = vector.load %arg6[%c0_2, %c0_3] : memref<1x64xf32, #tpu.memory_space<vmem>>, vector<1x64xf32>
    %c0_i32_4 = arith.constant 0 : i32
    %c9_i32 = arith.constant 9 : i32
    %3 = arith.addi %c0_i32_4, %c9_i32 : i32
    %c1_i32_5 = arith.constant 1 : i32
    scf.for %arg13 = %c0_i32_4 to %3 step %c1_i32_5  : i32 {
      %cst = arith.constant 0.000000e+00 : f32
      %6 = vector.broadcast %cst : f32 to vector<9x64xf32>
      %c2_i32 = arith.constant 2 : i32
      %7 = arith.muli %c2_i32, %arg13 : i32
      %c0_i32_12 = arith.constant 0 : i32
      %8 = arith.addi %7, %c0_i32_12 : i32
      %9 = arith.index_cast %8 : i32 to index
      %c0_13 = arith.constant 0 : index
      %c0_14 = arith.constant 0 : index
      %10 = vector.load %arg10[%9, %c0_13, %c0_14] : memref<20x10x32xbf16, #tpu.memory_space<vmem>>, vector<1x9x32xbf16>
      %11 = vector.shape_cast %10 : vector<1x9x32xbf16> to vector<9x32xbf16>
      %c0_15 = arith.constant 0 : index
      %c0_16 = arith.constant 0 : index
      %c0_17 = arith.constant 0 : index
      %12 = vector.load %arg5[%c0_15, %c0_16, %c0_17] : memref<16x32x64xbf16, #tpu.memory_space<vmem>>, vector<1x32x64xbf16>
      %13 = vector.shape_cast %12 : vector<1x32x64xbf16> to vector<32x64xbf16>
      %cst_18 = arith.constant dense<0.000000e+00> : vector<9x64xf32>
      %14 = tpu.matmul %11, %13, %cst_18 {dimension_numbers = #tpu.dot_dimension_numbers<[1], [0], [0], [1], [0, 0, 1, 1], [], []>} : vector<9x32xbf16>, vector<32x64xbf16>, vector<9x64xf32> -> vector<9x64xf32>
      %15 = arith.addf %6, %14 : vector<9x64xf32>
      %16 = arith.index_cast %8 : i32 to index
      %c0_19 = arith.constant 0 : index
      %c0_20 = arith.constant 0 : index
      %17 = vector.load %arg11[%16, %c0_19, %c0_20] : memref<20x10x32xbf16, #tpu.memory_space<vmem>>, vector<1x9x32xbf16>
      %18 = vector.shape_cast %17 : vector<1x9x32xbf16> to vector<9x32xbf16>
      %c1 = arith.constant 1 : index
      %c0_21 = arith.constant 0 : index
      %c0_22 = arith.constant 0 : index
      %19 = vector.load %arg5[%c1, %c0_21, %c0_22] : memref<16x32x64xbf16, #tpu.memory_space<vmem>>, vector<1x32x64xbf16>
      %20 = vector.shape_cast %19 : vector<1x32x64xbf16> to vector<32x64xbf16>
      %cst_23 = arith.constant dense<0.000000e+00> : vector<9x64xf32>
      %21 = tpu.matmul %18, %20, %cst_23 {dimension_numbers = #tpu.dot_dimension_numbers<[1], [0], [0], [1], [0, 0, 1, 1], [], []>} : vector<9x32xbf16>, vector<32x64xbf16>, vector<9x64xf32> -> vector<9x64xf32>
      %22 = arith.addf %15, %21 : vector<9x64xf32>
      %23 = arith.index_cast %8 : i32 to index
      %c1_24 = arith.constant 1 : index
      %c0_25 = arith.constant 0 : index
      %24 = vector.load %arg10[%23, %c1_24, %c0_25] : memref<20x10x32xbf16, #tpu.memory_space<vmem>>, vector<1x9x32xbf16>
      %25 = vector.shape_cast %24 : vector<1x9x32xbf16> to vector<9x32xbf16>
      %c2 = arith.constant 2 : index
      %c0_26 = arith.constant 0 : index
      %c0_27 = arith.constant 0 : index
      %26 = vector.load %arg5[%c2, %c0_26, %c0_27] : memref<16x32x64xbf16, #tpu.memory_space<vmem>>, vector<1x32x64xbf16>
      %27 = vector.shape_cast %26 : vector<1x32x64xbf16> to vector<32x64xbf16>
      %cst_28 = arith.constant dense<0.000000e+00> : vector<9x64xf32>
      %28 = tpu.matmul %25, %27, %cst_28 {dimension_numbers = #tpu.dot_dimension_numbers<[1], [0], [0], [1], [0, 0, 1, 1], [], []>} : vector<9x32xbf16>, vector<32x64xbf16>, vector<9x64xf32> -> vector<9x64xf32>
      %29 = arith.addf %22, %28 : vector<9x64xf32>
      %30 = arith.index_cast %8 : i32 to index
      %c1_29 = arith.constant 1 : index
      %c0_30 = arith.constant 0 : index
      %31 = vector.load %arg11[%30, %c1_29, %c0_30] : memref<20x10x32xbf16, #tpu.memory_space<vmem>>, vector<1x9x32xbf16>
      %32 = vector.shape_cast %31 : vector<1x9x32xbf16> to vector<9x32xbf16>
      %c3 = arith.constant 3 : index
      %c0_31 = arith.constant 0 : index
      %c0_32 = arith.constant 0 : index
      %33 = vector.load %arg5[%c3, %c0_31, %c0_32] : memref<16x32x64xbf16, #tpu.memory_space<vmem>>, vector<1x32x64xbf16>
      %34 = vector.shape_cast %33 : vector<1x32x64xbf16> to vector<32x64xbf16>
      %cst_33 = arith.constant dense<0.000000e+00> : vector<9x64xf32>
      %35 = tpu.matmul %32, %34, %cst_33 {dimension_numbers = #tpu.dot_dimension_numbers<[1], [0], [0], [1], [0, 0, 1, 1], [], []>} : vector<9x32xbf16>, vector<32x64xbf16>, vector<9x64xf32> -> vector<9x64xf32>
      %36 = arith.addf %29, %35 : vector<9x64xf32>
      %c2_i32_34 = arith.constant 2 : i32
      %37 = arith.muli %c2_i32_34, %arg13 : i32
      %c1_i32_35 = arith.constant 1 : i32
      %38 = arith.addi %37, %c1_i32_35 : i32
      %39 = arith.index_cast %38 : i32 to index
      %c0_36 = arith.constant 0 : index
      %c0_37 = arith.constant 0 : index
      %40 = vector.load %arg10[%39, %c0_36, %c0_37] : memref<20x10x32xbf16, #tpu.memory_space<vmem>>, vector<1x9x32xbf16>
      %41 = vector.shape_cast %40 : vector<1x9x32xbf16> to vector<9x32xbf16>
      %c4 = arith.constant 4 : index
      %c0_38 = arith.constant 0 : index
      %c0_39 = arith.constant 0 : index
      %42 = vector.load %arg5[%c4, %c0_38, %c0_39] : memref<16x32x64xbf16, #tpu.memory_space<vmem>>, vector<1x32x64xbf16>
      %43 = vector.shape_cast %42 : vector<1x32x64xbf16> to vector<32x64xbf16>
      %cst_40 = arith.constant dense<0.000000e+00> : vector<9x64xf32>
      %44 = tpu.matmul %41, %43, %cst_40 {dimension_numbers = #tpu.dot_dimension_numbers<[1], [0], [0], [1], [0, 0, 1, 1], [], []>} : vector<9x32xbf16>, vector<32x64xbf16>, vector<9x64xf32> -> vector<9x64xf32>
      %45 = arith.addf %36, %44 : vector<9x64xf32>
      %46 = arith.index_cast %38 : i32 to index
      %c0_41 = arith.constant 0 : index
      %c0_42 = arith.constant 0 : index
      %47 = vector.load %arg11[%46, %c0_41, %c0_42] : memref<20x10x32xbf16, #tpu.memory_space<vmem>>, vector<1x9x32xbf16>
      %48 = vector.shape_cast %47 : vector<1x9x32xbf16> to vector<9x32xbf16>
      %c5 = arith.constant 5 : index
      %c0_43 = arith.constant 0 : index
      %c0_44 = arith.constant 0 : index
      %49 = vector.load %arg5[%c5, %c0_43, %c0_44] : memref<16x32x64xbf16, #tpu.memory_space<vmem>>, vector<1x32x64xbf16>
      %50 = vector.shape_cast %49 : vector<1x32x64xbf16> to vector<32x64xbf16>
      %cst_45 = arith.constant dense<0.000000e+00> : vector<9x64xf32>
      %51 = tpu.matmul %48, %50, %cst_45 {dimension_numbers = #tpu.dot_dimension_numbers<[1], [0], [0], [1], [0, 0, 1, 1], [], []>} : vector<9x32xbf16>, vector<32x64xbf16>, vector<9x64xf32> -> vector<9x64xf32>
      %52 = arith.addf %45, %51 : vector<9x64xf32>
      %53 = arith.index_cast %38 : i32 to index
      %c1_46 = arith.constant 1 : index
      %c0_47 = arith.constant 0 : index
      %54 = vector.load %arg10[%53, %c1_46, %c0_47] : memref<20x10x32xbf16, #tpu.memory_space<vmem>>, vector<1x9x32xbf16>
      %55 = vector.shape_cast %54 : vector<1x9x32xbf16> to vector<9x32xbf16>
      %c6 = arith.constant 6 : index
      %c0_48 = arith.constant 0 : index
      %c0_49 = arith.constant 0 : index
      %56 = vector.load %arg5[%c6, %c0_48, %c0_49] : memref<16x32x64xbf16, #tpu.memory_space<vmem>>, vector<1x32x64xbf16>
      %57 = vector.shape_cast %56 : vector<1x32x64xbf16> to vector<32x64xbf16>
      %cst_50 = arith.constant dense<0.000000e+00> : vector<9x64xf32>
      %58 = tpu.matmul %55, %57, %cst_50 {dimension_numbers = #tpu.dot_dimension_numbers<[1], [0], [0], [1], [0, 0, 1, 1], [], []>} : vector<9x32xbf16>, vector<32x64xbf16>, vector<9x64xf32> -> vector<9x64xf32>
      %59 = arith.addf %52, %58 : vector<9x64xf32>
      %60 = arith.index_cast %38 : i32 to index
      %c1_51 = arith.constant 1 : index
      %c0_52 = arith.constant 0 : index
      %61 = vector.load %arg11[%60, %c1_51, %c0_52] : memref<20x10x32xbf16, #tpu.memory_space<vmem>>, vector<1x9x32xbf16>
      %62 = vector.shape_cast %61 : vector<1x9x32xbf16> to vector<9x32xbf16>
      %c7 = arith.constant 7 : index
      %c0_53 = arith.constant 0 : index
      %c0_54 = arith.constant 0 : index
      %63 = vector.load %arg5[%c7, %c0_53, %c0_54] : memref<16x32x64xbf16, #tpu.memory_space<vmem>>, vector<1x32x64xbf16>
      %64 = vector.shape_cast %63 : vector<1x32x64xbf16> to vector<32x64xbf16>
      %cst_55 = arith.constant dense<0.000000e+00> : vector<9x64xf32>
      %65 = tpu.matmul %62, %64, %cst_55 {dimension_numbers = #tpu.dot_dimension_numbers<[1], [0], [0], [1], [0, 0, 1, 1], [], []>} : vector<9x32xbf16>, vector<32x64xbf16>, vector<9x64xf32> -> vector<9x64xf32>
      %66 = arith.addf %59, %65 : vector<9x64xf32>
      %c2_i32_56 = arith.constant 2 : i32
      %67 = arith.muli %c2_i32_56, %arg13 : i32
      %c2_i32_57 = arith.constant 2 : i32
      %68 = arith.addi %67, %c2_i32_57 : i32
      %69 = arith.index_cast %68 : i32 to index
      %c0_58 = arith.constant 0 : index
      %c0_59 = arith.constant 0 : index
      %70 = vector.load %arg10[%69, %c0_58, %c0_59] : memref<20x10x32xbf16, #tpu.memory_space<vmem>>, vector<1x9x32xbf16>
      %71 = vector.shape_cast %70 : vector<1x9x32xbf16> to vector<9x32xbf16>
      %c8 = arith.constant 8 : index
      %c0_60 = arith.constant 0 : index
      %c0_61 = arith.constant 0 : index
      %72 = vector.load %arg5[%c8, %c0_60, %c0_61] : memref<16x32x64xbf16, #tpu.memory_space<vmem>>, vector<1x32x64xbf16>
      %73 = vector.shape_cast %72 : vector<1x32x64xbf16> to vector<32x64xbf16>
      %cst_62 = arith.constant dense<0.000000e+00> : vector<9x64xf32>
      %74 = tpu.matmul %71, %73, %cst_62 {dimension_numbers = #tpu.dot_dimension_numbers<[1], [0], [0], [1], [0, 0, 1, 1], [], []>} : vector<9x32xbf16>, vector<32x64xbf16>, vector<9x64xf32> -> vector<9x64xf32>
      %75 = arith.addf %66, %74 : vector<9x64xf32>
      %76 = arith.index_cast %68 : i32 to index
      %c0_63 = arith.constant 0 : index
      %c0_64 = arith.constant 0 : index
      %77 = vector.load %arg11[%76, %c0_63, %c0_64] : memref<20x10x32xbf16, #tpu.memory_space<vmem>>, vector<1x9x32xbf16>
      %78 = vector.shape_cast %77 : vector<1x9x32xbf16> to vector<9x32xbf16>
      %c9 = arith.constant 9 : index
      %c0_65 = arith.constant 0 : index
      %c0_66 = arith.constant 0 : index
      %79 = vector.load %arg5[%c9, %c0_65, %c0_66] : memref<16x32x64xbf16, #tpu.memory_space<vmem>>, vector<1x32x64xbf16>
      %80 = vector.shape_cast %79 : vector<1x32x64xbf16> to vector<32x64xbf16>
      %cst_67 = arith.constant dense<0.000000e+00> : vector<9x64xf32>
      %81 = tpu.matmul %78, %80, %cst_67 {dimension_numbers = #tpu.dot_dimension_numbers<[1], [0], [0], [1], [0, 0, 1, 1], [], []>} : vector<9x32xbf16>, vector<32x64xbf16>, vector<9x64xf32> -> vector<9x64xf32>
      %82 = arith.addf %75, %81 : vector<9x64xf32>
      %83 = arith.index_cast %68 : i32 to index
      %c1_68 = arith.constant 1 : index
      %c0_69 = arith.constant 0 : index
      %84 = vector.load %arg10[%83, %c1_68, %c0_69] : memref<20x10x32xbf16, #tpu.memory_space<vmem>>, vector<1x9x32xbf16>
      %85 = vector.shape_cast %84 : vector<1x9x32xbf16> to vector<9x32xbf16>
      %c10 = arith.constant 10 : index
      %c0_70 = arith.constant 0 : index
      %c0_71 = arith.constant 0 : index
      %86 = vector.load %arg5[%c10, %c0_70, %c0_71] : memref<16x32x64xbf16, #tpu.memory_space<vmem>>, vector<1x32x64xbf16>
      %87 = vector.shape_cast %86 : vector<1x32x64xbf16> to vector<32x64xbf16>
      %cst_72 = arith.constant dense<0.000000e+00> : vector<9x64xf32>
      %88 = tpu.matmul %85, %87, %cst_72 {dimension_numbers = #tpu.dot_dimension_numbers<[1], [0], [0], [1], [0, 0, 1, 1], [], []>} : vector<9x32xbf16>, vector<32x64xbf16>, vector<9x64xf32> -> vector<9x64xf32>
      %89 = arith.addf %82, %88 : vector<9x64xf32>
      %90 = arith.index_cast %68 : i32 to index
      %c1_73 = arith.constant 1 : index
      %c0_74 = arith.constant 0 : index
      %91 = vector.load %arg11[%90, %c1_73, %c0_74] : memref<20x10x32xbf16, #tpu.memory_space<vmem>>, vector<1x9x32xbf16>
      %92 = vector.shape_cast %91 : vector<1x9x32xbf16> to vector<9x32xbf16>
      %c11 = arith.constant 11 : index
      %c0_75 = arith.constant 0 : index
      %c0_76 = arith.constant 0 : index
      %93 = vector.load %arg5[%c11, %c0_75, %c0_76] : memref<16x32x64xbf16, #tpu.memory_space<vmem>>, vector<1x32x64xbf16>
      %94 = vector.shape_cast %93 : vector<1x32x64xbf16> to vector<32x64xbf16>
      %cst_77 = arith.constant dense<0.000000e+00> : vector<9x64xf32>
      %95 = tpu.matmul %92, %94, %cst_77 {dimension_numbers = #tpu.dot_dimension_numbers<[1], [0], [0], [1], [0, 0, 1, 1], [], []>} : vector<9x32xbf16>, vector<32x64xbf16>, vector<9x64xf32> -> vector<9x64xf32>
      %96 = arith.addf %89, %95 : vector<9x64xf32>
      %c2_i32_78 = arith.constant 2 : i32
      %97 = arith.muli %c2_i32_78, %arg13 : i32
      %c3_i32 = arith.constant 3 : i32
      %98 = arith.addi %97, %c3_i32 : i32
      %99 = arith.index_cast %98 : i32 to index
      %c0_79 = arith.constant 0 : index
      %c0_80 = arith.constant 0 : index
      %100 = vector.load %arg10[%99, %c0_79, %c0_80] : memref<20x10x32xbf16, #tpu.memory_space<vmem>>, vector<1x9x32xbf16>
      %101 = vector.shape_cast %100 : vector<1x9x32xbf16> to vector<9x32xbf16>
      %c12 = arith.constant 12 : index
      %c0_81 = arith.constant 0 : index
      %c0_82 = arith.constant 0 : index
      %102 = vector.load %arg5[%c12, %c0_81, %c0_82] : memref<16x32x64xbf16, #tpu.memory_space<vmem>>, vector<1x32x64xbf16>
      %103 = vector.shape_cast %102 : vector<1x32x64xbf16> to vector<32x64xbf16>
      %cst_83 = arith.constant dense<0.000000e+00> : vector<9x64xf32>
      %104 = tpu.matmul %101, %103, %cst_83 {dimension_numbers = #tpu.dot_dimension_numbers<[1], [0], [0], [1], [0, 0, 1, 1], [], []>} : vector<9x32xbf16>, vector<32x64xbf16>, vector<9x64xf32> -> vector<9x64xf32>
      %105 = arith.addf %96, %104 : vector<9x64xf32>
      %106 = arith.index_cast %98 : i32 to index
      %c0_84 = arith.constant 0 : index
      %c0_85 = arith.constant 0 : index
      %107 = vector.load %arg11[%106, %c0_84, %c0_85] : memref<20x10x32xbf16, #tpu.memory_space<vmem>>, vector<1x9x32xbf16>
      %108 = vector.shape_cast %107 : vector<1x9x32xbf16> to vector<9x32xbf16>
      %c13 = arith.constant 13 : index
      %c0_86 = arith.constant 0 : index
      %c0_87 = arith.constant 0 : index
      %109 = vector.load %arg5[%c13, %c0_86, %c0_87] : memref<16x32x64xbf16, #tpu.memory_space<vmem>>, vector<1x32x64xbf16>
      %110 = vector.shape_cast %109 : vector<1x32x64xbf16> to vector<32x64xbf16>
      %cst_88 = arith.constant dense<0.000000e+00> : vector<9x64xf32>
      %111 = tpu.matmul %108, %110, %cst_88 {dimension_numbers = #tpu.dot_dimension_numbers<[1], [0], [0], [1], [0, 0, 1, 1], [], []>} : vector<9x32xbf16>, vector<32x64xbf16>, vector<9x64xf32> -> vector<9x64xf32>
      %112 = arith.addf %105, %111 : vector<9x64xf32>
      %113 = arith.index_cast %98 : i32 to index
      %c1_89 = arith.constant 1 : index
      %c0_90 = arith.constant 0 : index
      %114 = vector.load %arg10[%113, %c1_89, %c0_90] : memref<20x10x32xbf16, #tpu.memory_space<vmem>>, vector<1x9x32xbf16>
      %115 = vector.shape_cast %114 : vector<1x9x32xbf16> to vector<9x32xbf16>
      %c14 = arith.constant 14 : index
      %c0_91 = arith.constant 0 : index
      %c0_92 = arith.constant 0 : index
      %116 = vector.load %arg5[%c14, %c0_91, %c0_92] : memref<16x32x64xbf16, #tpu.memory_space<vmem>>, vector<1x32x64xbf16>
      %117 = vector.shape_cast %116 : vector<1x32x64xbf16> to vector<32x64xbf16>
      %cst_93 = arith.constant dense<0.000000e+00> : vector<9x64xf32>
      %118 = tpu.matmul %115, %117, %cst_93 {dimension_numbers = #tpu.dot_dimension_numbers<[1], [0], [0], [1], [0, 0, 1, 1], [], []>} : vector<9x32xbf16>, vector<32x64xbf16>, vector<9x64xf32> -> vector<9x64xf32>
      %119 = arith.addf %112, %118 : vector<9x64xf32>
      %120 = arith.index_cast %98 : i32 to index
      %c1_94 = arith.constant 1 : index
      %c0_95 = arith.constant 0 : index
      %121 = vector.load %arg11[%120, %c1_94, %c0_95] : memref<20x10x32xbf16, #tpu.memory_space<vmem>>, vector<1x9x32xbf16>
      %122 = vector.shape_cast %121 : vector<1x9x32xbf16> to vector<9x32xbf16>
      %c15 = arith.constant 15 : index
      %c0_96 = arith.constant 0 : index
      %c0_97 = arith.constant 0 : index
      %123 = vector.load %arg5[%c15, %c0_96, %c0_97] : memref<16x32x64xbf16, #tpu.memory_space<vmem>>, vector<1x32x64xbf16>
      %124 = vector.shape_cast %123 : vector<1x32x64xbf16> to vector<32x64xbf16>
      %cst_98 = arith.constant dense<0.000000e+00> : vector<9x64xf32>
      %125 = tpu.matmul %122, %124, %cst_98 {dimension_numbers = #tpu.dot_dimension_numbers<[1], [0], [0], [1], [0, 0, 1, 1], [], []>} : vector<9x32xbf16>, vector<32x64xbf16>, vector<9x64xf32> -> vector<9x64xf32>
      %126 = arith.addf %119, %125 : vector<9x64xf32>
      %127 = vector.broadcast %2 : vector<1x64xf32> to vector<9x64xf32>
      %128 = arith.addf %126, %127 : vector<9x64xf32>
      %cst_99 = arith.constant 0.000000e+00 : f32
      %129 = vector.broadcast %cst_99 : f32 to vector<9x64xf32>
      %130 = arith.maximumf %128, %129 : vector<9x64xf32>
      %131 = arith.truncf %130 : vector<9x64xf32> to vector<9x64xbf16>
      %132 = arith.index_cast %arg13 : i32 to index
      %c0_100 = arith.constant 0 : index
      %c0_101 = arith.constant 0 : index
      %133 = vector.load %arg12[%132, %c0_100, %c0_101] : memref<9x9x64xbf16, #tpu.memory_space<vmem>>, vector<1x9x64xbf16>
      %134 = vector.shape_cast %133 : vector<1x9x64xbf16> to vector<9x64xbf16>
      %135 = vector.shape_cast %131 : vector<9x64xbf16> to vector<1x9x64xbf16>
      tpu.vector_store %arg12[%132, %c0_100, %c0_101], %135 {strides = array<i32>} : memref<9x9x64xbf16, #tpu.memory_space<vmem>>, vector<1x9x64xbf16>,
    }
    %c9_i32_6 = arith.constant 9 : i32
    %c0_7 = arith.constant 0 : index
    %c0_8 = arith.constant 0 : index
    %4 = vector.load %arg8[%c0_7, %c0_8] : memref<1x32xf32, #tpu.memory_space<vmem>>, vector<1x32xf32>
    %c0_i32_9 = arith.constant 0 : i32
    %c7_i32 = arith.constant 7 : i32
    %5 = arith.addi %c0_i32_9, %c7_i32 : i32
    %c1_i32_10 = arith.constant 1 : i32
    scf.for %arg13 = %c0_i32_9 to %5 step %c1_i32_10  : i32 {
      %cst = arith.constant 0.000000e+00 : f32
      %6 = vector.broadcast %cst : f32 to vector<7x32xf32>
      %c0_i32_12 = arith.constant 0 : i32
      %7 = arith.addi %arg13, %c0_i32_12 : i32
      %8 = arith.index_cast %7 : i32 to index
      %c0_13 = arith.constant 0 : index
      %c0_14 = arith.constant 0 : index
      %9 = vector.load %arg12[%8, %c0_13, %c0_14] : memref<9x9x64xbf16, #tpu.memory_space<vmem>>, vector<1x7x64xbf16>
      %10 = vector.shape_cast %9 : vector<1x7x64xbf16> to vector<7x64xbf16>
      %c0_15 = arith.constant 0 : index
      %c0_16 = arith.constant 0 : index
      %c0_17 = arith.constant 0 : index
      %11 = vector.load %arg7[%c0_15, %c0_16, %c0_17] : memref<9x64x32xbf16, #tpu.memory_space<vmem>>, vector<1x64x32xbf16>
      %12 = vector.shape_cast %11 : vector<1x64x32xbf16> to vector<64x32xbf16>
      %cst_18 = arith.constant dense<0.000000e+00> : vector<7x32xf32>
      %13 = tpu.matmul %10, %12, %cst_18 {dimension_numbers = #tpu.dot_dimension_numbers<[1], [0], [0], [1], [0, 0, 1, 1], [], []>} : vector<7x64xbf16>, vector<64x32xbf16>, vector<7x32xf32> -> vector<7x32xf32>
      %14 = arith.addf %6, %13 : vector<7x32xf32>
      %c0_i32_19 = arith.constant 0 : i32
      %15 = arith.addi %arg13, %c0_i32_19 : i32
      %16 = arith.index_cast %15 : i32 to index
      %c1 = arith.constant 1 : index
      %c0_20 = arith.constant 0 : index
      %17 = vector.load %arg12[%16, %c1, %c0_20] : memref<9x9x64xbf16, #tpu.memory_space<vmem>>, vector<1x7x64xbf16>
      %18 = vector.shape_cast %17 : vector<1x7x64xbf16> to vector<7x64xbf16>
      %c1_21 = arith.constant 1 : index
      %c0_22 = arith.constant 0 : index
      %c0_23 = arith.constant 0 : index
      %19 = vector.load %arg7[%c1_21, %c0_22, %c0_23] : memref<9x64x32xbf16, #tpu.memory_space<vmem>>, vector<1x64x32xbf16>
      %20 = vector.shape_cast %19 : vector<1x64x32xbf16> to vector<64x32xbf16>
      %cst_24 = arith.constant dense<0.000000e+00> : vector<7x32xf32>
      %21 = tpu.matmul %18, %20, %cst_24 {dimension_numbers = #tpu.dot_dimension_numbers<[1], [0], [0], [1], [0, 0, 1, 1], [], []>} : vector<7x64xbf16>, vector<64x32xbf16>, vector<7x32xf32> -> vector<7x32xf32>
      %22 = arith.addf %14, %21 : vector<7x32xf32>
      %c0_i32_25 = arith.constant 0 : i32
      %23 = arith.addi %arg13, %c0_i32_25 : i32
      %24 = arith.index_cast %23 : i32 to index
      %c2 = arith.constant 2 : index
      %c0_26 = arith.constant 0 : index
      %25 = vector.load %arg12[%24, %c2, %c0_26] : memref<9x9x64xbf16, #tpu.memory_space<vmem>>, vector<1x7x64xbf16>
      %26 = vector.shape_cast %25 : vector<1x7x64xbf16> to vector<7x64xbf16>
      %c2_27 = arith.constant 2 : index
      %c0_28 = arith.constant 0 : index
      %c0_29 = arith.constant 0 : index
      %27 = vector.load %arg7[%c2_27, %c0_28, %c0_29] : memref<9x64x32xbf16, #tpu.memory_space<vmem>>, vector<1x64x32xbf16>
      %28 = vector.shape_cast %27 : vector<1x64x32xbf16> to vector<64x32xbf16>
      %cst_30 = arith.constant dense<0.000000e+00> : vector<7x32xf32>
      %29 = tpu.matmul %26, %28, %cst_30 {dimension_numbers = #tpu.dot_dimension_numbers<[1], [0], [0], [1], [0, 0, 1, 1], [], []>} : vector<7x64xbf16>, vector<64x32xbf16>, vector<7x32xf32> -> vector<7x32xf32>
      %30 = arith.addf %22, %29 : vector<7x32xf32>
      %c1_i32_31 = arith.constant 1 : i32
      %31 = arith.addi %arg13, %c1_i32_31 : i32
      %32 = arith.index_cast %31 : i32 to index
      %c0_32 = arith.constant 0 : index
      %c0_33 = arith.constant 0 : index
      %33 = vector.load %arg12[%32, %c0_32, %c0_33] : memref<9x9x64xbf16, #tpu.memory_space<vmem>>, vector<1x7x64xbf16>
      %34 = vector.shape_cast %33 : vector<1x7x64xbf16> to vector<7x64xbf16>
      %c3 = arith.constant 3 : index
      %c0_34 = arith.constant 0 : index
      %c0_35 = arith.constant 0 : index
      %35 = vector.load %arg7[%c3, %c0_34, %c0_35] : memref<9x64x32xbf16, #tpu.memory_space<vmem>>, vector<1x64x32xbf16>
      %36 = vector.shape_cast %35 : vector<1x64x32xbf16> to vector<64x32xbf16>
      %cst_36 = arith.constant dense<0.000000e+00> : vector<7x32xf32>
      %37 = tpu.matmul %34, %36, %cst_36 {dimension_numbers = #tpu.dot_dimension_numbers<[1], [0], [0], [1], [0, 0, 1, 1], [], []>} : vector<7x64xbf16>, vector<64x32xbf16>, vector<7x32xf32> -> vector<7x32xf32>
      %38 = arith.addf %30, %37 : vector<7x32xf32>
      %c1_i32_37 = arith.constant 1 : i32
      %39 = arith.addi %arg13, %c1_i32_37 : i32
      %40 = arith.index_cast %39 : i32 to index
      %c1_38 = arith.constant 1 : index
      %c0_39 = arith.constant 0 : index
      %41 = vector.load %arg12[%40, %c1_38, %c0_39] : memref<9x9x64xbf16, #tpu.memory_space<vmem>>, vector<1x7x64xbf16>
      %42 = vector.shape_cast %41 : vector<1x7x64xbf16> to vector<7x64xbf16>
      %c4 = arith.constant 4 : index
      %c0_40 = arith.constant 0 : index
      %c0_41 = arith.constant 0 : index
      %43 = vector.load %arg7[%c4, %c0_40, %c0_41] : memref<9x64x32xbf16, #tpu.memory_space<vmem>>, vector<1x64x32xbf16>
      %44 = vector.shape_cast %43 : vector<1x64x32xbf16> to vector<64x32xbf16>
      %cst_42 = arith.constant dense<0.000000e+00> : vector<7x32xf32>
      %45 = tpu.matmul %42, %44, %cst_42 {dimension_numbers = #tpu.dot_dimension_numbers<[1], [0], [0], [1], [0, 0, 1, 1], [], []>} : vector<7x64xbf16>, vector<64x32xbf16>, vector<7x32xf32> -> vector<7x32xf32>
      %46 = arith.addf %38, %45 : vector<7x32xf32>
      %c1_i32_43 = arith.constant 1 : i32
      %47 = arith.addi %arg13, %c1_i32_43 : i32
      %48 = arith.index_cast %47 : i32 to index
      %c2_44 = arith.constant 2 : index
      %c0_45 = arith.constant 0 : index
      %49 = vector.load %arg12[%48, %c2_44, %c0_45] : memref<9x9x64xbf16, #tpu.memory_space<vmem>>, vector<1x7x64xbf16>
      %50 = vector.shape_cast %49 : vector<1x7x64xbf16> to vector<7x64xbf16>
      %c5 = arith.constant 5 : index
      %c0_46 = arith.constant 0 : index
      %c0_47 = arith.constant 0 : index
      %51 = vector.load %arg7[%c5, %c0_46, %c0_47] : memref<9x64x32xbf16, #tpu.memory_space<vmem>>, vector<1x64x32xbf16>
      %52 = vector.shape_cast %51 : vector<1x64x32xbf16> to vector<64x32xbf16>
      %cst_48 = arith.constant dense<0.000000e+00> : vector<7x32xf32>
      %53 = tpu.matmul %50, %52, %cst_48 {dimension_numbers = #tpu.dot_dimension_numbers<[1], [0], [0], [1], [0, 0, 1, 1], [], []>} : vector<7x64xbf16>, vector<64x32xbf16>, vector<7x32xf32> -> vector<7x32xf32>
      %54 = arith.addf %46, %53 : vector<7x32xf32>
      %c2_i32 = arith.constant 2 : i32
      %55 = arith.addi %arg13, %c2_i32 : i32
      %56 = arith.index_cast %55 : i32 to index
      %c0_49 = arith.constant 0 : index
      %c0_50 = arith.constant 0 : index
      %57 = vector.load %arg12[%56, %c0_49, %c0_50] : memref<9x9x64xbf16, #tpu.memory_space<vmem>>, vector<1x7x64xbf16>
      %58 = vector.shape_cast %57 : vector<1x7x64xbf16> to vector<7x64xbf16>
      %c6 = arith.constant 6 : index
      %c0_51 = arith.constant 0 : index
      %c0_52 = arith.constant 0 : index
      %59 = vector.load %arg7[%c6, %c0_51, %c0_52] : memref<9x64x32xbf16, #tpu.memory_space<vmem>>, vector<1x64x32xbf16>
      %60 = vector.shape_cast %59 : vector<1x64x32xbf16> to vector<64x32xbf16>
      %cst_53 = arith.constant dense<0.000000e+00> : vector<7x32xf32>
      %61 = tpu.matmul %58, %60, %cst_53 {dimension_numbers = #tpu.dot_dimension_numbers<[1], [0], [0], [1], [0, 0, 1, 1], [], []>} : vector<7x64xbf16>, vector<64x32xbf16>, vector<7x32xf32> -> vector<7x32xf32>
      %62 = arith.addf %54, %61 : vector<7x32xf32>
      %c2_i32_54 = arith.constant 2 : i32
      %63 = arith.addi %arg13, %c2_i32_54 : i32
      %64 = arith.index_cast %63 : i32 to index
      %c1_55 = arith.constant 1 : index
      %c0_56 = arith.constant 0 : index
      %65 = vector.load %arg12[%64, %c1_55, %c0_56] : memref<9x9x64xbf16, #tpu.memory_space<vmem>>, vector<1x7x64xbf16>
      %66 = vector.shape_cast %65 : vector<1x7x64xbf16> to vector<7x64xbf16>
      %c7 = arith.constant 7 : index
      %c0_57 = arith.constant 0 : index
      %c0_58 = arith.constant 0 : index
      %67 = vector.load %arg7[%c7, %c0_57, %c0_58] : memref<9x64x32xbf16, #tpu.memory_space<vmem>>, vector<1x64x32xbf16>
      %68 = vector.shape_cast %67 : vector<1x64x32xbf16> to vector<64x32xbf16>
      %cst_59 = arith.constant dense<0.000000e+00> : vector<7x32xf32>
      %69 = tpu.matmul %66, %68, %cst_59 {dimension_numbers = #tpu.dot_dimension_numbers<[1], [0], [0], [1], [0, 0, 1, 1], [], []>} : vector<7x64xbf16>, vector<64x32xbf16>, vector<7x32xf32> -> vector<7x32xf32>
      %70 = arith.addf %62, %69 : vector<7x32xf32>
      %c2_i32_60 = arith.constant 2 : i32
      %71 = arith.addi %arg13, %c2_i32_60 : i32
      %72 = arith.index_cast %71 : i32 to index
      %c2_61 = arith.constant 2 : index
      %c0_62 = arith.constant 0 : index
      %73 = vector.load %arg12[%72, %c2_61, %c0_62] : memref<9x9x64xbf16, #tpu.memory_space<vmem>>, vector<1x7x64xbf16>
      %74 = vector.shape_cast %73 : vector<1x7x64xbf16> to vector<7x64xbf16>
      %c8 = arith.constant 8 : index
      %c0_63 = arith.constant 0 : index
      %c0_64 = arith.constant 0 : index
      %75 = vector.load %arg7[%c8, %c0_63, %c0_64] : memref<9x64x32xbf16, #tpu.memory_space<vmem>>, vector<1x64x32xbf16>
      %76 = vector.shape_cast %75 : vector<1x64x32xbf16> to vector<64x32xbf16>
      %cst_65 = arith.constant dense<0.000000e+00> : vector<7x32xf32>
      %77 = tpu.matmul %74, %76, %cst_65 {dimension_numbers = #tpu.dot_dimension_numbers<[1], [0], [0], [1], [0, 0, 1, 1], [], []>} : vector<7x64xbf16>, vector<64x32xbf16>, vector<7x32xf32> -> vector<7x32xf32>
      %78 = arith.addf %70, %77 : vector<7x32xf32>
      %79 = vector.broadcast %4 : vector<1x32xf32> to vector<7x32xf32>
      %80 = arith.addf %78, %79 : vector<7x32xf32>
      %cst_66 = arith.constant 0.000000e+00 : f32
      %81 = vector.broadcast %cst_66 : f32 to vector<7x32xf32>
      %82 = arith.maximumf %80, %81 : vector<7x32xf32>
      %83 = arith.truncf %82 : vector<7x32xf32> to vector<7x32xbf16>
      %c0_67 = arith.constant 0 : index
      %84 = arith.index_cast %arg13 : i32 to index
      %c0_68 = arith.constant 0 : index
      %c0_69 = arith.constant 0 : index
      %85 = vector.load %arg9[%c0_67, %84, %c0_68, %c0_69] : memref<1x7x7x32xbf16, #tpu.memory_space<vmem>>, vector<1x1x7x32xbf16>
      %86 = vector.shape_cast %85 : vector<1x1x7x32xbf16> to vector<7x32xbf16>
      %87 = vector.shape_cast %83 : vector<7x32xbf16> to vector<1x1x7x32xbf16>
      tpu.vector_store %arg9[%c0_67, %84, %c0_68, %c0_69], %87 {strides = array<i32>} : memref<1x7x7x32xbf16, #tpu.memory_space<vmem>>, vector<1x1x7x32xbf16>,
    }
    %c7_i32_11 = arith.constant 7 : i32
    return
  }
  func.func @transform_0(%arg0: i32) -> (i32, i32, i32, i32) {
    %c0_i32 = arith.constant 0 : i32
    %c0_i32_0 = arith.constant 0 : i32
    %c0_i32_1 = arith.constant 0 : i32
    %c0_i32_2 = arith.constant 0 : i32
    return %arg0, %c0_i32, %c0_i32_0, %c0_i32_1 : i32, i32, i32, i32
  }
  func.func @transform_1(%arg0: i32) -> (i32, i32, i32, i32) {
    %c0_i32 = arith.constant 0 : i32
    %c0_i32_0 = arith.constant 0 : i32
    %c0_i32_1 = arith.constant 0 : i32
    %c0_i32_2 = arith.constant 0 : i32
    return %arg0, %c0_i32, %c0_i32_0, %c0_i32_1 : i32, i32, i32, i32
  }
  func.func @transform_2(%arg0: i32) -> (i32, i32, i32) {
    %c0_i32 = arith.constant 0 : i32
    %c0_i32_0 = arith.constant 0 : i32
    %c0_i32_1 = arith.constant 0 : i32
    %c0_i32_2 = arith.constant 0 : i32
    return %c0_i32, %c0_i32_0, %c0_i32_1 : i32, i32, i32
  }
  func.func @transform_3(%arg0: i32) -> (i32, i32) {
    %c0_i32 = arith.constant 0 : i32
    %c0_i32_0 = arith.constant 0 : i32
    %c0_i32_1 = arith.constant 0 : i32
    return %c0_i32, %c0_i32_0 : i32, i32
  }
  func.func @transform_4(%arg0: i32) -> (i32, i32, i32) {
    %c0_i32 = arith.constant 0 : i32
    %c0_i32_0 = arith.constant 0 : i32
    %c0_i32_1 = arith.constant 0 : i32
    %c0_i32_2 = arith.constant 0 : i32
    return %c0_i32, %c0_i32_0, %c0_i32_1 : i32, i32, i32
  }
  func.func @transform_5(%arg0: i32) -> (i32, i32) {
    %c0_i32 = arith.constant 0 : i32
    %c0_i32_0 = arith.constant 0 : i32
    %c0_i32_1 = arith.constant 0 : i32
    return %c0_i32, %c0_i32_0 : i32, i32
  }
  func.func @transform_6(%arg0: i32) -> (i32, i32, i32) {
    %c0_i32 = arith.constant 0 : i32
    %c0_i32_0 = arith.constant 0 : i32
    %c0_i32_1 = arith.constant 0 : i32
    %c0_i32_2 = arith.constant 0 : i32
    return %c0_i32, %c0_i32_0, %c0_i32_1 : i32, i32, i32
  }
  func.func @transform_7(%arg0: i32) -> (i32, i32) {
    %c0_i32 = arith.constant 0 : i32
    %c0_i32_0 = arith.constant 0 : i32
    %c0_i32_1 = arith.constant 0 : i32
    return %c0_i32, %c0_i32_0 : i32, i32
  }
  func.func @transform_8(%arg0: i32) -> (i32, i32, i32, i32) {
    %c0_i32 = arith.constant 0 : i32
    %c0_i32_0 = arith.constant 0 : i32
    %c0_i32_1 = arith.constant 0 : i32
    %c0_i32_2 = arith.constant 0 : i32
    return %arg0, %c0_i32, %c0_i32_0, %c0_i32_1 : i32, i32, i32, i32
  }
}

module attributes {stable_mosaic.version = 11 : i64} {
  func.func @_head_kernel(%arg0: i32, %arg1: memref<8x1568xbf16, #tpu.memory_space<vmem>>, %arg2: memref<1568x512xbf16, #tpu.memory_space<vmem>>, %arg3: memref<1x512xf32, #tpu.memory_space<vmem>>, %arg4: memref<512x128xbf16, #tpu.memory_space<vmem>>, %arg5: memref<1x128xf32, #tpu.memory_space<vmem>>, %arg6: memref<8x128xf32, #tpu.memory_space<vmem>>) attributes {dimension_semantics = [#tpu.dimension_semantics<parallel>], iteration_bounds = array<i64: 1>, scalar_prefetch = 0 : i64, scratch_operands = 0 : i64, tpu.core_type = #tpu.core_type<tc>, window_params = [{transform_indices = @transform_0, window_bounds = array<i64: 8, 1568>}, {pipeline_mode = #tpu.pipeline_mode<synchronous>, transform_indices = @transform_1, window_bounds = array<i64: 1568, 512>}, {pipeline_mode = #tpu.pipeline_mode<synchronous>, transform_indices = @transform_2, window_bounds = array<i64: 1, 512>}, {pipeline_mode = #tpu.pipeline_mode<synchronous>, transform_indices = @transform_3, window_bounds = array<i64: 512, 128>}, {pipeline_mode = #tpu.pipeline_mode<synchronous>, transform_indices = @transform_4, window_bounds = array<i64: 1, 128>}, {transform_indices = @transform_5, window_bounds = array<i64: 8, 128>}]} {
    %c0 = arith.constant 0 : index
    %c0_0 = arith.constant 0 : index
    %0 = vector.load %arg1[%c0, %c0_0] : memref<8x1568xbf16, #tpu.memory_space<vmem>>, vector<8x1568xbf16>
    %c0_1 = arith.constant 0 : index
    %c0_2 = arith.constant 0 : index
    %1 = vector.load %arg2[%c0_1, %c0_2] : memref<1568x512xbf16, #tpu.memory_space<vmem>>, vector<1568x512xbf16>
    %cst = arith.constant dense<0.000000e+00> : vector<8x512xf32>
    %2 = tpu.matmul %0, %1, %cst {dimension_numbers = #tpu.dot_dimension_numbers<[1], [0], [0], [1], [0, 0, 1, 1], [], []>} : vector<8x1568xbf16>, vector<1568x512xbf16>, vector<8x512xf32> -> vector<8x512xf32>
    %c0_3 = arith.constant 0 : index
    %c0_4 = arith.constant 0 : index
    %3 = vector.load %arg3[%c0_3, %c0_4] : memref<1x512xf32, #tpu.memory_space<vmem>>, vector<1x512xf32>
    %4 = vector.broadcast %3 : vector<1x512xf32> to vector<8x512xf32>
    %5 = arith.addf %2, %4 : vector<8x512xf32>
    %cst_5 = arith.constant 0.000000e+00 : f32
    %6 = vector.broadcast %cst_5 : f32 to vector<8x512xf32>
    %7 = arith.maximumf %5, %6 : vector<8x512xf32>
    %8 = arith.truncf %7 : vector<8x512xf32> to vector<8x512xbf16>
    %c0_6 = arith.constant 0 : index
    %c0_7 = arith.constant 0 : index
    %9 = vector.load %arg4[%c0_6, %c0_7] : memref<512x128xbf16, #tpu.memory_space<vmem>>, vector<512x128xbf16>
    %cst_8 = arith.constant dense<0.000000e+00> : vector<8x128xf32>
    %10 = tpu.matmul %8, %9, %cst_8 {dimension_numbers = #tpu.dot_dimension_numbers<[1], [0], [0], [1], [0, 0, 1, 1], [], []>} : vector<8x512xbf16>, vector<512x128xbf16>, vector<8x128xf32> -> vector<8x128xf32>
    %c0_9 = arith.constant 0 : index
    %c0_10 = arith.constant 0 : index
    %11 = vector.load %arg5[%c0_9, %c0_10] : memref<1x128xf32, #tpu.memory_space<vmem>>, vector<1x128xf32>
    %12 = vector.broadcast %11 : vector<1x128xf32> to vector<8x128xf32>
    %13 = arith.addf %10, %12 : vector<8x128xf32>
    %c0_11 = arith.constant 0 : index
    %c0_12 = arith.constant 0 : index
    %14 = vector.load %arg6[%c0_11, %c0_12] : memref<8x128xf32, #tpu.memory_space<vmem>>, vector<8x128xf32>
    tpu.vector_store %arg6[%c0_11, %c0_12], %13 {strides = array<i32>} : memref<8x128xf32, #tpu.memory_space<vmem>>, vector<8x128xf32>,
    return
  }
  func.func @transform_0(%arg0: i32) -> (i32, i32) {
    %c0_i32 = arith.constant 0 : i32
    %c0_i32_0 = arith.constant 0 : i32
    return %arg0, %c0_i32 : i32, i32
  }
  func.func @transform_1(%arg0: i32) -> (i32, i32) {
    %c0_i32 = arith.constant 0 : i32
    %c0_i32_0 = arith.constant 0 : i32
    %c0_i32_1 = arith.constant 0 : i32
    return %c0_i32, %c0_i32_0 : i32, i32
  }
  func.func @transform_2(%arg0: i32) -> (i32, i32) {
    %c0_i32 = arith.constant 0 : i32
    %c0_i32_0 = arith.constant 0 : i32
    %c0_i32_1 = arith.constant 0 : i32
    return %c0_i32, %c0_i32_0 : i32, i32
  }
  func.func @transform_3(%arg0: i32) -> (i32, i32) {
    %c0_i32 = arith.constant 0 : i32
    %c0_i32_0 = arith.constant 0 : i32
    %c0_i32_1 = arith.constant 0 : i32
    return %c0_i32, %c0_i32_0 : i32, i32
  }
  func.func @transform_4(%arg0: i32) -> (i32, i32) {
    %c0_i32 = arith.constant 0 : i32
    %c0_i32_0 = arith.constant 0 : i32
    %c0_i32_1 = arith.constant 0 : i32
    return %c0_i32, %c0_i32_0 : i32, i32
  }
  func.func @transform_5(%arg0: i32) -> (i32, i32) {
    %c0_i32 = arith.constant 0 : i32
    %c0_i32_0 = arith.constant 0 : i32
    return %arg0, %c0_i32 : i32, i32
  }
}

</mosaic_0001>

<bundles_post_ra>
// kernel: cnn_base.2
= control target key start
LH: loop header
LB: loop body
LE: loop exit
PB: predicated region body
PF: predicated region fallthrough
CT: control target
= control target key end

     0   :  { %s2943_s27 = smov 0   ;;  %s3358_s0 = inlined_call_operand.vmem [shape: bf16[2,21,11,64], index: 0, kind: input, shape index: {}]   ;;  %s3359_s1 = inlined_call_operand.vmem [shape: bf16[2,21,10,64], index: 1, kind: input, shape index: {}]   ;;  %s3360_s2 = inlined_call_operand.vmem [shape: bf16[4,64,32], index: 2, kind: input, shape index: {}]   ;;  %s3361_s3 = inlined_call_operand.vmem [shape: f32[1,32], index: 3, kind: input, shape index: {}, may-alias: {3,7}]   ;;  %s3362_s4 = inlined_call_operand.vmem [shape: bf16[16,32,64], index: 4, kind: input, shape index: {}]   ;;  %s3363_s5 = inlined_call_operand.vmem [shape: f32[1,64], index: 5, kind: input, shape index: {}]   ;;  %s3364_s6 = inlined_call_operand.vmem [shape: bf16[9,64,32], index: 6, kind: input, shape index: {}]   ;;  %s3365_s7 = inlined_call_operand.vmem [shape: f32[1,32], index: 7, kind: input, shape index: {}, may-alias: {3,7}]   ;;  %s3366_s8 = inlined_call_operand.vmem [shape: bf16[2,7,7,32], index: 8, kind: output, shape index: {}]  }
   0x1 LB: > { %s2089_s28 = sadd.s32 4294967295, %s2884_s27   ;;  %p2093_p0 = scmp.ge.s32.totalorder %s2884_s27, 1  ;;  %s2884_s27 = sphi %s2943_s27, %s18_s27  }
   0x2   : > { %p272_p1 = scmp.lt.s32.totalorder %s2884_s27, 3 }
   0x4   : > { %p273_p2 = pnand %p2093_p0, %p272_p1 }
   0x5   : > { %p311_p3 = scmp.lt.s32.totalorder (!%p273_p2), %s2089_s28, 1  ;;  %s2971_s20 = smov (!%p273_p2), 0  }
   0x6   : > { %276 = sbr.rel (%p273_p2) target bundleno = 598 (0x256), region = 52 }
   0xb   : > { %v2954_v0 = vld [vmem:[%s3361_s3] sm:$0x1]  ;;  %s3368_s28 = smov (!%p311_p3, %s2089_s28), 1 }
   0xc   : > { %s2832_s9 = smul.u32 168, %s3368_s28 }
   0xd   : > { %s2833_s10 = smul.u32 28, %s3368_s28 }
   0xe   : > { %s2959_s13 = scalar_lea.vmem %s3358_s0, %s2832_s9  ;;  %s2964_s16 = scalar_lea.vmem %s3359_s1, %s2832_s9 }
   0xf   : > { %s2969_s19 = scalar_lea.vmem %s3366_s8, %s2833_s10 }
  0x10 LB: >> { %v2730_v1 = vld [vmem:[%s3360_s2 + $0x38] sm:$0xff]  ;;  %v2729_v3 = vld [vmem:[%s3360_s2 + $0x30] sm:$0xff]  ;;  %s2989_s30 = sshll.u32 %s2888_s20, 3  ;;  %v2728_v8 = vld [vmem:[%s3360_s2 + $0x28] sm:$0xff]  ;;  %vm390_vm0 = vcmask 523264   ;;  %v666_v59 = vperm.slane %v2954_v0, 0  ;;  %s2888_s20 = sphi %s2971_s20, %s333_s20  }
  0x11   : >> { %v2726_v2 = vld [vmem:[%s3360_s2 + $0x18] sm:$0xff]  ;;  %398 = vmatpush.bf16.msra.mxu0 %v2730_v1  ;;  %v2725_v4 = vld [vmem:[%s3360_s2 + $0x10] sm:$0xff]  ;;  %471 = vmatpush.bf16.msra.mxu2 %v2730_v1  ;;  %s2993_s9 = scalar_lea.vmem %s2959_s13, %s2989_s30  ;;  %v2724_v9 = vld [vmem:[%s3360_s2 + $0x8] sm:$0xff]  ;;  %s3006_s15 = scalar_lea.vmem %s2964_s16, %s2989_s30  ;;  %vm676_vm1 = vcmask 257024   ;;  %vm678_vm2 = vcmask 253952  }
  0x12   : >> { %444 = vmatpush.bf16.msra.mxu1 %v2726_v2  ;;  %485 = vmatpush.bf16.msra.mxu3 %v2726_v2  ;;  %v337_v5 = vld [vmem:[%s2993_s9] sm:$0xf]  ;;  %v339_v7 = vld [vmem:[%s2993_s9 + $0x4] sm:$0x3]  ;;  %v2735_v21 = vld [vmem:[%s3360_s2 + $0x58] sm:$0xff]  ;;  %s333_s20 = sadd.s32 1, %s2888_s20  }
  0x13   : >> { %v410_v6 = vunpack.c.l.b16 %v337_v5  ;;  %v338_v10 = vld [vmem:[%s2993_s9 + $0x4] sm:$0x1]  ;;  %v455_v11 = vunpack.c.l.b16 %v339_v7  ;;  %v2110_v16 = vld [vmem:[%s3006_s15] sm:$0xf]  ;;  %v2149_v22 = vld [vmem:[%s2993_s9 + $0x8] sm:$0xf] }
  0x14   : >> { %v2727_v13 = vld [vmem:[%s3360_s2 + $0x20] sm:$0xff]  ;;  %v411_v15 = vunpack.c.l.b16 %v338_v10  ;;  %v2151_v23 = vld [vmem:[%s2993_s9 + $0xc] sm:$0x3]  ;;  %v2739_v27 = vld [vmem:[%s3360_s2 + $0x78] sm:$0xff]  ;;  %v526_v28 = vunpack.c.l.b16 %v2149_v22  ;;  %p330_p4 = scmp.ge.s32.totalorder %s333_s20, 20  }
  0x15   : >> { %399 = vmatpush.bf16.msra.mxu0 %v2729_v3  ;;  %472 = vmatpush.bf16.msra.mxu2 %v2729_v3  ;;  %v456_v12 = vpack.c.b16 %v455_v11, %v410_v6  ;;  %v2723_v14 = vld [vmem:[%s3360_s2] sm:$0xff]  ;;  %v637_v29 = vunpack.c.l.b16 %v2151_v23  ;;  %v2734_v30 = vld [vmem:[%s3360_s2 + $0x50] sm:$0xff]  ;;  %v2733_v33 = vld [vmem:[%s3360_s2 + $0x48] sm:$0xff] }
  0x16   : >> { %445 = vmatpush.bf16.msra.mxu1 %v2725_v4  ;;  %486 = vmatpush.bf16.msra.mxu3 %v2725_v4  ;;  %v2722_v17 = vld [vmem:[%s3006_s15] sm:$0x10]  ;;  %v412_v25 = vpack.c.b16 %v411_v15, %v410_v6  ;;  %v2738_v31 = vld [vmem:[%s3360_s2 + $0x70] sm:$0xff]  ;;  %v2150_v34 = vld [vmem:[%s2993_s9 + $0xc] sm:$0x1]  ;;  %s675_s9 = scalar_lea.vmem [#allocation2], %s2989_s30 }
  0x17   : >> { %v458_v18 = vshrl.u32 %v456_v12, 16  ;;  %v460_v19 = vshll.u32 %v456_v12, 16  ;;  %v2111_v24 = vor.u32 %v2722_v17, %v2110_v16  ;;  %v638_v32 = vpack.c.b16 %v637_v29, %v526_v28  ;;  %v2737_v35 = vld [vmem:[%s3360_s2 + $0x68] sm:$0xff]  ;;  %v2732_v37 = vld [vmem:[%s3360_s2 + $0x40] sm:$0xff] }
  0x18   : >> { %v527_v38 = vunpack.c.l.b16 %v2150_v34  ;;  %v2736_v39 = vld [vmem:[%s3360_s2 + $0x60] sm:$0xff]  ;;  %v2190_v40 = vld [vmem:[%s3006_s15 + $0x8] sm:$0xf]  ;;  %v2731_v41 = vld [vmem:[%s3006_s15 + $0x8] sm:$0x10]  ;;  %s687_s15 = scalar_lea.vmem [#allocation3], %s2989_s30 }
  0x19   : >> { %400 = vmatpush.bf16.msra.mxu0 %v2728_v8  ;;  %473 = vmatpush.bf16.msra.mxu2 %v2728_v8  ;;  %v462_v20 = vrot.slane %v460_v19, 1  ;;  %v642_v36 = vshll.u32 %v638_v32, 16  ;;  %v640_v42 = vshrl.u32 %v638_v32, 16  ;;  %v2191_v45 = vor.u32 %v2731_v41, %v2190_v40  ;;  %s3066_s30 = smov (%p330_p4), 0  }
  0x1a   : >> { %446 = vmatpush.bf16.msra.mxu1 %v2724_v9  ;;  %487 = vmatpush.bf16.msra.mxu3 %v2724_v9  ;;  %v528_v44 = vpack.c.b16 %v527_v38, %v526_v28 }
  0x1b   : >> { %v463_v26 = vor.u32 %v462_v20, %v458_v18  ;;  %v644_v43 = vrot.slane %v642_v36, 1 }
  0x1d   : >> { %401 = vmatpush.bf16.msra.mxu0 %v2727_v13  ;;  %474 = vmatpush.bf16.msra.mxu2 %v2727_v13  ;;  %v645_v46 = vor.u32 %v644_v43, %v640_v42 }
  0x1e   : >> { %447 = vmatpush.bf16.msra.mxu1 %v2723_v14  ;;  %488 = vmatpush.bf16.msra.mxu3 %v2723_v14 }
  0x20   : >> { %2128 = vmatmul.msk.bf16.vlgmr.msra.gmra.mxu0 %vm390_vm0, %v2111_v24  ;;  %2146 = vmatmul.msk.bf16.vlgmr.msra.gmra.mxu2 %vm390_vm0, %v463_v26 }
  0x21   : >> { %624 = vmatpush.bf16.msrb.mxu2 %v2735_v21  ;;  %560 = vmatpush.bf16.msrb.mxu0 %v2735_v21 }
  0x22   : >> { %2145 = vmatmul.msk.bf16.vlgmr.msra.gmra.mxu1 %vm390_vm0, %v412_v25  ;;  %2147 = vmatmul.msk.bf16.vlgmr.msra.gmra.mxu3 %vm390_vm0, %v2111_v24  ;;  %v3064_v25 = vld [vmem:[%s3363_s5] sm:$0x1] (%p330_p4) }
  0x23   : >> { %608 = vmatpush.bf16.msrb.mxu1 %v2739_v27  ;;  %653 = vmatpush.bf16.msrb.mxu3 %v2739_v27 }
  0x25   : >> { %625 = vmatpush.bf16.msrb.mxu2 %v2734_v30  ;;  %561 = vmatpush.bf16.msrb.mxu0 %v2734_v30 }
  0x27   : >> { %609 = vmatpush.bf16.msrb.mxu1 %v2738_v31  ;;  %654 = vmatpush.bf16.msrb.mxu3 %v2738_v31 }
  0x29   : >> { %626 = vmatpush.bf16.msrb.mxu2 %v2733_v33  ;;  %562 = vmatpush.bf16.msrb.mxu0 %v2733_v33 }
  0x2b   : >> { %610 = vmatpush.bf16.msrb.mxu1 %v2737_v35  ;;  %655 = vmatpush.bf16.msrb.mxu3 %v2737_v35 }
  0x2d   : >> { %627 = vmatpush.bf16.msrb.mxu2 %v2732_v37  ;;  %563 = vmatpush.bf16.msrb.mxu0 %v2732_v37 }
  0x2f   : >> { %611 = vmatpush.bf16.msrb.mxu1 %v2736_v39  ;;  %656 = vmatpush.bf16.msrb.mxu3 %v2736_v39 }
  0x30   : >> { %2187 = vmatmul.msk.bf16.vlgmr.msrb.gmra.mxu0 %vm390_vm0, %v528_v44  ;;  %2209 = vmatmul.msk.bf16.vlgmr.msrb.gmra.mxu2 %vm390_vm0, %v2191_v45 }
  0x32   : >> { %2208 = vmatmul.msk.bf16.vlgmr.msrb.gmra.mxu1 %vm390_vm0, %v2191_v45  ;;  %2210 = vmatmul.msk.bf16.vlgmr.msrb.gmra.mxu3 %vm390_vm0, %v645_v46 }
  0x9d   : >> { %v403_v47 = vpop.f32.mrf.mxu0 }
  0x9f   : >> { %v449_v48 = vpop.f32.mrf.mxu1 }
  0xa0   : >> { %v450_v53 = vadd.f32 %v449_v48, %v403_v47 }
  0xa3   : >> { %v476_v49 = vpop.f32.mrf.mxu2 }
  0xa5   : >> { %v490_v50 = vpop.f32.mrf.mxu3  ;;  %v405_v51 = vpop.f32.mrf.mxu0 }
  0xa6   : >> { %v491_v62 = vadd.f32 %v490_v50, %v476_v49 }
  0xa7   : >> { %v451_v52 = vpop.f32.mrf.mxu1 }
  0xa8   : >> { %v452_v63 = vadd.f32 %v451_v52, %v405_v51 }
  0xab   : >> { %v478_v54 = vpop.f32.mrf.mxu2 }
  0xad   : >> { %v492_v55 = vpop.f32.mrf.mxu3  ;;  %v565_v56 = vpop.f32.mrf.mxu0 }
  0xae   : >> { %v570_v57 = vadd.f32 %v565_v56, %v450_v53  ;;  %v493_v13 = vadd.f32 %v492_v55, %v478_v54 }
  0xaf   : >> { %v613_v58 = vpop.f32.mrf.mxu1 }
  0xb0   : >> { %v618_v60 = vadd.f32 %v613_v58, %v570_v57 }
  0xb2   : >> { %v668_v61 = vadd.f32 %v666_v59, %v618_v60 }
  0xb3   : >> { %v629_v2 = vpop.f32.mrf.mxu2 }
  0xb4   : >> { %v670_v1 = vmax.f32 %v668_v61, 0.0  ;;  %v634_v3 = vadd.f32 %v629_v2, %v491_v62 }
  0xb5   : >> { %v658_v4 = vpop.f32.mrf.mxu3  ;;  %v567_v5 = vpop.f32.mrf.mxu0 }
  0xb6   : >> { %v672_v6 = vpack.c.bf16 %v670_v1, %v670_v1  ;;  %v571_v7 = vadd.f32 %v567_v5, %v452_v63  ;;  %v663_v8 = vadd.f32 %v658_v4, %v634_v3 }
  0xb7   : >> { %v615_v9 = vpop.f32.mrf.mxu1 }
  0xb8   : >> { %677 = vst.msk [vmem:[%s675_s9] sm:$0xf] %vm676_vm1, %v672_v6  ;;  %v619_v10 = vadd.f32 %v615_v9, %v571_v7  ;;  %v680_v11 = vadd.f32 %v666_v59, %v663_v8 }
  0xba   : >> { %v669_v12 = vadd.f32 %v666_v59, %v619_v10  ;;  %v682_v14 = vmax.f32 %v680_v11, 0.0 }
  0xbb   : >> { %v631_v16 = vpop.f32.mrf.mxu2 }
  0xbc   : >> { %v671_v15 = vmax.f32 %v669_v12, 0.0  ;;  %v684_v17 = vpack.c.bf16 %v682_v14, %v682_v14  ;;  %v635_v18 = vadd.f32 %v631_v16, %v493_v13 }
  0xbd   : >> { %v660_v20 = vpop.f32.mrf.mxu3 }
  0xbe   : >> { %v673_v19 = vpack.c.bf16 %v671_v15, %v671_v15  ;;  %688 = vst.msk [vmem:[%s687_s15] sm:$0xf] %vm676_vm1, %v684_v17  ;;  %v664_v21 = vadd.f32 %v660_v20, %v635_v18 }
  0xc0   : >> { %679 = vst.msk [vmem:[%s675_s9 + $0x4] sm:$0x1] %vm678_vm2, %v673_v19  ;;  %v681_v22 = vadd.f32 %v666_v59, %v664_v21 }
  0xc2   : >> { %v683_v23 = vmax.f32 %v681_v22, 0.0  ;;  %332 = sbr.rel (!%p330_p4) target bundleno = 16 (0x10), region = 151 }
  0xc4   : >> { %v685_v24 = vpack.c.bf16 %v683_v23, %v683_v23 }
  0xc6   : >> { %689 = vst.msk [vmem:[%s687_s15 + $0x4] sm:$0x1] %vm678_vm2, %v685_v24 }
  0xc7 LB: >> { %v2750_v26 = vld [vmem:[%s3362_s4 + $0x18] sm:$0xff]  ;;  %v2746_v0 = vld [vmem:[%s3362_s4 + $0x8] sm:$0xff]  ;;  %v2749_v29 = vld [vmem:[%s3362_s4 + $0x10] sm:$0xff]  ;;  %s2743_s22 = sshll.u32 %s2892_s30, 4  ;;  %vm733_vm3 = vcmask 261120   ;;  %vm1408_vm4 = vcmask 519168   ;;  %s2892_s30 = sphi %s3066_s30, %s696_s30  }
  0xc8   : >> { %v2752_v27 = vld [vmem:[%s3362_s4 + $0x28] sm:$0xff]  ;;  %v2754_v28 = vld [vmem:[%s3362_s4 + $0x38] sm:$0xff]  ;;  %743 = vmatpush.bf16.msra.mxu0 %v2750_v26  ;;  %777 = vmatpush.bf16.msra.mxu1 %v2746_v0  ;;  %v2745_v30 = vld [vmem:[%s3362_s4] sm:$0xff]  ;;  %s3102_s10 = scalar_lea.vmem [#allocation3], %s2743_s22  ;;  %s3106_s20 = scalar_lea.vmem [#allocation2], %s2743_s22  ;;  %vm1410_vm5 = vcmask 516096  }
  0xc9   : >> { %v2751_v31 = vld [vmem:[%s3362_s4 + $0x20] sm:$0xff]  ;;  %817 = vmatpush.bf16.msra.mxu2 %v2752_v27  ;;  %859 = vmatpush.bf16.msra.mxu3 %v2754_v28  ;;  %v2753_v32 = vld [vmem:[%s3362_s4 + $0x30] sm:$0xff]  ;;  %v2764_v33 = vld [vmem:[%s3362_s4 + $0x68] sm:$0xff]  ;;  %vm1411_vm6 = vsmask.f32 256 }
  0xca   : >> { %v2758_v34 = vld [vmem:[%s3362_s4 + $0x48] sm:$0xff]  ;;  %v2236_v37 = vld [vmem:[%s3106_s20] sm:$0xf]  ;;  %v2744_v39 = vld [vmem:[%s3106_s20] sm:$0x10] }
  0xcb   : >> { %v2237_v40 = vor.u32 %v2744_v39, %v2236_v37  ;;  %v2766_v41 = vld [vmem:[%s3362_s4 + $0x78] sm:$0xff]  ;;  %v2763_v47 = vld [vmem:[%s3362_s4 + $0x60] sm:$0xff]  ;;  %v2761_v50 = vld [vmem:[%s3362_s4 + $0x50] sm:$0xff] }
  0xcc   : >> { %744 = vmatpush.bf16.msra.mxu0 %v2749_v29  ;;  %778 = vmatpush.bf16.msra.mxu1 %v2745_v30  ;;  %v2762_v42 = vld [vmem:[%s3362_s4 + $0x58] sm:$0xff]  ;;  %v2757_v48 = vld [vmem:[%s3362_s4 + $0x40] sm:$0xff]  ;;  %v2770_v51 = vld [vmem:[%s3362_s4 + $0x88] sm:$0xff] }
  0xcd   : >> { %v2223_v35 = vld [vmem:[%s3102_s10] sm:$0xf]  ;;  %v2748_v36 = vld [vmem:[%s3102_s10] sm:$0x10]  ;;  %818 = vmatpush.bf16.msra.mxu2 %v2751_v31  ;;  %860 = vmatpush.bf16.msra.mxu3 %v2753_v32  ;;  %v790_v45 = vshrl.u32 %v2237_v40, 16  ;;  %v792_v46 = vshll.u32 %v2237_v40, 16  ;;  %vm1412_vm7 = vmand %vm1410_vm5, %vm1411_vm6 }
  0xce   : >> { %v2224_v38 = vor.u32 %v2748_v36, %v2223_v35  ;;  %v2765_v53 = vld [vmem:[%s3362_s4 + $0x70] sm:$0xff]  ;;  %v2304_v54 = vld [vmem:[%s3102_s10 + $0x8] sm:$0xf]  ;;  %v2760_v55 = vld [vmem:[%s3102_s10 + $0x8] sm:$0x10] }
  0xcf   : >> { %2246 = vmatmul.msk.bf16.vlgmr.msra.gmra.mxu1 %vm733_vm3, %v2237_v40  ;;  %v794_v52 = vrot.slane %v792_v46, 1  ;;  %v2283_v57 = vld [vmem:[%s3106_s20 + $0x8] sm:$0xf]  ;;  %v2756_v58 = vld [vmem:[%s3106_s20 + $0x8] sm:$0x10]  ;;  %v2778_v61 = vld [vmem:[%s3362_s4 + $0xb8] sm:$0xff]  ;;  %v2305_v63 = vor.u32 %v2760_v55, %v2304_v54 }
  0xd0   : >> { %v832_v43 = vshrl.u32 %v2224_v38, 16  ;;  %v834_v44 = vshll.u32 %v2224_v38, 16  ;;  %906 = vmatpush.bf16.msrb.mxu0 %v2758_v34  ;;  %951 = vmatpush.bf16.msrb.mxu1 %v2762_v42  ;;  %v2776_v59 = vld [vmem:[%s3362_s4 + $0xa8] sm:$0xff]  ;;  %v2774_v62 = vld [vmem:[%s3362_s4 + $0x98] sm:$0xff]  ;;  %v2769_v1 = vld [vmem:[%s3362_s4 + $0x80] sm:$0xff]  ;;  %v2284_v2 = vor.u32 %v2756_v58, %v2283_v57 }
  0xd1   : >> { %993 = vmatpush.bf16.msrb.mxu2 %v2764_v33  ;;  %2233 = vmatmul.msk.bf16.vlgmr.msra.gmra.mxu0 %vm733_vm3, %v2224_v38  ;;  %v795_v60 = vor.u32 %v794_v52, %v790_v45  ;;  %v2775_v3 = vld [vmem:[%s3362_s4 + $0xa0] sm:$0xff]  ;;  %v2773_v4 = vld [vmem:[%s3362_s4 + $0x90] sm:$0xff]  ;;  %v1010_v6 = vshll.u32 %v2305_v63, 16  ;;  %v1008_v8 = vshrl.u32 %v2305_v63, 16  ;;  %v2782_v12 = vld [vmem:[%s3362_s4 + $0xc8] sm:$0xff] }
  0xd2   : >> { %v836_v49 = vrot.slane %v834_v44, 1  ;;  %1035 = vmatpush.bf16.msrb.mxu3 %v2766_v41  ;;  %v2777_v5 = vld [vmem:[%s3362_s4 + $0xb0] sm:$0xff]  ;;  %v968_v7 = vshll.u32 %v2284_v2, 16  ;;  %v966_v10 = vshrl.u32 %v2284_v2, 16  ;;  %v2786_v13 = vld [vmem:[%s3362_s4 + $0xd8] sm:$0xff]  ;;  %v2788_v21 = vld [vmem:[%s3362_s4 + $0xe8] sm:$0xff] }
  0xd3   : >> { %2259 = vmatmul.msk.bf16.vlgmr.msra.gmra.mxu2 %vm733_vm3, %v795_v60  ;;  %v1012_v9 = vrot.slane %v1010_v6, 1  ;;  %v2351_v15 = vld [vmem:[%s3106_s20 + $0x10] sm:$0xf]  ;;  %v2772_v18 = vld [vmem:[%s3102_s10 + $0x10] sm:$0x10]  ;;  %v2790_v19 = vld [vmem:[%s3362_s4 + $0xf8] sm:$0xff] }
  0xd4   : >> { %v837_v56 = vor.u32 %v836_v49, %v832_v43  ;;  %907 = vmatpush.bf16.msrb.mxu0 %v2757_v48  ;;  %952 = vmatpush.bf16.msrb.mxu1 %v2761_v50  ;;  %v970_v11 = vrot.slane %v968_v7, 1  ;;  %v2372_v17 = vld [vmem:[%s3102_s10 + $0x10] sm:$0xf]  ;;  %v2768_v20 = vld [vmem:[%s3106_s20 + $0x10] sm:$0x10]  ;;  %v2781_v22 = vld [vmem:[%s3362_s4 + $0xc0] sm:$0xff] }
  0xd5   : >> { %994 = vmatpush.bf16.msrb.mxu2 %v2763_v47  ;;  %v1013_v14 = vor.u32 %v1012_v9, %v1008_v8  ;;  %v2785_v23 = vld [vmem:[%s3362_s4 + $0xd0] sm:$0xff]  ;;  %v2373_v24 = vor.u32 %v2772_v18, %v2372_v17  ;;  %v2352_v26 = vor.u32 %v2768_v20, %v2351_v15  ;;  %v2787_v27 = vld [vmem:[%s3362_s4 + $0xe0] sm:$0xff]  ;;  %v2440_v36 = vld [vmem:[%s3102_s10 + $0x18] sm:$0xf] }
  0xd6   : >> { %2272 = vmatmul.msk.bf16.vlgmr.msra.gmra.mxu3 %vm733_vm3, %v837_v56  ;;  %v971_v16 = vor.u32 %v970_v11, %v966_v10  ;;  %v2789_v0 = vld [vmem:[%s3362_s4 + $0xf0] sm:$0xff]  ;;  %v2784_v37 = vld [vmem:[%s3102_s10 + $0x18] sm:$0x10]  ;;  %v2419_v38 = vld [vmem:[%s3106_s20 + $0x18] sm:$0xf]  ;;  %s2791_s10 = sshll.u32 %s2892_s30, 3 }
  0xd7   : >> { %1036 = vmatpush.bf16.msrb.mxu3 %v2765_v53  ;;  %v1186_v28 = vshll.u32 %v2373_v24, 16  ;;  %v1144_v29 = vshll.u32 %v2352_v26, 16  ;;  %v1184_v30 = vshrl.u32 %v2373_v24, 16  ;;  %v1142_v32 = vshrl.u32 %v2352_v26, 16  ;;  %v2780_v39 = vld [vmem:[%s3106_s20 + $0x18] sm:$0x10] }
  0xd8   : >> { %1082 = vmatpush.bf16.msra.mxu0 %v2770_v51  ;;  %1127 = vmatpush.bf16.msra.mxu1 %v2774_v62  ;;  %v2441_v40 = vor.u32 %v2784_v37, %v2440_v36  ;;  %v2420_v41 = vor.u32 %v2780_v39, %v2419_v38  ;;  %s1407_s20 = scalar_lea.vmem [#allocation4], %s2791_s10  ;;  %s696_s30 = sadd.s32 1, %s2892_s30  }
  0xd9   : >> { %1169 = vmatpush.bf16.msra.mxu2 %v2776_v59  ;;  %v1188_v31 = vrot.slane %v1186_v28, 1  ;;  %v1146_v33 = vrot.slane %v1144_v29, 1  ;;  %p693_p5 = scmp.ge.s32.totalorder %s696_s30, 9  }
  0xda   : >> { %v1362_v42 = vshll.u32 %v2441_v40, 16  ;;  %v1320_v43 = vshll.u32 %v2420_v41, 16  ;;  %v1360_v44 = vshrl.u32 %v2441_v40, 16  ;;  %v1318_v46 = vshrl.u32 %v2420_v41, 16  ;;  %s3214_s15 = smov (%p693_p5), 0  }
  0xdb   : >> { %1211 = vmatpush.bf16.msra.mxu3 %v2778_v61  ;;  %v1189_v34 = vor.u32 %v1188_v31, %v1184_v30  ;;  %v1147_v35 = vor.u32 %v1146_v33, %v1142_v32 }
  0xdc   : >> { %1083 = vmatpush.bf16.msra.mxu0 %v2769_v1  ;;  %1128 = vmatpush.bf16.msra.mxu1 %v2773_v4  ;;  %v1364_v45 = vrot.slane %v1362_v42, 1  ;;  %v1322_v47 = vrot.slane %v1320_v43, 1 }
  0xdd   : >> { %1170 = vmatpush.bf16.msra.mxu2 %v2775_v3 }
  0xde   : >> { %v1365_v48 = vor.u32 %v1364_v45, %v1360_v44  ;;  %v1323_v49 = vor.u32 %v1322_v47, %v1318_v46 }
  0xdf   : >> { %1212 = vmatpush.bf16.msra.mxu3 %v2777_v5  ;;  %2314 = vmatmul.msk.bf16.vlgmr.msrb.gmra.mxu1 %vm733_vm3, %v2305_v63 }
  0xe0   : >> { %1303 = vmatpush.bf16.msrb.mxu1 %v2786_v13 }
  0xe1   : >> { %2293 = vmatmul.msk.bf16.vlgmr.msrb.gmra.mxu0 %vm733_vm3, %v2284_v2 }
  0xe2   : >> { %1258 = vmatpush.bf16.msrb.mxu0 %v2782_v12 }
  0xe3   : >> { %2327 = vmatmul.msk.bf16.vlgmr.msrb.gmra.mxu2 %vm733_vm3, %v971_v16 }
  0xe4   : >> { %1345 = vmatpush.bf16.msrb.mxu2 %v2788_v21  ;;  %1304 = vmatpush.bf16.msrb.mxu1 %v2785_v23 }
  0xe6   : >> { %2340 = vmatmul.msk.bf16.vlgmr.msrb.gmra.mxu3 %vm733_vm3, %v1013_v14  ;;  %1259 = vmatpush.bf16.msrb.mxu0 %v2781_v22 }
  0xe7   : >> { %1387 = vmatpush.bf16.msrb.mxu3 %v2790_v19 }
  0xe8   : >> { %1346 = vmatpush.bf16.msrb.mxu2 %v2787_v27 }
  0xeb   : >> { %1388 = vmatpush.bf16.msrb.mxu3 %v2789_v0 }
  0xef   : >> { %2382 = vmatmul.msk.bf16.vlgmr.msra.gmra.mxu1 %vm733_vm3, %v2373_v24 }
  0xf1   : >> { %2361 = vmatmul.msk.bf16.vlgmr.msra.gmra.mxu0 %vm733_vm3, %v2352_v26 }
  0xf3   : >> { %2395 = vmatmul.msk.bf16.vlgmr.msra.gmra.mxu2 %vm733_vm3, %v1147_v35 }
  0xf6   : >> { %2408 = vmatmul.msk.bf16.vlgmr.msra.gmra.mxu3 %vm733_vm3, %v1189_v34 }
  0xff   : >> { %2450 = vmatmul.msk.bf16.vlgmr.msrb.gmra.mxu1 %vm733_vm3, %v2441_v40 }
 0x101   : >> { %2429 = vmatmul.msk.bf16.vlgmr.msrb.gmra.mxu0 %vm733_vm3, %v2420_v41  ;;  %v1398_v41 = vperm.slane %v3064_v25, 0 }
 0x103   : >> { %2463 = vmatmul.msk.bf16.vlgmr.msrb.gmra.mxu2 %vm733_vm3, %v1323_v49 }
 0x106   : >> { %2476 = vmatmul.msk.bf16.vlgmr.msrb.gmra.mxu3 %vm733_vm3, %v1365_v48 }
 0x14c   : >> { %v780_v51 = vpop.f32.mrf.mxu1 }
 0x14e   : >> { %v746_v50 = vpop.f32.mrf.mxu0 }
 0x14f   : >> { %v781_v60 = vadd.f32 %v780_v51, %v746_v50 }
 0x154   : >> { %v782_v53 = vpop.f32.mrf.mxu1 }
 0x156   : >> { %v748_v52 = vpop.f32.mrf.mxu0  ;;  %v820_v55 = vpop.f32.mrf.mxu2 }
 0x157   : >> { %v825_v61 = vadd.f32 %v820_v55, %v781_v60  ;;  %v783_v4 = vadd.f32 %v782_v53, %v748_v52  ;;  %v1413_v55 = vld [vmem:[%s1407_s20 + $0x4] sm:$0x1] }
 0x159   : >> { %v862_v54 = vpop.f32.mrf.mxu3 }
 0x15a   : >> { %v867_v3 = vadd.f32 %v862_v54, %v825_v61 }
 0x15c   : >> { %v954_v57 = vpop.f32.mrf.mxu1 }
 0x15e   : >> { %v909_v56 = vpop.f32.mrf.mxu0  ;;  %v822_v59 = vpop.f32.mrf.mxu2 }
 0x15f   : >> { %v914_v5 = vadd.f32 %v909_v56, %v867_v3  ;;  %v826_v6 = vadd.f32 %v822_v59, %v783_v4 }
 0x161   : >> { %v864_v58 = vpop.f32.mrf.mxu3  ;;  %v959_v8 = vadd.f32 %v954_v57, %v914_v5 }
 0x162   : >> { %v868_v12 = vadd.f32 %v864_v58, %v826_v6  ;;  %v3212_v58 = vld [vmem:[%s3365_s7] sm:$0x1] (%p693_p5) }
 0x164   : >> { %v956_v63 = vpop.f32.mrf.mxu1 }
 0x166   : >> { %v911_v62 = vpop.f32.mrf.mxu0  ;;  %v996_v2 = vpop.f32.mrf.mxu2 }
 0x167   : >> { %v1001_v13 = vadd.f32 %v996_v2, %v959_v8  ;;  %v915_v14 = vadd.f32 %v911_v62, %v868_v12 }
 0x169   : >> { %v1038_v1 = vpop.f32.mrf.mxu3  ;;  %v960_v17 = vadd.f32 %v956_v63, %v915_v14 }
 0x16a   : >> { %v1043_v15 = vadd.f32 %v1038_v1, %v1001_v13 }
 0x16c   : >> { %v1130_v10 = vpop.f32.mrf.mxu1 }
 0x16e   : >> { %v1085_v7 = vpop.f32.mrf.mxu0  ;;  %v998_v11 = vpop.f32.mrf.mxu2 }
 0x16f   : >> { %v1090_v18 = vadd.f32 %v1085_v7, %v1043_v15  ;;  %v1002_v21 = vadd.f32 %v998_v11, %v960_v17 }
 0x171   : >> { %v1040_v9 = vpop.f32.mrf.mxu3  ;;  %v1135_v23 = vadd.f32 %v1130_v10, %v1090_v18 }
 0x172   : >> { %v1044_v24 = vadd.f32 %v1040_v9, %v1002_v21 }
 0x174   : >> { %v1132_v22 = vpop.f32.mrf.mxu1 }
 0x176   : >> { %v1087_v16 = vpop.f32.mrf.mxu0  ;;  %v1172_v20 = vpop.f32.mrf.mxu2 }
 0x177   : >> { %v1177_v26 = vadd.f32 %v1172_v20, %v1135_v23  ;;  %v1091_v27 = vadd.f32 %v1087_v16, %v1044_v24 }
 0x179   : >> { %v1214_v19 = vpop.f32.mrf.mxu3  ;;  %v1136_v31 = vadd.f32 %v1132_v22, %v1091_v27 }
 0x17a   : >> { %v1219_v30 = vadd.f32 %v1214_v19, %v1177_v26 }
 0x17c   : >> { %v1306_v33 = vpop.f32.mrf.mxu1 }
 0x17e   : >> { %v1261_v0 = vpop.f32.mrf.mxu0  ;;  %v1174_v29 = vpop.f32.mrf.mxu2 }
 0x17f   : >> { %v1266_v32 = vadd.f32 %v1261_v0, %v1219_v30  ;;  %v1178_v34 = vadd.f32 %v1174_v29, %v1136_v31 }
 0x181   : >> { %v1216_v28 = vpop.f32.mrf.mxu3  ;;  %v1311_v35 = vadd.f32 %v1306_v33, %v1266_v32 }
 0x182   : >> { %v1220_v39 = vadd.f32 %v1216_v28, %v1178_v34 }
 0x184   : >> { %v1308_v45 = vpop.f32.mrf.mxu1 }
 0x186   : >> { %v1263_v36 = vpop.f32.mrf.mxu0  ;;  %v1348_v37 = vpop.f32.mrf.mxu2 }
 0x187   : >> { %v1353_v40 = vadd.f32 %v1348_v37, %v1311_v35  ;;  %v1267_v42 = vadd.f32 %v1263_v36, %v1220_v39 }
 0x189   : >> { %v1390_v38 = vpop.f32.mrf.mxu3  ;;  %v1312_v46 = vadd.f32 %v1308_v45, %v1267_v42 }
 0x18a   : >> { %v1395_v43 = vadd.f32 %v1390_v38, %v1353_v40 }
 0x18c   : >> { %v1400_v44 = vadd.f32 %v1398_v41, %v1395_v43 }
 0x18e   : >> { %v1402_v47 = vmax.f32 %v1400_v44, 0.0  ;;  %v1350_v48 = vpop.f32.mrf.mxu2 }
 0x18f   : >> { %v1354_v50 = vadd.f32 %v1350_v48, %v1312_v46 }
 0x190   : >> { %v1404_v49 = vpack.c.bf16 %v1402_v47, %v1402_v47 }
 0x191   : >> { %v1392_v51 = vpop.f32.mrf.mxu3 }
 0x192   : >> { %1409 = vst.msk [vmem:[%s1407_s20] sm:$0xf] %vm1408_vm4, %v1404_v49  ;;  %v1396_v52 = vadd.f32 %v1392_v51, %v1354_v50 }
 0x194   : >> { %v1401_v53 = vadd.f32 %v1398_v41, %v1396_v52 }
 0x196   : >> { %v1403_v54 = vmax.f32 %v1401_v53, 0.0 }
 0x197   : > { %695 = sbr.rel (!%p693_p5) target bundleno = 199 (0xc7), region = 162 }
 0x198   : >> { %v1405_v56 = vpack.c.bf16 %v1403_v54, %v1403_v54 }
 0x19a   : >> { %v1414_v57 = vsel %vm1412_vm7, %v1405_v56, %v1413_v55 }
 0x19b   : >> { %1415 = vst [vmem:[%s1407_s20 + $0x4] sm:$0x1] %v1414_v57 }
 0x19c LB: >> { %v2800_v59 = vld [vmem:[%s3364_s6 + $0x38] sm:$0xff]  ;;  %v2799_v62 = vld [vmem:[%s3364_s6 + $0x30] sm:$0xff]  ;;  %s2792_s21 = sshll.u32 %s2896_s15, 3  ;;  %v2798_v4 = vld [vmem:[%s3364_s6 + $0x28] sm:$0xff]  ;;  %vm1948_vm8 = vsmask.f32 3328  ;;  %s2896_s15 = sphi %s3214_s15, %s1422_s15  }
 0x19d   : >> { %v2796_v25 = vld [vmem:[%s3364_s6 + $0x18] sm:$0xff]  ;;  %1486 = vmatpush.bf16.msra.mxu0 %v2800_v59  ;;  %v2795_v63 = vld [vmem:[%s3364_s6 + $0x10] sm:$0xff]  ;;  %s3244_s24 = scalar_lea.vmem [#allocation4], %s2792_s21  ;;  %v2794_v5 = vld [vmem:[%s3364_s6 + $0x8] sm:$0xff] }
 0x19e   : >> { %v2805_v60 = vld [vmem:[%s3364_s6 + $0x58] sm:$0xff]  ;;  %1526 = vmatpush.bf16.msra.mxu1 %v2796_v25  ;;  %v2804_v1 = vld [vmem:[%s3364_s6 + $0x50] sm:$0xff]  ;;  %v2803_v6 = vld [vmem:[%s3364_s6 + $0x48] sm:$0xff] }
 0x19f   : >> { %v2809_v61 = vld [vmem:[%s3364_s6 + $0x78] sm:$0xff]  ;;  %1583 = vmatpush.bf16.msra.mxu2 %v2805_v60  ;;  %v2808_v2 = vld [vmem:[%s3364_s6 + $0x70] sm:$0xff]  ;;  %v2807_v8 = vld [vmem:[%s3364_s6 + $0x68] sm:$0xff] }
 0x1a0   : >> { %1638 = vmatpush.bf16.msra.mxu3 %v2809_v61  ;;  %v2797_v12 = vld [vmem:[%s3364_s6 + $0x20] sm:$0xff]  ;;  %v2813_v21 = vld [vmem:[%s3364_s6 + $0x98] sm:$0xff]  ;;  %v2812_v30 = vld [vmem:[%s3364_s6 + $0x90] sm:$0xff] }
 0x1a1   : >> { %1487 = vmatpush.bf16.msra.mxu0 %v2799_v62  ;;  %v2793_v13 = vld [vmem:[%s3364_s6] sm:$0xff]  ;;  %v2822_v22 = vld [vmem:[%s3364_s6 + $0xd8] sm:$0xff]  ;;  %v2821_v31 = vld [vmem:[%s3364_s6 + $0xd0] sm:$0xff] }
 0x1a2   : >> { %v1426_v3 = vld [vmem:[%s3244_s24] sm:$0xf]  ;;  %1527 = vmatpush.bf16.msra.mxu1 %v2795_v63  ;;  %v2801_v10 = vld [vmem:[%s3244_s24] sm:$0x10]  ;;  %v2552_v19 = vld [vmem:[%s3244_s24 + $0x8] sm:$0xf] }
 0x1a3   : >> { %v1445_v7 = vunpack.c.l.b16 %v1426_v3  ;;  %1584 = vmatpush.bf16.msra.mxu2 %v2804_v1  ;;  %v2532_v9 = vld [vmem:[%s3244_s24] sm:$0xe]  ;;  %v2635_v23 = vld [vmem:[%s3244_s24 + $0x10] sm:$0xf]  ;;  %v1658_v24 = vunpack.c.l.b16 %v2552_v19  ;;  %v2826_v28 = vld [vmem:[%s3364_s6 + $0xf8] sm:$0xff] }
 0x1a4   : >> { %1639 = vmatpush.bf16.msra.mxu3 %v2808_v2  ;;  %v2533_v16 = vor.u32 %v2801_v10, %v2532_v9  ;;  %v2802_v17 = vld [vmem:[%s3364_s6 + $0x40] sm:$0xff]  ;;  %v1831_v27 = vunpack.c.l.b16 %v2635_v23  ;;  %v2818_v29 = vld [vmem:[%s3364_s6 + $0xb8] sm:$0xff]  ;;  %v2825_v34 = vld [vmem:[%s3364_s6 + $0xf0] sm:$0xff] }
 0x1a5   : >> { %v1446_v11 = vpack.c.b16 %v1445_v7, %v1445_v7  ;;  %1488 = vmatpush.bf16.msra.mxu0 %v2798_v4  ;;  %v2806_v18 = vld [vmem:[%s3364_s6 + $0x60] sm:$0xff]  ;;  %v1659_v32 = vpack.c.b16 %v1658_v24, %v1658_v24  ;;  %v2817_v35 = vld [vmem:[%s3364_s6 + $0xb0] sm:$0xff]  ;;  %v2811_v36 = vld [vmem:[%s3364_s6 + $0x88] sm:$0xff]  ;;  %v1940_v24 = vperm.slane %v3212_v58, 0 }
 0x1a6   : >> { %1528 = vmatpush.bf16.msra.mxu1 %v2794_v5  ;;  %v1551_v0 = vrot.slane %v2533_v16, 1  ;;  %v1832_v33 = vpack.c.b16 %v1831_v27, %v1831_v27  ;;  %v2820_v37 = vld [vmem:[%s3364_s6 + $0xc8] sm:$0xff]  ;;  %v2810_v42 = vld [vmem:[%s3364_s6 + $0x80] sm:$0xff]  ;;  %v2831_v48 = vld [vmem:[%s3364_s6 + $0x118] sm:$0xff] }
 0x1a7   : >> { %v1448_v14 = vshrl.u32 %v1446_v11, 16  ;;  %v1450_v15 = vshll.u32 %v1446_v11, 16  ;;  %1585 = vmatpush.bf16.msra.mxu2 %v2803_v6  ;;  %v1663_v38 = vshll.u32 %v1659_v32, 16  ;;  %v2824_v40 = vld [vmem:[%s3364_s6 + $0xe8] sm:$0xff]  ;;  %v2819_v43 = vld [vmem:[%s3364_s6 + $0xc0] sm:$0xff]  ;;  %v1661_v46 = vshrl.u32 %v1659_v32, 16  ;;  %vm1949_vm9 = vmand %vm676_vm1, %vm1948_vm8 }
 0x1a8   : >> { %1640 = vmatpush.bf16.msra.mxu3 %v2807_v8  ;;  %v1836_v39 = vshll.u32 %v1832_v33, 16  ;;  %v2816_v41 = vld [vmem:[%s3364_s6 + $0xa8] sm:$0xff]  ;;  %v1834_v49 = vshrl.u32 %v1832_v33, 16  ;;  %v2823_v51 = vld [vmem:[%s3364_s6 + $0xe0] sm:$0xff]  ;;  %v2830_v57 = vld [vmem:[%s3364_s6 + $0x110] sm:$0xff] }
 0x1a9   : >> { %v1452_v20 = vrot.slane %v1450_v15, 1  ;;  %1489 = vmatpush.bf16.msra.mxu0 %v2797_v12  ;;  %v2615_v44 = vld [vmem:[%s3244_s24 + $0x8] sm:$0xe]  ;;  %v2814_v45 = vld [vmem:[%s3244_s24 + $0x8] sm:$0x10]  ;;  %v1665_v47 = vrot.slane %v1663_v38, 1 }
 0x1aa   : >> { %1529 = vmatpush.bf16.msra.mxu1 %v2793_v13  ;;  %v1838_v50 = vrot.slane %v1836_v39, 1  ;;  %v2815_v52 = vld [vmem:[%s3364_s6 + $0xa0] sm:$0xff]  ;;  %v2616_v53 = vor.u32 %v2814_v45, %v2615_v44  ;;  %v2829_v59 = vld [vmem:[%s3364_s6 + $0x108] sm:$0xff]  ;;  %v2698_v25 = vld [vmem:[%s3244_s24 + $0x10] sm:$0xe] }
 0x1ab   : >> { %v1453_v26 = vor.u32 %v1452_v20, %v1448_v14  ;;  %1586 = vmatpush.bf16.msra.mxu2 %v2802_v17  ;;  %v1666_v54 = vor.u32 %v1665_v47, %v1661_v46  ;;  %v2827_v60 = vld [vmem:[%s3244_s24 + $0x10] sm:$0x10]  ;;  %v2828_v61 = vld [vmem:[%s3364_s6 + $0x100] sm:$0xff]  ;;  %s2717_s24 = sshll.u32 %s2896_s15, 2  ;;  %s1422_s15 = sadd.s32 1, %s2896_s15  }
 0x1ac   : >> { %1641 = vmatpush.bf16.msra.mxu3 %v2806_v18  ;;  %v1839_v55 = vor.u32 %v1838_v50, %v1834_v49  ;;  %v1724_v56 = vrot.slane %v2616_v53, 1  ;;  %v2699_v62 = vor.u32 %v2827_v60, %v2698_v25  ;;  %s1946_s26 = scalar_lea.vmem %s2969_s19, %s2717_s24  ;;  %p1419_p6 = scmp.ge.s32.totalorder %s1422_s15, 7  }
 0x1ad   : >> { %1698 = vmatpush.bf16.msrb.mxu0 %v2813_v21  ;;  %2521 = vmatmul.msk.bf16.vlgmr.msra.gmra.mxu1 %vm390_vm0, %v1426_v3 }
 0x1ae   : >> { %2504 = vmatmul.msk.bf16.vlgmr.msra.gmra.mxu0 %vm390_vm0, %v1453_v26  ;;  %2550 = vmatmul.msk.bf16.vlgmr.msra.gmra.mxu2 %vm390_vm0, %v1551_v0  ;;  %v1897_v63 = vrot.slane %v2699_v62, 1 }
 0x1af   : >> { %1811 = vmatpush.bf16.msrb.mxu2 %v2822_v22  ;;  %2577 = vmatmul.msk.bf16.vlgmr.msra.gmra.mxu3 %vm390_vm0, %v2552_v19 }
 0x1b0   : >> { %1871 = vmatpush.bf16.msrb.mxu3 %v2826_v28  ;;  %1756 = vmatpush.bf16.msrb.mxu1 %v2818_v29  ;;  %v1950_v29 = vld [vmem:[%s1946_s26] sm:$0xf] }
 0x1b1   : >> { %1699 = vmatpush.bf16.msrb.mxu0 %v2812_v30 }
 0x1b3   : >> { %1812 = vmatpush.bf16.msrb.mxu2 %v2821_v31 }
 0x1b4   : >> { %1872 = vmatpush.bf16.msrb.mxu3 %v2825_v34  ;;  %1757 = vmatpush.bf16.msrb.mxu1 %v2817_v35 }
 0x1b5   : >> { %1700 = vmatpush.bf16.msrb.mxu0 %v2811_v36 }
 0x1b7   : >> { %1813 = vmatpush.bf16.msrb.mxu2 %v2820_v37 }
 0x1b8   : >> { %1873 = vmatpush.bf16.msrb.mxu3 %v2824_v40  ;;  %1758 = vmatpush.bf16.msrb.mxu1 %v2816_v41 }
 0x1b9   : >> { %1701 = vmatpush.bf16.msrb.mxu0 %v2810_v42 }
 0x1bb   : >> { %1814 = vmatpush.bf16.msrb.mxu2 %v2819_v43 }
 0x1bc   : >> { %1874 = vmatpush.bf16.msrb.mxu3 %v2823_v51  ;;  %1759 = vmatpush.bf16.msrb.mxu1 %v2815_v52 }
 0x1bd   : >> { %1929 = vmatpush.bf16.msra.mxu0 %v2831_v48 }
 0x1be   : >> { %2602 = vmatmul.msk.bf16.vlgmr.msrb.gmra.mxu0 %vm390_vm0, %v1666_v54  ;;  %2660 = vmatmul.msk.bf16.vlgmr.msrb.gmra.mxu2 %vm390_vm0, %v2635_v23 }
 0x1bf   : >> { %2685 = vmatmul.msk.bf16.vlgmr.msrb.gmra.mxu3 %vm390_vm0, %v1839_v55  ;;  %2633 = vmatmul.msk.bf16.vlgmr.msrb.gmra.mxu1 %vm390_vm0, %v1724_v56 }
 0x1c1   : >> { %1930 = vmatpush.bf16.msra.mxu0 %v2830_v57 }
 0x1c5   : >> { %1931 = vmatpush.bf16.msra.mxu0 %v2829_v59 }
 0x1c9   : >> { %1932 = vmatpush.bf16.msra.mxu0 %v2828_v61 }
 0x1ce   : >> { %2716 = vmatmul.msk.bf16.vlgmr.msra.gmra.mxu0 %vm390_vm0, %v1897_v63 }
 0x22a   : >> { %v1531_v2 = vpop.f32.mrf.mxu1 }
 0x22b   : >> { %v1491_v1 = vpop.f32.mrf.mxu0 }
 0x22c   : >> { %v1532_v7 = vadd.f32 %v1531_v2, %v1491_v1 }
 0x231   : >> { %v1588_v3 = vpop.f32.mrf.mxu2 }
 0x232   : >> { %v1643_v4 = vpop.f32.mrf.mxu3  ;;  %v1533_v6 = vpop.f32.mrf.mxu1  ;;  %v1592_v8 = vadd.f32 %v1588_v3, %v1532_v7 }
 0x233   : >> { %v1493_v5 = vpop.f32.mrf.mxu0 }
 0x234   : >> { %v1647_v13 = vadd.f32 %v1643_v4, %v1592_v8 }
 0x239   : >> { %v1590_v9 = vpop.f32.mrf.mxu2 }
 0x23a   : >> { %v1645_v10 = vpop.f32.mrf.mxu3 }
 0x23b   : >> { %v1703_v11 = vpop.f32.mrf.mxu0 }
 0x23c   : >> { %v1761_v12 = vpop.f32.mrf.mxu1  ;;  %v1707_v14 = vadd.f32 %v1703_v11, %v1647_v13 }
 0x23e   : >> { %v1765_v18 = vadd.f32 %v1761_v12, %v1707_v14 }
 0x241   : >> { %v1816_v15 = vpop.f32.mrf.mxu2 }
 0x242   : >> { %v1876_v16 = vpop.f32.mrf.mxu3  ;;  %v1820_v20 = vadd.f32 %v1816_v15, %v1765_v18 }
 0x243   : >> { %v1705_v17 = vpop.f32.mrf.mxu0 }
 0x244   : >> { %v1763_v19 = vpop.f32.mrf.mxu1  ;;  %v1880_v21 = vadd.f32 %v1876_v16, %v1820_v20 }
 0x249   : >> { %v1818_v22 = vpop.f32.mrf.mxu2 }
 0x24a   : >> { %v1878_v23 = vpop.f32.mrf.mxu3 }
 0x24b   : >> { %v1934_v26 = vpop.f32.mrf.mxu0 }
 0x24c   : >> { %v1938_v0 = vadd.f32 %v1934_v26, %v1880_v21 }
 0x24e   : >> { %v1942_v27 = vadd.f32 %v1940_v24, %v1938_v0 }
 0x250   : >> { %v1943_v28 = vmax.f32 %v1942_v27, 0.0 }
 0x251   : > { %1421 = sbr.rel (!%p1419_p6) target bundleno = 412 (0x19c), region = 173 }
 0x252   : >> { %v1944_v30 = vpack.c.bf16 %v1943_v28, %v1943_v28 }
 0x253   : >> { %v1936_v31 = vpop.f32.mrf.mxu0 }
 0x254   : >> { %v1951_v32 = vsel %vm1949_vm9, %v1944_v30, %v1950_v29 }
 0x255   : >> { %1952 = vst [vmem:[%s1946_s26] sm:$0xf] %v1951_v32 }
 0x256 PF: > { %s18_s27 = sadd.s32 1, %s2884_s27  }
 0x257   : > { %p15_p7 = scmp.ge.s32.totalorder %s18_s27, 4  }
 0x259   :  { %17 = sbr.rel (!%p15_p7) target bundleno = 1 (0x1), region = 184 }

// kernel: cnn_base.3
= control target key start
LH: loop header
LB: loop body
LE: loop exit
PB: predicated region body
PF: predicated region fallthrough
CT: control target
= control target key end

     0   :  { %vm2435_vm0 = vcmask 261120   ;;  %s8200_s1 = inlined_call_operand.vmem [shape: bf16[1568,512], index: 1, kind: input, shape index: {}]   ;;  %s8201_s0 = inlined_call_operand.vmem [shape: bf16[8,1568], index: 0, kind: input, shape index: {}]   ;;  %s8202_s2 = inlined_call_operand.vmem [shape: f32[1,512], index: 2, kind: input, shape index: {}]   ;;  %s8203_s3 = inlined_call_operand.vmem [shape: bf16[512,128], index: 3, kind: input, shape index: {}]   ;;  %s8204_s4 = inlined_call_operand.vmem [shape: f32[1,128], index: 4, kind: input, shape index: {}]   ;;  %s8205_s5 = inlined_call_operand.vmem [shape: f32[8,128], index: 5, kind: output, shape index: {}]  }
   0x1   :  { %v3554_v0 = vld [vmem:[%s8200_s1 + $0xe0] sm:$0xf]  ;;  %v5170_v1 = vld [vmem:[%s8200_s1 + $0xec] sm:$0xf0] }
   0x2   :  { %v3682_v2 = vld [vmem:[%s8200_s1 + $0x1e0] sm:$0xf]  ;;  %v3555_v3 = vor.u32 %v5170_v1, %v3554_v0  ;;  %v5202_v4 = vld [vmem:[%s8200_s1 + $0x1ec] sm:$0xf0] }
   0x3   :  { %v3810_v5 = vld [vmem:[%s8200_s1 + $0x2e0] sm:$0xf]  ;;  %v5234_v6 = vld [vmem:[%s8200_s1 + $0x2ec] sm:$0xf0]  ;;  %v3683_v7 = vor.u32 %v5202_v4, %v3682_v2 }
   0x4   :  { %v3811_v8 = vor.u32 %v5234_v6, %v3810_v5  ;;  %v3938_v9 = vld [vmem:[%s8200_s1 + $0x3e0] sm:$0xf]  ;;  %v5266_v10 = vld [vmem:[%s8200_s1 + $0x3ec] sm:$0xf0]  ;;  %2439 = vmatpush.bf16.msra.mxu0 %v3555_v3 }
   0x5   :  { %v3538_v11 = vld [vmem:[%s8200_s1 + $0xc0] sm:$0xf]  ;;  %v3939_v12 = vor.u32 %v5266_v10, %v3938_v9  ;;  %v5166_v13 = vld [vmem:[%s8200_s1 + $0xcc] sm:$0xf0]  ;;  %2452 = vmatpush.bf16.msra.mxu1 %v3683_v7 }
   0x6   :  { %v3666_v14 = vld [vmem:[%s8200_s1 + $0x1c0] sm:$0xf]  ;;  %v5198_v15 = vld [vmem:[%s8200_s1 + $0x1cc] sm:$0xf0]  ;;  %2465 = vmatpush.bf16.msra.mxu2 %v3811_v8  ;;  %v3539_v16 = vor.u32 %v5166_v13, %v3538_v11 }
   0x7   :  { %v3667_v17 = vor.u32 %v5198_v15, %v3666_v14  ;;  %v3794_v18 = vld [vmem:[%s8200_s1 + $0x2c0] sm:$0xf]  ;;  %v5230_v19 = vld [vmem:[%s8200_s1 + $0x2cc] sm:$0xf0]  ;;  %2478 = vmatpush.bf16.msra.mxu3 %v3939_v12 }
   0x8   :  { %v3922_v20 = vld [vmem:[%s8200_s1 + $0x3c0] sm:$0xf]  ;;  %v3795_v21 = vor.u32 %v5230_v19, %v3794_v18  ;;  %v5262_v22 = vld [vmem:[%s8200_s1 + $0x3cc] sm:$0xf0]  ;;  %2440 = vmatpush.bf16.msra.mxu0 %v3539_v16 }
   0x9   :  { %v3522_v23 = vld [vmem:[%s8200_s1 + $0xa0] sm:$0xf]  ;;  %v5162_v24 = vld [vmem:[%s8200_s1 + $0xac] sm:$0xf0]  ;;  %v3923_v25 = vor.u32 %v5262_v22, %v3922_v20  ;;  %2453 = vmatpush.bf16.msra.mxu1 %v3667_v17 }
   0xa   :  { %v3650_v26 = vld [vmem:[%s8200_s1 + $0x1a0] sm:$0xf]  ;;  %v5194_v27 = vld [vmem:[%s8200_s1 + $0x1ac] sm:$0xf0]  ;;  %v3523_v29 = vor.u32 %v5162_v24, %v3522_v23  ;;  %2466 = vmatpush.bf16.msra.mxu2 %v3795_v21 }
   0xb   :  { %v3778_v28 = vld [vmem:[%s8200_s1 + $0x2a0] sm:$0xf]  ;;  %v5226_v30 = vld [vmem:[%s8200_s1 + $0x2ac] sm:$0xf0]  ;;  %v3651_v33 = vor.u32 %v5194_v27, %v3650_v26  ;;  %2479 = vmatpush.bf16.msra.mxu3 %v3923_v25 }
   0xc   :  { %v3906_v31 = vld [vmem:[%s8200_s1 + $0x3a0] sm:$0xf]  ;;  %v5258_v32 = vld [vmem:[%s8200_s1 + $0x3ac] sm:$0xf0]  ;;  %v3779_v34 = vor.u32 %v5226_v30, %v3778_v28  ;;  %2441 = vmatpush.bf16.msra.mxu0 %v3523_v29 }
   0xd   :  { %v3506_v35 = vld [vmem:[%s8200_s1 + $0x80] sm:$0xf]  ;;  %v5158_v36 = vld [vmem:[%s8200_s1 + $0x8c] sm:$0xf0]  ;;  %v3907_v38 = vor.u32 %v5258_v32, %v3906_v31  ;;  %2454 = vmatpush.bf16.msra.mxu1 %v3651_v33 }
   0xe   :  { %v3634_v37 = vld [vmem:[%s8200_s1 + $0x180] sm:$0xf]  ;;  %v5190_v39 = vld [vmem:[%s8200_s1 + $0x18c] sm:$0xf0]  ;;  %v3507_v44 = vor.u32 %v5158_v36, %v3506_v35  ;;  %2467 = vmatpush.bf16.msra.mxu2 %v3779_v34 }
   0xf   :  { %v3762_v40 = vld [vmem:[%s8200_s1 + $0x280] sm:$0xf]  ;;  %v5222_v41 = vld [vmem:[%s8200_s1 + $0x28c] sm:$0xf0]  ;;  %v3635_v45 = vor.u32 %v5190_v39, %v3634_v37  ;;  %2480 = vmatpush.bf16.msra.mxu3 %v3907_v38 }
  0x10   :  { %v3890_v42 = vld [vmem:[%s8200_s1 + $0x380] sm:$0xf]  ;;  %v5254_v43 = vld [vmem:[%s8200_s1 + $0x38c] sm:$0xf0]  ;;  %v3763_v46 = vor.u32 %v5222_v41, %v3762_v40  ;;  %2442 = vmatpush.bf16.msra.mxu0 %v3507_v44 }
  0x11   :  { %v3490_v47 = vld [vmem:[%s8200_s1 + $0x60] sm:$0xf]  ;;  %v5154_v48 = vld [vmem:[%s8200_s1 + $0x6c] sm:$0xf0]  ;;  %v3891_v50 = vor.u32 %v5254_v43, %v3890_v42  ;;  %2455 = vmatpush.bf16.msra.mxu1 %v3635_v45 }
  0x12   :  { %v3618_v49 = vld [vmem:[%s8200_s1 + $0x160] sm:$0xf]  ;;  %v5186_v51 = vld [vmem:[%s8200_s1 + $0x16c] sm:$0xf0]  ;;  %v3491_v56 = vor.u32 %v5154_v48, %v3490_v47  ;;  %2468 = vmatpush.bf16.msra.mxu2 %v3763_v46 }
  0x13   :  { %v3746_v52 = vld [vmem:[%s8200_s1 + $0x260] sm:$0xf]  ;;  %v5218_v53 = vld [vmem:[%s8200_s1 + $0x26c] sm:$0xf0]  ;;  %v3619_v57 = vor.u32 %v5186_v51, %v3618_v49  ;;  %2481 = vmatpush.bf16.msra.mxu3 %v3891_v50 }
  0x14   :  { %v3874_v54 = vld [vmem:[%s8200_s1 + $0x360] sm:$0xf]  ;;  %v5250_v55 = vld [vmem:[%s8200_s1 + $0x36c] sm:$0xf0]  ;;  %v3747_v58 = vor.u32 %v5218_v53, %v3746_v52  ;;  %2443 = vmatpush.bf16.msra.mxu0 %v3491_v56 }
  0x15   :  { %v3474_v59 = vld [vmem:[%s8200_s1 + $0x40] sm:$0xf]  ;;  %v5150_v60 = vld [vmem:[%s8200_s1 + $0x4c] sm:$0xf0]  ;;  %v3875_v62 = vor.u32 %v5250_v55, %v3874_v54  ;;  %2456 = vmatpush.bf16.msra.mxu1 %v3619_v57 }
  0x16   :  { %v3602_v61 = vld [vmem:[%s8200_s1 + $0x140] sm:$0xf]  ;;  %v5182_v63 = vld [vmem:[%s8200_s1 + $0x14c] sm:$0xf0]  ;;  %v3475_v4 = vor.u32 %v5150_v60, %v3474_v59  ;;  %2469 = vmatpush.bf16.msra.mxu2 %v3747_v58  ;;  %v22_v58 = vld [vmem:[%s8201_s0 + $0x8] sm:$0xff] }
  0x17   :  { %v3730_v0 = vld [vmem:[%s8200_s1 + $0x240] sm:$0xf]  ;;  %v5214_v1 = vld [vmem:[%s8200_s1 + $0x24c] sm:$0xf0]  ;;  %v3603_v5 = vor.u32 %v5182_v63, %v3602_v61  ;;  %2482 = vmatpush.bf16.msra.mxu3 %v3875_v62  ;;  %v439_v63 = vunpack.c.l.b16 %v22_v58 }
  0x18   :  { %v3858_v2 = vld [vmem:[%s8200_s1 + $0x340] sm:$0xf]  ;;  %v5246_v3 = vld [vmem:[%s8200_s1 + $0x34c] sm:$0xf0]  ;;  %v3731_v6 = vor.u32 %v5214_v1, %v3730_v0  ;;  %2444 = vmatpush.bf16.msra.mxu0 %v3475_v4  ;;  %v440_v0 = vunpack.c.h.b16 %v22_v58 }
  0x19   :  { %v3458_v7 = vld [vmem:[%s8200_s1 + $0x20] sm:$0xf]  ;;  %v5146_v8 = vld [vmem:[%s8200_s1 + $0x2c] sm:$0xf0]  ;;  %v3859_v10 = vor.u32 %v5246_v3, %v3858_v2  ;;  %2457 = vmatpush.bf16.msra.mxu1 %v3603_v5  ;;  %v5863_v4 = vpack.c.b16 %v439_v63, %v439_v63 }
  0x1a   :  { %v3586_v9 = vld [vmem:[%s8200_s1 + $0x120] sm:$0xf]  ;;  %v5178_v11 = vld [vmem:[%s8200_s1 + $0x12c] sm:$0xf0]  ;;  %v3459_v16 = vor.u32 %v5146_v8, %v3458_v7  ;;  %2470 = vmatpush.bf16.msra.mxu2 %v3731_v6  ;;  %v5868_v6 = vpack.c.b16 %v440_v0, %v440_v0 }
  0x1b   :  { %v3714_v12 = vld [vmem:[%s8200_s1 + $0x220] sm:$0xf]  ;;  %v5210_v13 = vld [vmem:[%s8200_s1 + $0x22c] sm:$0xf0]  ;;  %v3587_v19 = vor.u32 %v5178_v11, %v3586_v9  ;;  %2483 = vmatpush.bf16.msra.mxu3 %v3859_v10 }
  0x1c   :  { %v3842_v14 = vld [vmem:[%s8200_s1 + $0x320] sm:$0xf]  ;;  %v5242_v15 = vld [vmem:[%s8200_s1 + $0x32c] sm:$0xf0]  ;;  %v3715_v20 = vor.u32 %v5210_v13, %v3714_v12  ;;  %2445 = vmatpush.bf16.msra.mxu0 %v3459_v16 }
  0x1d   :  { %v3442_v17 = vld [vmem:[%s8200_s1] sm:$0xf]  ;;  %v5142_v18 = vld [vmem:[%s8200_s1 + $0xc] sm:$0xf0]  ;;  %v3843_v24 = vor.u32 %v5242_v15, %v3842_v14  ;;  %2458 = vmatpush.bf16.msra.mxu1 %v3587_v19 }
  0x1e   :  { %v3570_v21 = vld [vmem:[%s8200_s1 + $0x100] sm:$0xf]  ;;  %v5174_v22 = vld [vmem:[%s8200_s1 + $0x10c] sm:$0xf0]  ;;  %v3443_v31 = vor.u32 %v5142_v18, %v3442_v17  ;;  %2471 = vmatpush.bf16.msra.mxu2 %v3715_v20 }
  0x1f   :  { %v3698_v23 = vld [vmem:[%s8200_s1 + $0x200] sm:$0xf]  ;;  %v5206_v25 = vld [vmem:[%s8200_s1 + $0x20c] sm:$0xf0]  ;;  %v3571_v35 = vor.u32 %v5174_v22, %v3570_v21  ;;  %2484 = vmatpush.bf16.msra.mxu3 %v3843_v24 }
  0x20   :  { %v3826_v26 = vld [vmem:[%s8200_s1 + $0x300] sm:$0xf]  ;;  %v5238_v27 = vld [vmem:[%s8200_s1 + $0x30c] sm:$0xf0]  ;;  %v3699_v36 = vor.u32 %v5206_v25, %v3698_v23  ;;  %2446 = vmatpush.bf16.msra.mxu0 %v3443_v31 }
  0x21   :  { %v4066_v28 = vld [vmem:[%s8200_s1 + $0x4e0] sm:$0xf]  ;;  %v5298_v29 = vld [vmem:[%s8200_s1 + $0x4ec] sm:$0xf0]  ;;  %v3827_v39 = vor.u32 %v5238_v27, %v3826_v26  ;;  %2459 = vmatpush.bf16.msra.mxu1 %v3571_v35 }
  0x22   :  { %v4194_v30 = vld [vmem:[%s8200_s1 + $0x5e0] sm:$0xf]  ;;  %v5330_v32 = vld [vmem:[%s8200_s1 + $0x5ec] sm:$0xf0]  ;;  %v4067_v40 = vor.u32 %v5298_v29, %v4066_v28  ;;  %2472 = vmatpush.bf16.msra.mxu2 %v3699_v36 }
  0x23   :  { %v4322_v33 = vld [vmem:[%s8200_s1 + $0x6e0] sm:$0xf]  ;;  %v5362_v34 = vld [vmem:[%s8200_s1 + $0x6ec] sm:$0xf0]  ;;  %v4195_v41 = vor.u32 %v5330_v32, %v4194_v30  ;;  %2485 = vmatpush.bf16.msra.mxu3 %v3827_v39 }
  0x24   :  { %v4450_v37 = vld [vmem:[%s8200_s1 + $0x7e0] sm:$0xf]  ;;  %v5394_v38 = vld [vmem:[%s8200_s1 + $0x7ec] sm:$0xf0]  ;;  %v4323_v42 = vor.u32 %v5362_v34, %v4322_v33  ;;  %2491 = vmatpush.bf16.msrb.mxu0 %v4067_v40 }
  0x25   :  { %v4050_v43 = vld [vmem:[%s8200_s1 + $0x4c0] sm:$0xf]  ;;  %v5294_v44 = vld [vmem:[%s8200_s1 + $0x4cc] sm:$0xf0]  ;;  %v4451_v46 = vor.u32 %v5394_v38, %v4450_v37  ;;  %2504 = vmatpush.bf16.msrb.mxu1 %v4195_v41  ;;  %2473 = vmatmul.bf16.vlgmr.msra.gmra.mxu2 %v5863_v4 }
  0x26   :  { %v4178_v45 = vld [vmem:[%s8200_s1 + $0x5c0] sm:$0xf]  ;;  %v5326_v47 = vld [vmem:[%s8200_s1 + $0x5cc] sm:$0xf0]  ;;  %v4051_v52 = vor.u32 %v5294_v44, %v4050_v43  ;;  %2517 = vmatpush.bf16.msrb.mxu2 %v4323_v42  ;;  %2486 = vmatmul.bf16.vlgmr.msra.gmra.mxu3 %v5868_v6 }
  0x27   :  { %v4306_v48 = vld [vmem:[%s8200_s1 + $0x6c0] sm:$0xf]  ;;  %v5358_v49 = vld [vmem:[%s8200_s1 + $0x6cc] sm:$0xf0]  ;;  %v4179_v54 = vor.u32 %v5326_v47, %v4178_v45  ;;  %2530 = vmatpush.bf16.msrb.mxu3 %v4451_v46 }
  0x28   :  { %v4434_v50 = vld [vmem:[%s8200_s1 + $0x7c0] sm:$0xf]  ;;  %v5390_v51 = vld [vmem:[%s8200_s1 + $0x7cc] sm:$0xf0]  ;;  %v4307_v55 = vor.u32 %v5358_v49, %v4306_v48  ;;  %2492 = vmatpush.bf16.msrb.mxu0 %v4051_v52 }
  0x29   :  { %v4034_v53 = vld [vmem:[%s8200_s1 + $0x4a0] sm:$0xf]  ;;  %v5290_v56 = vld [vmem:[%s8200_s1 + $0x4ac] sm:$0xf0]  ;;  %v4435_v59 = vor.u32 %v5390_v51, %v4434_v50  ;;  %2505 = vmatpush.bf16.msrb.mxu1 %v4179_v54 }
  0x2a   :  { %v4162_v57 = vld [vmem:[%s8200_s1 + $0x5a0] sm:$0xf]  ;;  %v5322_v60 = vld [vmem:[%s8200_s1 + $0x5ac] sm:$0xf0]  ;;  %v4035_v3 = vor.u32 %v5290_v56, %v4034_v53  ;;  %2518 = vmatpush.bf16.msrb.mxu2 %v4307_v55 }
  0x2b   :  { %v4290_v61 = vld [vmem:[%s8200_s1 + $0x6a0] sm:$0xf]  ;;  %v5354_v62 = vld [vmem:[%s8200_s1 + $0x6ac] sm:$0xf0]  ;;  %v4163_v7 = vor.u32 %v5322_v60, %v4162_v57  ;;  %2531 = vmatpush.bf16.msrb.mxu3 %v4435_v59 }
  0x2c   :  { %v4418_v1 = vld [vmem:[%s8200_s1 + $0x7a0] sm:$0xf]  ;;  %v5386_v2 = vld [vmem:[%s8200_s1 + $0x7ac] sm:$0xf0]  ;;  %v4291_v8 = vor.u32 %v5354_v62, %v4290_v61  ;;  %2493 = vmatpush.bf16.msrb.mxu0 %v4035_v3  ;;  %v24_v3 = vld [vmem:[%s8201_s0 + $0x18] sm:$0xff] }
  0x2d   :  { %v21_v5 = vld [vmem:[%s8201_s0] sm:$0xff]  ;;  %v5286_v10 = vld [vmem:[%s8200_s1 + $0x48c] sm:$0xf0]  ;;  %v4419_v14 = vor.u32 %v5386_v2, %v4418_v1  ;;  %2506 = vmatpush.bf16.msrb.mxu1 %v4163_v7 }
  0x2e   :  { %v4018_v9 = vld [vmem:[%s8200_s1 + $0x480] sm:$0xf]  ;;  %v437_v12 = vunpack.c.l.b16 %v21_v5  ;;  %v438_v13 = vunpack.c.h.b16 %v21_v5  ;;  %v5318_v15 = vld [vmem:[%s8200_s1 + $0x58c] sm:$0xf0]  ;;  %2519 = vmatpush.bf16.msrb.mxu2 %v4291_v8 }
  0x2f   :  { %v4146_v11 = vld [vmem:[%s8200_s1 + $0x580] sm:$0xf]  ;;  %v5350_v17 = vld [vmem:[%s8200_s1 + $0x68c] sm:$0xf0]  ;;  %v4019_v22 = vor.u32 %v5286_v10, %v4018_v9  ;;  %2532 = vmatpush.bf16.msrb.mxu3 %v4419_v14 }
  0x30   :  { %v4274_v16 = vld [vmem:[%s8200_s1 + $0x680] sm:$0xf]  ;;  %v5382_v19 = vld [vmem:[%s8200_s1 + $0x78c] sm:$0xf0]  ;;  %v5895_v20 = vpack.c.b16 %v437_v12, %v437_v12  ;;  %v5898_v21 = vpack.c.b16 %v438_v13, %v438_v13  ;;  %v4147_v23 = vor.u32 %v5318_v15, %v4146_v11 }
  0x31   :  { %v4402_v18 = vld [vmem:[%s8200_s1 + $0x780] sm:$0xf]  ;;  %v4275_v24 = vor.u32 %v5350_v17, %v4274_v16  ;;  %v5282_v26 = vld [vmem:[%s8200_s1 + $0x46c] sm:$0xf0]  ;;  %2494 = vmatpush.bf16.msrb.mxu0 %v4019_v22  ;;  %v443_v17 = vunpack.c.l.b16 %v24_v3 }
  0x32   :  { %v4002_v25 = vld [vmem:[%s8200_s1 + $0x460] sm:$0xf]  ;;  %v4403_v28 = vor.u32 %v5382_v19, %v4402_v18  ;;  %v5314_v29 = vld [vmem:[%s8200_s1 + $0x56c] sm:$0xf0]  ;;  %2447 = vmatmul.bf16.vlgmr.msra.gmra.mxu0 %v5895_v20  ;;  %2460 = vmatmul.bf16.vlgmr.msra.gmra.mxu1 %v5898_v21 }
  0x33   :  { %v4130_v27 = vld [vmem:[%s8200_s1 + $0x560] sm:$0xf]  ;;  %v5346_v31 = vld [vmem:[%s8200_s1 + $0x66c] sm:$0xf0]  ;;  %v4003_v34 = vor.u32 %v5282_v26, %v4002_v25  ;;  %2507 = vmatpush.bf16.msrb.mxu1 %v4147_v23  ;;  %2520 = vmatpush.bf16.msrb.mxu2 %v4275_v24  ;;  %v444_v25 = vunpack.c.h.b16 %v24_v3 }
  0x34   :  { %v4258_v30 = vld [vmem:[%s8200_s1 + $0x660] sm:$0xf]  ;;  %v5378_v33 = vld [vmem:[%s8200_s1 + $0x76c] sm:$0xf0]  ;;  %v4131_v35 = vor.u32 %v5314_v29, %v4130_v27  ;;  %2533 = vmatpush.bf16.msrb.mxu3 %v4403_v28 }
  0x35   :  { %v4386_v32 = vld [vmem:[%s8200_s1 + $0x760] sm:$0xf]  ;;  %v4259_v36 = vor.u32 %v5346_v31, %v4258_v30  ;;  %v5278_v38 = vld [vmem:[%s8200_s1 + $0x44c] sm:$0xf0]  ;;  %2495 = vmatpush.bf16.msrb.mxu0 %v4003_v34 }
  0x36   :  { %v3986_v37 = vld [vmem:[%s8200_s1 + $0x440] sm:$0xf]  ;;  %v4387_v40 = vor.u32 %v5378_v33, %v4386_v32  ;;  %v5310_v41 = vld [vmem:[%s8200_s1 + $0x54c] sm:$0xf0] }
  0x37   :  { %v4114_v39 = vld [vmem:[%s8200_s1 + $0x540] sm:$0xf]  ;;  %v5342_v43 = vld [vmem:[%s8200_s1 + $0x64c] sm:$0xf0]  ;;  %v3987_v46 = vor.u32 %v5278_v38, %v3986_v37  ;;  %2508 = vmatpush.bf16.msrb.mxu1 %v4131_v35  ;;  %2521 = vmatpush.bf16.msrb.mxu2 %v4259_v36  ;;  %v6046_v38 = vpack.c.b16 %v443_v17, %v443_v17 }
  0x38   :  { %v4242_v42 = vld [vmem:[%s8200_s1 + $0x640] sm:$0xf]  ;;  %v5374_v45 = vld [vmem:[%s8200_s1 + $0x74c] sm:$0xf0]  ;;  %v4115_v47 = vor.u32 %v5310_v41, %v4114_v39  ;;  %2534 = vmatpush.bf16.msrb.mxu3 %v4387_v40 }
  0x39   :  { %v4370_v44 = vld [vmem:[%s8200_s1 + $0x740] sm:$0xf]  ;;  %v4243_v48 = vor.u32 %v5342_v43, %v4242_v42  ;;  %v5274_v50 = vld [vmem:[%s8200_s1 + $0x42c] sm:$0xf0]  ;;  %2496 = vmatpush.bf16.msrb.mxu0 %v3987_v46  ;;  %v6056_v42 = vpack.c.b16 %v444_v25, %v444_v25 }
  0x3a   :  { %v3970_v49 = vld [vmem:[%s8200_s1 + $0x420] sm:$0xf]  ;;  %v4371_v52 = vor.u32 %v5374_v45, %v4370_v44  ;;  %v5306_v53 = vld [vmem:[%s8200_s1 + $0x52c] sm:$0xf0] }
  0x3b   :  { %v4098_v51 = vld [vmem:[%s8200_s1 + $0x520] sm:$0xf]  ;;  %v5338_v55 = vld [vmem:[%s8200_s1 + $0x62c] sm:$0xf0]  ;;  %v3971_v59 = vor.u32 %v5274_v50, %v3970_v49  ;;  %2509 = vmatpush.bf16.msrb.mxu1 %v4115_v47  ;;  %2522 = vmatpush.bf16.msrb.mxu2 %v4243_v48 }
  0x3c   :  { %v4226_v54 = vld [vmem:[%s8200_s1 + $0x620] sm:$0xf]  ;;  %v5370_v57 = vld [vmem:[%s8200_s1 + $0x72c] sm:$0xf0]  ;;  %v4099_v63 = vor.u32 %v5306_v53, %v4098_v51  ;;  %2535 = vmatpush.bf16.msrb.mxu3 %v4371_v52 }
  0x3d   :  { %v4354_v56 = vld [vmem:[%s8200_s1 + $0x720] sm:$0xf]  ;;  %v5270_v60 = vld [vmem:[%s8200_s1 + $0x40c] sm:$0xf0]  ;;  %v4227_v0 = vor.u32 %v5338_v55, %v4226_v54  ;;  %2497 = vmatpush.bf16.msrb.mxu0 %v3971_v59 }
  0x3e   :  { %v3954_v58 = vld [vmem:[%s8200_s1 + $0x400] sm:$0xf]  ;;  %v5302_v62 = vld [vmem:[%s8200_s1 + $0x50c] sm:$0xf0]  ;;  %v4355_v5 = vor.u32 %v5370_v57, %v4354_v56 }
  0x3f   :  { %v4082_v61 = vld [vmem:[%s8200_s1 + $0x500] sm:$0xf]  ;;  %v5334_v2 = vld [vmem:[%s8200_s1 + $0x60c] sm:$0xf0]  ;;  %v3955_v13 = vor.u32 %v5270_v60, %v3954_v58  ;;  %2510 = vmatpush.bf16.msrb.mxu1 %v4099_v63  ;;  %2523 = vmatpush.bf16.msrb.mxu2 %v4227_v0 }
  0x40   :  { %v4210_v1 = vld [vmem:[%s8200_s1 + $0x600] sm:$0xf]  ;;  %v5366_v8 = vld [vmem:[%s8200_s1 + $0x70c] sm:$0xf0]  ;;  %v4083_v18 = vor.u32 %v5302_v62, %v4082_v61  ;;  %2536 = vmatpush.bf16.msrb.mxu3 %v4355_v5 }
  0x41   :  { %v4338_v7 = vld [vmem:[%s8200_s1 + $0x700] sm:$0xf]  ;;  %v23_v9 = vld [vmem:[%s8201_s0 + $0x10] sm:$0xff]  ;;  %v4211_v19 = vor.u32 %v5334_v2, %v4210_v1  ;;  %2498 = vmatpush.bf16.msrb.mxu0 %v3955_v13 }
  0x42   :  { %v4578_v10 = vld [vmem:[%s8200_s1 + $0x8e0] sm:$0xf]  ;;  %v5426_v11 = vld [vmem:[%s8200_s1 + $0x8ec] sm:$0xf0]  ;;  %v441_v24 = vunpack.c.l.b16 %v23_v9  ;;  %v4339_v26 = vor.u32 %v5366_v8, %v4338_v7  ;;  %v442_v28 = vunpack.c.h.b16 %v23_v9 }
  0x43   :  { %v4706_v12 = vld [vmem:[%s8200_s1 + $0x9e0] sm:$0xf]  ;;  %v5458_v14 = vld [vmem:[%s8200_s1 + $0x9ec] sm:$0xf0]  ;;  %v4579_v27 = vor.u32 %v5426_v11, %v4578_v10  ;;  %2511 = vmatpush.bf16.msrb.mxu1 %v4083_v18  ;;  %2524 = vmatpush.bf16.msrb.mxu2 %v4211_v19 }
  0x44   :  { %v4834_v15 = vld [vmem:[%s8200_s1 + $0xae0] sm:$0xf]  ;;  %v5490_v16 = vld [vmem:[%s8200_s1 + $0xaec] sm:$0xf0]  ;;  %v4707_v29 = vor.u32 %v5458_v14, %v4706_v12  ;;  %v6054_v41 = vpack.c.b16 %v441_v24, %v441_v24  ;;  %2537 = vmatpush.bf16.msrb.mxu3 %v4339_v26  ;;  %v6058_v44 = vpack.c.b16 %v442_v28, %v442_v28 }
  0x45   :  { %v4962_v22 = vld [vmem:[%s8200_s1 + $0xbe0] sm:$0xf]  ;;  %v5522_v23 = vld [vmem:[%s8200_s1 + $0xbec] sm:$0xf0]  ;;  %v4835_v30 = vor.u32 %v5490_v16, %v4834_v15  ;;  %2543 = vmatpush.bf16.msra.mxu0 %v4579_v27 }
  0x46   :  { %v4562_v31 = vld [vmem:[%s8200_s1 + $0x8c0] sm:$0xf]  ;;  %v5422_v32 = vld [vmem:[%s8200_s1 + $0x8cc] sm:$0xf0]  ;;  %v4963_v34 = vor.u32 %v5522_v23, %v4962_v22  ;;  %2525 = vmatmul.bf16.vlgmr.msrb.gmra.mxu2 %v6046_v38  ;;  %2499 = vmatmul.bf16.vlgmr.msrb.gmra.mxu0 %v6054_v41 }
  0x47   :  { %v4690_v33 = vld [vmem:[%s8200_s1 + $0x9c0] sm:$0xf]  ;;  %v5454_v35 = vld [vmem:[%s8200_s1 + $0x9cc] sm:$0xf0]  ;;  %v4563_v43 = vor.u32 %v5422_v32, %v4562_v31  ;;  %2556 = vmatpush.bf16.msra.mxu1 %v4707_v29  ;;  %2569 = vmatpush.bf16.msra.mxu2 %v4835_v30 }
  0x48   :  { %v4818_v36 = vld [vmem:[%s8200_s1 + $0xac0] sm:$0xf]  ;;  %v5486_v37 = vld [vmem:[%s8200_s1 + $0xacc] sm:$0xf0]  ;;  %v4691_v45 = vor.u32 %v5454_v35, %v4690_v33  ;;  %2582 = vmatpush.bf16.msra.mxu3 %v4963_v34  ;;  %2512 = vmatmul.bf16.vlgmr.msrb.gmra.mxu1 %v6058_v44 }
  0x49   :  { %v4946_v39 = vld [vmem:[%s8200_s1 + $0xbc0] sm:$0xf]  ;;  %v5518_v40 = vld [vmem:[%s8200_s1 + $0xbcc] sm:$0xf0]  ;;  %v4819_v46 = vor.u32 %v5486_v37, %v4818_v36  ;;  %2538 = vmatmul.bf16.vlgmr.msrb.gmra.mxu3 %v6056_v42  ;;  %2544 = vmatpush.bf16.msra.mxu0 %v4563_v43 }
  0x4a   :  { %v4546_v47 = vld [vmem:[%s8200_s1 + $0x8a0] sm:$0xf]  ;;  %v5418_v48 = vld [vmem:[%s8200_s1 + $0x8ac] sm:$0xf0]  ;;  %v4947_v50 = vor.u32 %v5518_v40, %v4946_v39 }
  0x4b   :  { %v4674_v49 = vld [vmem:[%s8200_s1 + $0x9a0] sm:$0xf]  ;;  %v5450_v51 = vld [vmem:[%s8200_s1 + $0x9ac] sm:$0xf0]  ;;  %v4547_v56 = vor.u32 %v5418_v48, %v4546_v47  ;;  %2557 = vmatpush.bf16.msra.mxu1 %v4691_v45  ;;  %2570 = vmatpush.bf16.msra.mxu2 %v4819_v46 }
  0x4c   :  { %v4802_v52 = vld [vmem:[%s8200_s1 + $0xaa0] sm:$0xf]  ;;  %v5482_v53 = vld [vmem:[%s8200_s1 + $0xaac] sm:$0xf0]  ;;  %v4675_v57 = vor.u32 %v5450_v51, %v4674_v49  ;;  %2583 = vmatpush.bf16.msra.mxu3 %v4947_v50 }
  0x4d   :  { %v4930_v54 = vld [vmem:[%s8200_s1 + $0xba0] sm:$0xf]  ;;  %v5514_v55 = vld [vmem:[%s8200_s1 + $0xbac] sm:$0xf0]  ;;  %v4803_v58 = vor.u32 %v5482_v53, %v4802_v52  ;;  %2545 = vmatpush.bf16.msra.mxu0 %v4547_v56 }
  0x4e   :  { %v4530_v59 = vld [vmem:[%s8200_s1 + $0x880] sm:$0xf]  ;;  %v5414_v60 = vld [vmem:[%s8200_s1 + $0x88c] sm:$0xf0]  ;;  %v4931_v62 = vor.u32 %v5514_v55, %v4930_v54 }
  0x4f   :  { %v4658_v61 = vld [vmem:[%s8200_s1 + $0x980] sm:$0xf]  ;;  %v5446_v63 = vld [vmem:[%s8200_s1 + $0x98c] sm:$0xf0]  ;;  %v4531_v5 = vor.u32 %v5414_v60, %v4530_v59  ;;  %2558 = vmatpush.bf16.msra.mxu1 %v4675_v57  ;;  %2571 = vmatpush.bf16.msra.mxu2 %v4803_v58 }
  0x50   :  { %v4786_v0 = vld [vmem:[%s8200_s1 + $0xa80] sm:$0xf]  ;;  %v5478_v1 = vld [vmem:[%s8200_s1 + $0xa8c] sm:$0xf0]  ;;  %v4659_v7 = vor.u32 %v5446_v63, %v4658_v61  ;;  %2584 = vmatpush.bf16.msra.mxu3 %v4931_v62  ;;  %v26_v61 = vld [vmem:[%s8201_s0 + $0x28] sm:$0xff] }
  0x51   :  { %v4914_v2 = vld [vmem:[%s8200_s1 + $0xb80] sm:$0xf]  ;;  %v5510_v3 = vld [vmem:[%s8200_s1 + $0xb8c] sm:$0xf0]  ;;  %v4787_v8 = vor.u32 %v5478_v1, %v4786_v0  ;;  %2546 = vmatpush.bf16.msra.mxu0 %v4531_v5  ;;  %v5168_v0 = vld [vmem:[%s8200_s1 + $0xe4] sm:$0xf] }
  0x52   :  { %v4514_v9 = vld [vmem:[%s8200_s1 + $0x860] sm:$0xf]  ;;  %v5410_v10 = vld [vmem:[%s8200_s1 + $0x86c] sm:$0xf0]  ;;  %v4915_v12 = vor.u32 %v5510_v3, %v4914_v2  ;;  %v3556_v2 = vld [vmem:[%s8200_s1 + $0xf0] sm:$0xf0] }
  0x53   :  { %v4642_v11 = vld [vmem:[%s8200_s1 + $0x960] sm:$0xf]  ;;  %v5442_v13 = vld [vmem:[%s8200_s1 + $0x96c] sm:$0xf0]  ;;  %v4515_v18 = vor.u32 %v5410_v10, %v4514_v9  ;;  %2559 = vmatpush.bf16.msra.mxu1 %v4659_v7  ;;  %2572 = vmatpush.bf16.msra.mxu2 %v4787_v8  ;;  %v5200_v3 = vld [vmem:[%s8200_s1 + $0x1e4] sm:$0xf] }
  0x54   :  { %v4770_v14 = vld [vmem:[%s8200_s1 + $0xa60] sm:$0xf]  ;;  %v5474_v15 = vld [vmem:[%s8200_s1 + $0xa6c] sm:$0xf0]  ;;  %v4643_v19 = vor.u32 %v5442_v13, %v4642_v11  ;;  %2585 = vmatpush.bf16.msra.mxu3 %v4915_v12  ;;  %v3684_v5 = vld [vmem:[%s8200_s1 + $0x1f0] sm:$0xf0]  ;;  %v447_v12 = vunpack.c.l.b16 %v26_v61 }
  0x55   :  { %v4898_v16 = vld [vmem:[%s8200_s1 + $0xb60] sm:$0xf]  ;;  %v5506_v17 = vld [vmem:[%s8200_s1 + $0xb6c] sm:$0xf0]  ;;  %v4771_v22 = vor.u32 %v5474_v15, %v4770_v14  ;;  %2547 = vmatpush.bf16.msra.mxu0 %v4515_v18  ;;  %v5232_v10 = vld [vmem:[%s8200_s1 + $0x2e4] sm:$0xf]  ;;  %v3559_v18 = vor.u32 %v5168_v0, %v3556_v2 }
  0x56   :  { %v4498_v23 = vld [vmem:[%s8200_s1 + $0x840] sm:$0xf]  ;;  %v5406_v24 = vld [vmem:[%s8200_s1 + $0x84c] sm:$0xf0]  ;;  %v4899_v26 = vor.u32 %v5506_v17, %v4898_v16  ;;  %v3812_v11 = vld [vmem:[%s8200_s1 + $0x2f0] sm:$0xf0]  ;;  %v448_v16 = vunpack.c.h.b16 %v26_v61 }
  0x57   :  { %v4626_v25 = vld [vmem:[%s8200_s1 + $0x940] sm:$0xf]  ;;  %v5438_v27 = vld [vmem:[%s8200_s1 + $0x94c] sm:$0xf0]  ;;  %v4499_v32 = vor.u32 %v5406_v24, %v4498_v23  ;;  %2560 = vmatpush.bf16.msra.mxu1 %v4643_v19  ;;  %2573 = vmatpush.bf16.msra.mxu2 %v4771_v22  ;;  %v3687_v19 = vor.u32 %v5200_v3, %v3684_v5  ;;  %v5164_v23 = vld [vmem:[%s8200_s1 + $0xc4] sm:$0xf] }
  0x58   :  { %v4754_v28 = vld [vmem:[%s8200_s1 + $0xa40] sm:$0xf]  ;;  %v5470_v29 = vld [vmem:[%s8200_s1 + $0xa4c] sm:$0xf0]  ;;  %v4627_v33 = vor.u32 %v5438_v27, %v4626_v25  ;;  %2586 = vmatpush.bf16.msra.mxu3 %v4899_v26  ;;  %v3540_v24 = vld [vmem:[%s8200_s1 + $0xd0] sm:$0xf0]  ;;  %v3815_v25 = vor.u32 %v5232_v10, %v3812_v11 }
  0x59   :  { %v4882_v30 = vld [vmem:[%s8200_s1 + $0xb40] sm:$0xf]  ;;  %v5502_v31 = vld [vmem:[%s8200_s1 + $0xb4c] sm:$0xf0]  ;;  %v4755_v34 = vor.u32 %v5470_v29, %v4754_v28  ;;  %2548 = vmatpush.bf16.msra.mxu0 %v4499_v32  ;;  %v5196_v27 = vld [vmem:[%s8200_s1 + $0x1c4] sm:$0xf] }
  0x5a   :  { %v4482_v35 = vld [vmem:[%s8200_s1 + $0x820] sm:$0xf]  ;;  %v5402_v36 = vld [vmem:[%s8200_s1 + $0x82c] sm:$0xf0]  ;;  %v4883_v39 = vor.u32 %v5502_v31, %v4882_v30  ;;  %v3668_v28 = vld [vmem:[%s8200_s1 + $0x1d0] sm:$0xf0]  ;;  %v6261_v30 = vpack.c.b16 %v447_v12, %v447_v12 }
  0x5b   :  { %v4610_v37 = vld [vmem:[%s8200_s1 + $0x920] sm:$0xf]  ;;  %v5434_v40 = vld [vmem:[%s8200_s1 + $0x92c] sm:$0xf0]  ;;  %v4483_v49 = vor.u32 %v5402_v36, %v4482_v35  ;;  %2561 = vmatpush.bf16.msra.mxu1 %v4627_v33  ;;  %2574 = vmatpush.bf16.msra.mxu2 %v4755_v34  ;;  %v5228_v29 = vld [vmem:[%s8200_s1 + $0x2c4] sm:$0xf]  ;;  %v6274_v35 = vpack.c.b16 %v448_v16, %v448_v16 }
  0x5c   :  { %v4738_v43 = vld [vmem:[%s8200_s1 + $0xa20] sm:$0xf]  ;;  %v5466_v45 = vld [vmem:[%s8200_s1 + $0xa2c] sm:$0xf0]  ;;  %v4611_v53 = vor.u32 %v5434_v40, %v4610_v37  ;;  %2587 = vmatpush.bf16.msra.mxu3 %v4883_v39  ;;  %v3796_v32 = vld [vmem:[%s8200_s1 + $0x2d0] sm:$0xf0]  ;;  %v3543_v37 = vor.u32 %v5164_v23, %v3540_v24  ;;  %v3671_v39 = vor.u32 %v5196_v27, %v3668_v28 }
  0x5d   :  { %v4866_v46 = vld [vmem:[%s8200_s1 + $0xb20] sm:$0xf]  ;;  %v5498_v47 = vld [vmem:[%s8200_s1 + $0xb2c] sm:$0xf0]  ;;  %v4739_v54 = vor.u32 %v5466_v45, %v4738_v43  ;;  %2549 = vmatpush.bf16.msra.mxu0 %v4483_v49  ;;  %v5264_v33 = vld [vmem:[%s8200_s1 + $0x3e4] sm:$0xf]  ;;  %v3799_v45 = vor.u32 %v5228_v29, %v3796_v32 }
  0x5e   :  { %v4466_v48 = vld [vmem:[%s8200_s1 + $0x800] sm:$0xf]  ;;  %v5398_v50 = vld [vmem:[%s8200_s1 + $0x80c] sm:$0xf0]  ;;  %v4867_v58 = vor.u32 %v5498_v47, %v4866_v46  ;;  %v3940_v34 = vld [vmem:[%s8200_s1 + $0x3f0] sm:$0xf0] }
  0x5f   :  { %v4594_v51 = vld [vmem:[%s8200_s1 + $0x900] sm:$0xf]  ;;  %v5430_v52 = vld [vmem:[%s8200_s1 + $0x90c] sm:$0xf0]  ;;  %v4467_v1 = vor.u32 %v5398_v50, %v4466_v48  ;;  %2562 = vmatpush.bf16.msra.mxu1 %v4611_v53  ;;  %2575 = vmatpush.bf16.msra.mxu2 %v4739_v54  ;;  %v5160_v40 = vld [vmem:[%s8200_s1 + $0xa4] sm:$0xf]  ;;  %v3943_v46 = vor.u32 %v5264_v33, %v3940_v34 }
  0x60   :  { %v4722_v55 = vld [vmem:[%s8200_s1 + $0xa00] sm:$0xf]  ;;  %v5462_v56 = vld [vmem:[%s8200_s1 + $0xa0c] sm:$0xf0]  ;;  %v4595_v8 = vor.u32 %v5430_v52, %v4594_v51  ;;  %2588 = vmatpush.bf16.msra.mxu3 %v4867_v58  ;;  %v3524_v43 = vld [vmem:[%s8200_s1 + $0xb0] sm:$0xf0] }
  0x61   :  { %v25_v57 = vld [vmem:[%s8201_s0 + $0x20] sm:$0xff]  ;;  %v5494_v60 = vld [vmem:[%s8200_s1 + $0xb0c] sm:$0xf0]  ;;  %v4723_v9 = vor.u32 %v5462_v56, %v4722_v55  ;;  %2550 = vmatpush.bf16.msra.mxu0 %v4467_v1  ;;  %v3652_v48 = vld [vmem:[%s8200_s1 + $0x1b0] sm:$0xf0]  ;;  %v3527_v53 = vor.u32 %v5160_v40, %v3524_v43 }
  0x62   :  { %v4850_v59 = vld [vmem:[%s8200_s1 + $0xb00] sm:$0xf]  ;;  %v5530_v63 = vld [vmem:[%s8200_s1 + $0xc2c] sm:$0xf0]  ;;  %v445_v7 = vunpack.c.l.b16 %v25_v57  ;;  %v446_v13 = vunpack.c.h.b16 %v25_v57  ;;  %v5192_v47 = vld [vmem:[%s8200_s1 + $0x1a4] sm:$0xf] }
  0x63   :  { %v4994_v62 = vld [vmem:[%s8200_s1 + $0xc20] sm:$0xf]  ;;  %v4851_v14 = vor.u32 %v5494_v60, %v4850_v59  ;;  %v5526_v22 = vld [vmem:[%s8200_s1 + $0xc0c] sm:$0xf0]  ;;  %2563 = vmatpush.bf16.msra.mxu1 %v4595_v8  ;;  %2576 = vmatpush.bf16.msra.mxu2 %v4723_v9  ;;  %v5224_v49 = vld [vmem:[%s8200_s1 + $0x2a4] sm:$0xf]  ;;  %v3655_v54 = vor.u32 %v5192_v47, %v3652_v48 }
  0x64   :  { %v4995_v15 = vor.u32 %v5530_v63, %v4994_v62  ;;  %v4978_v17 = vld [vmem:[%s8200_s1 + $0xc00] sm:$0xf]  ;;  %v6250_v26 = vpack.c.b16 %v445_v7, %v445_v7  ;;  %v6263_v31 = vpack.c.b16 %v446_v13, %v446_v13  ;;  %v3780_v50 = vld [vmem:[%s8200_s1 + $0x2b0] sm:$0xf0]  ;;  %v5260_v51 = vld [vmem:[%s8200_s1 + $0x3c4] sm:$0xf] }
  0x65   :  { %2589 = vmatpush.bf16.msra.mxu3 %v4851_v14  ;;  %v4979_v36 = vor.u32 %v5526_v22, %v4978_v17  ;;  %v3924_v52 = vld [vmem:[%s8200_s1 + $0x3d0] sm:$0xf0]  ;;  %v5156_v55 = vld [vmem:[%s8200_s1 + $0x84] sm:$0xf]  ;;  %v3783_v57 = vor.u32 %v5224_v49, %v3780_v50  ;;  %v27_v1 = vld [vmem:[%s8201_s0 + $0x30] sm:$0xf] }
  0x66   :  { %2601 = vmatpush.bf16.msrb.mxu0 %v4995_v15  ;;  %2577 = vmatmul.bf16.vlgmr.msra.gmra.mxu2 %v6261_v30  ;;  %v3508_v56 = vld [vmem:[%s8200_s1 + $0x90] sm:$0xf0]  ;;  %v3927_v58 = vor.u32 %v5260_v51, %v3924_v52  ;;  %v5188_v59 = vld [vmem:[%s8200_s1 + $0x184] sm:$0xf]  ;;  %v449_v16 = vunpack.c.l.b16 %v27_v1 }
  0x67   :  { %2608 = vmatpush.bf16.msrb.mxu1 %v3559_v18  ;;  %2621 = vmatpush.bf16.msrb.mxu2 %v3687_v19  ;;  %v3636_v60 = vld [vmem:[%s8200_s1 + $0x190] sm:$0xf0]  ;;  %v5220_v61 = vld [vmem:[%s8200_s1 + $0x284] sm:$0xf]  ;;  %v3511_v2 = vor.u32 %v5156_v55, %v3508_v56 }
  0x68   :  { %2551 = vmatmul.bf16.vlgmr.msra.gmra.mxu0 %v6250_v26  ;;  %2564 = vmatmul.bf16.vlgmr.msra.gmra.mxu1 %v6263_v31  ;;  %v3764_v62 = vld [vmem:[%s8200_s1 + $0x290] sm:$0xf0]  ;;  %v5256_v63 = vld [vmem:[%s8200_s1 + $0x3a4] sm:$0xf]  ;;  %v3639_v3 = vor.u32 %v5188_v59, %v3636_v60  ;;  %v6370_v29 = vpack.c.b16 %v449_v16, %v449_v16 }
  0x69   :  { %2634 = vmatpush.bf16.msrb.mxu3 %v3815_v25  ;;  %v3908_v0 = vld [vmem:[%s8200_s1 + $0x3b0] sm:$0xf0]  ;;  %v5152_v5 = vld [vmem:[%s8200_s1 + $0x64] sm:$0xf]  ;;  %v3767_v8 = vor.u32 %v5220_v61, %v3764_v62 }
  0x6a   :  { %2590 = vmatmul.bf16.vlgmr.msra.gmra.mxu3 %v6274_v35  ;;  %2602 = vmatpush.bf16.msrb.mxu0 %v4979_v36  ;;  %v3492_v7 = vld [vmem:[%s8200_s1 + $0x70] sm:$0xf0]  ;;  %v3911_v9 = vor.u32 %v5256_v63, %v3908_v0  ;;  %v5184_v10 = vld [vmem:[%s8200_s1 + $0x164] sm:$0xf] }
  0x6b   :  { %2609 = vmatpush.bf16.msrb.mxu1 %v3543_v37  ;;  %2622 = vmatpush.bf16.msrb.mxu2 %v3671_v39  ;;  %v3620_v11 = vld [vmem:[%s8200_s1 + $0x170] sm:$0xf0]  ;;  %v5216_v12 = vld [vmem:[%s8200_s1 + $0x264] sm:$0xf]  ;;  %v3495_v17 = vor.u32 %v5152_v5, %v3492_v7 }
  0x6c   :  { %v3748_v13 = vld [vmem:[%s8200_s1 + $0x270] sm:$0xf0]  ;;  %v5252_v14 = vld [vmem:[%s8200_s1 + $0x384] sm:$0xf]  ;;  %v3623_v18 = vor.u32 %v5184_v10, %v3620_v11 }
  0x6d   :  { %2635 = vmatpush.bf16.msrb.mxu3 %v3799_v45  ;;  %v3892_v15 = vld [vmem:[%s8200_s1 + $0x390] sm:$0xf0]  ;;  %v5148_v19 = vld [vmem:[%s8200_s1 + $0x44] sm:$0xf]  ;;  %v3751_v23 = vor.u32 %v5216_v12, %v3748_v13 }
  0x6e   :  { %2647 = vmatpush.bf16.msra.mxu0 %v3943_v46  ;;  %v3476_v22 = vld [vmem:[%s8200_s1 + $0x50] sm:$0xf0]  ;;  %v3895_v24 = vor.u32 %v5252_v14, %v3892_v15  ;;  %v5180_v25 = vld [vmem:[%s8200_s1 + $0x144] sm:$0xf] }
  0x6f   :  { %2610 = vmatpush.bf16.msrb.mxu1 %v3527_v53  ;;  %2623 = vmatpush.bf16.msrb.mxu2 %v3655_v54  ;;  %v3604_v27 = vld [vmem:[%s8200_s1 + $0x150] sm:$0xf0]  ;;  %v5212_v28 = vld [vmem:[%s8200_s1 + $0x244] sm:$0xf]  ;;  %v3479_v36 = vor.u32 %v5148_v19, %v3476_v22 }
  0x70   :  { %v3732_v32 = vld [vmem:[%s8200_s1 + $0x250] sm:$0xf0]  ;;  %v5248_v33 = vld [vmem:[%s8200_s1 + $0x364] sm:$0xf]  ;;  %v3607_v37 = vor.u32 %v5180_v25, %v3604_v27 }
  0x71   :  { %2636 = vmatpush.bf16.msrb.mxu3 %v3783_v57  ;;  %v3876_v34 = vld [vmem:[%s8200_s1 + $0x370] sm:$0xf0]  ;;  %v5144_v39 = vld [vmem:[%s8200_s1 + $0x24] sm:$0xf]  ;;  %v3735_v43 = vor.u32 %v5212_v28, %v3732_v32 }
  0x72   :  { %2648 = vmatpush.bf16.msra.mxu0 %v3927_v58  ;;  %v3460_v40 = vld [vmem:[%s8200_s1 + $0x30] sm:$0xf0]  ;;  %v3879_v45 = vor.u32 %v5248_v33, %v3876_v34  ;;  %v5176_v46 = vld [vmem:[%s8200_s1 + $0x124] sm:$0xf] }
  0x73   :  { %2611 = vmatpush.bf16.msrb.mxu1 %v3511_v2  ;;  %2624 = vmatpush.bf16.msrb.mxu2 %v3639_v3  ;;  %v3588_v47 = vld [vmem:[%s8200_s1 + $0x130] sm:$0xf0]  ;;  %v5208_v48 = vld [vmem:[%s8200_s1 + $0x224] sm:$0xf]  ;;  %v3463_v52 = vor.u32 %v5144_v39, %v3460_v40 }
  0x74   :  { %v3716_v49 = vld [vmem:[%s8200_s1 + $0x230] sm:$0xf0]  ;;  %v5244_v50 = vld [vmem:[%s8200_s1 + $0x344] sm:$0xf]  ;;  %v3591_v53 = vor.u32 %v5176_v46, %v3588_v47 }
  0x75   :  { %2637 = vmatpush.bf16.msrb.mxu3 %v3767_v8  ;;  %v3860_v51 = vld [vmem:[%s8200_s1 + $0x350] sm:$0xf0]  ;;  %v5140_v54 = vld [vmem:[%s8200_s1 + $0x4] sm:$0xf]  ;;  %v3719_v57 = vor.u32 %v5208_v48, %v3716_v49 }
  0x76   :  { %2649 = vmatpush.bf16.msra.mxu0 %v3911_v9  ;;  %v3444_v55 = vld [vmem:[%s8200_s1 + $0x10] sm:$0xf0]  ;;  %v5172_v56 = vld [vmem:[%s8200_s1 + $0x104] sm:$0xf]  ;;  %v3863_v58 = vor.u32 %v5244_v50, %v3860_v51 }
  0x77   :  { %2612 = vmatpush.bf16.msrb.mxu1 %v3495_v17  ;;  %2625 = vmatpush.bf16.msrb.mxu2 %v3623_v18  ;;  %v3572_v59 = vld [vmem:[%s8200_s1 + $0x110] sm:$0xf0]  ;;  %v5204_v60 = vld [vmem:[%s8200_s1 + $0x204] sm:$0xf]  ;;  %v3447_v5 = vor.u32 %v5140_v54, %v3444_v55 }
  0x78   :  { %5008 = vmatmul.msk.bf16.vlgmr.msrb.gmra.mxu0 %vm2435_vm0, %v6370_v29  ;;  %v3700_v61 = vld [vmem:[%s8200_s1 + $0x210] sm:$0xf0]  ;;  %v5240_v62 = vld [vmem:[%s8200_s1 + $0x324] sm:$0xf]  ;;  %v3575_v7 = vor.u32 %v5172_v56, %v3572_v59 }
  0x79   :  { %2638 = vmatpush.bf16.msrb.mxu3 %v3751_v23  ;;  %v3844_v63 = vld [vmem:[%s8200_s1 + $0x330] sm:$0xf0]  ;;  %v5296_v0 = vld [vmem:[%s8200_s1 + $0x4e4] sm:$0xf]  ;;  %v3703_v10 = vor.u32 %v5204_v60, %v3700_v61 }
  0x7a   :  { %2650 = vmatpush.bf16.msra.mxu0 %v3895_v24  ;;  %v4068_v1 = vld [vmem:[%s8200_s1 + $0x4f0] sm:$0xf0]  ;;  %v5328_v2 = vld [vmem:[%s8200_s1 + $0x5e4] sm:$0xf]  ;;  %v3847_v11 = vor.u32 %v5240_v62, %v3844_v63 }
  0x7b   :  { %2613 = vmatpush.bf16.msrb.mxu1 %v3479_v36  ;;  %2626 = vmatpush.bf16.msrb.mxu2 %v3607_v37  ;;  %v4196_v3 = vld [vmem:[%s8200_s1 + $0x5f0] sm:$0xf0]  ;;  %v5360_v8 = vld [vmem:[%s8200_s1 + $0x6e4] sm:$0xf]  ;;  %v4071_v13 = vor.u32 %v5296_v0, %v4068_v1 }
  0x7c   :  { %v4324_v9 = vld [vmem:[%s8200_s1 + $0x6f0] sm:$0xf0]  ;;  %v5236_v12 = vld [vmem:[%s8200_s1 + $0x304] sm:$0xf]  ;;  %v4199_v14 = vor.u32 %v5328_v2, %v4196_v3 }
  0x7d   :  { %2639 = vmatpush.bf16.msrb.mxu3 %v3735_v43  ;;  %v3828_v15 = vld [vmem:[%s8200_s1 + $0x310] sm:$0xf0]  ;;  %v5292_v16 = vld [vmem:[%s8200_s1 + $0x4c4] sm:$0xf]  ;;  %v4327_v18 = vor.u32 %v5360_v8, %v4324_v9 }
  0x7e   :  { %2651 = vmatpush.bf16.msra.mxu0 %v3879_v45  ;;  %v4052_v17 = vld [vmem:[%s8200_s1 + $0x4d0] sm:$0xf0]  ;;  %v5324_v19 = vld [vmem:[%s8200_s1 + $0x5c4] sm:$0xf]  ;;  %v3831_v28 = vor.u32 %v5236_v12, %v3828_v15 }
  0x7f   :  { %2614 = vmatpush.bf16.msrb.mxu1 %v3463_v52  ;;  %2627 = vmatpush.bf16.msrb.mxu2 %v3591_v53  ;;  %v4180_v22 = vld [vmem:[%s8200_s1 + $0x5d0] sm:$0xf0]  ;;  %v5356_v23 = vld [vmem:[%s8200_s1 + $0x6c4] sm:$0xf]  ;;  %v4055_v32 = vor.u32 %v5292_v16, %v4052_v17 }
  0x80   :  { %v4308_v24 = vld [vmem:[%s8200_s1 + $0x6d0] sm:$0xf0]  ;;  %v5392_v25 = vld [vmem:[%s8200_s1 + $0x7e4] sm:$0xf]  ;;  %v4183_v33 = vor.u32 %v5324_v19, %v4180_v22 }
  0x81   :  { %2640 = vmatpush.bf16.msrb.mxu3 %v3719_v57  ;;  %v4452_v27 = vld [vmem:[%s8200_s1 + $0x7f0] sm:$0xf0]  ;;  %v5288_v34 = vld [vmem:[%s8200_s1 + $0x4a4] sm:$0xf]  ;;  %v4311_v37 = vor.u32 %v5356_v23, %v4308_v24 }
  0x82   :  { %2652 = vmatpush.bf16.msra.mxu0 %v3863_v58  ;;  %v4036_v36 = vld [vmem:[%s8200_s1 + $0x4b0] sm:$0xf0]  ;;  %v4455_v39 = vor.u32 %v5392_v25, %v4452_v27  ;;  %v5320_v40 = vld [vmem:[%s8200_s1 + $0x5a4] sm:$0xf] }
  0x83   :  { %2615 = vmatpush.bf16.msrb.mxu1 %v3447_v5  ;;  %2628 = vmatpush.bf16.msrb.mxu2 %v3575_v7  ;;  %v4164_v43 = vld [vmem:[%s8200_s1 + $0x5b0] sm:$0xf0]  ;;  %v5352_v45 = vld [vmem:[%s8200_s1 + $0x6a4] sm:$0xf]  ;;  %v4039_v49 = vor.u32 %v5288_v34, %v4036_v36 }
  0x84   :  { %v4292_v46 = vld [vmem:[%s8200_s1 + $0x6b0] sm:$0xf0]  ;;  %v5388_v47 = vld [vmem:[%s8200_s1 + $0x7c4] sm:$0xf]  ;;  %v4167_v50 = vor.u32 %v5320_v40, %v4164_v43 }
  0x85   :  { %2641 = vmatpush.bf16.msrb.mxu3 %v3703_v10  ;;  %v4436_v48 = vld [vmem:[%s8200_s1 + $0x7d0] sm:$0xf0]  ;;  %v5284_v51 = vld [vmem:[%s8200_s1 + $0x484] sm:$0xf]  ;;  %v4295_v53 = vor.u32 %v5352_v45, %v4292_v46 }
  0x86   :  { %2653 = vmatpush.bf16.msra.mxu0 %v3847_v11  ;;  %2629 = vmatmul.bf16.vlgmr.msrb.gmra.mxu2 %v5898_v21  ;;  %v4020_v52 = vld [vmem:[%s8200_s1 + $0x490] sm:$0xf0]  ;;  %v4439_v54 = vor.u32 %v5388_v47, %v4436_v48  ;;  %v5316_v55 = vld [vmem:[%s8200_s1 + $0x584] sm:$0xf] }
  0x87   :  { %2660 = vmatpush.bf16.msra.mxu1 %v4071_v13  ;;  %2673 = vmatpush.bf16.msra.mxu2 %v4199_v14  ;;  %v4148_v56 = vld [vmem:[%s8200_s1 + $0x590] sm:$0xf0]  ;;  %v5348_v57 = vld [vmem:[%s8200_s1 + $0x684] sm:$0xf]  ;;  %v4023_v61 = vor.u32 %v5284_v51, %v4020_v52 }
  0x88   :  { %2642 = vmatmul.bf16.vlgmr.msrb.gmra.mxu3 %v5863_v4  ;;  %2616 = vmatmul.bf16.vlgmr.msrb.gmra.mxu1 %v5895_v20  ;;  %v4276_v58 = vld [vmem:[%s8200_s1 + $0x690] sm:$0xf0]  ;;  %v5384_v59 = vld [vmem:[%s8200_s1 + $0x7a4] sm:$0xf]  ;;  %v4151_v62 = vor.u32 %v5316_v55, %v4148_v56 }
  0x89   :  { %2686 = vmatpush.bf16.msra.mxu3 %v4327_v18  ;;  %v4420_v60 = vld [vmem:[%s8200_s1 + $0x7b0] sm:$0xf0]  ;;  %v5280_v63 = vld [vmem:[%s8200_s1 + $0x464] sm:$0xf]  ;;  %v4279_v1 = vor.u32 %v5348_v57, %v4276_v58 }
  0x8a   :  { %2654 = vmatpush.bf16.msra.mxu0 %v3831_v28  ;;  %v4004_v0 = vld [vmem:[%s8200_s1 + $0x470] sm:$0xf0]  ;;  %v4423_v2 = vor.u32 %v5384_v59, %v4420_v60  ;;  %v5312_v3 = vld [vmem:[%s8200_s1 + $0x564] sm:$0xf] }
  0x8b   :  { %2661 = vmatpush.bf16.msra.mxu1 %v4055_v32  ;;  %2674 = vmatpush.bf16.msra.mxu2 %v4183_v33  ;;  %v4132_v5 = vld [vmem:[%s8200_s1 + $0x570] sm:$0xf0]  ;;  %v5344_v7 = vld [vmem:[%s8200_s1 + $0x664] sm:$0xf]  ;;  %v4007_v11 = vor.u32 %v5280_v63, %v4004_v0 }
  0x8c   :  { %v4260_v8 = vld [vmem:[%s8200_s1 + $0x670] sm:$0xf0]  ;;  %v5380_v9 = vld [vmem:[%s8200_s1 + $0x784] sm:$0xf]  ;;  %v4135_v12 = vor.u32 %v5312_v3, %v4132_v5 }
  0x8d   :  { %2687 = vmatpush.bf16.msra.mxu3 %v4311_v37  ;;  %2655 = vmatmul.bf16.vlgmr.msra.gmra.mxu0 %v5868_v6  ;;  %v4404_v10 = vld [vmem:[%s8200_s1 + $0x790] sm:$0xf0]  ;;  %v5276_v13 = vld [vmem:[%s8200_s1 + $0x444] sm:$0xf]  ;;  %v4263_v15 = vor.u32 %v5344_v7, %v4260_v8 }
  0x8e   :  { %2699 = vmatpush.bf16.msrb.mxu0 %v4455_v39  ;;  %v3988_v14 = vld [vmem:[%s8200_s1 + $0x450] sm:$0xf0]  ;;  %v4407_v16 = vor.u32 %v5380_v9, %v4404_v10  ;;  %v5308_v17 = vld [vmem:[%s8200_s1 + $0x544] sm:$0xf] }
  0x8f   :  { %2662 = vmatpush.bf16.msra.mxu1 %v4039_v49  ;;  %2675 = vmatpush.bf16.msra.mxu2 %v4167_v50  ;;  %v4116_v18 = vld [vmem:[%s8200_s1 + $0x550] sm:$0xf0]  ;;  %v5340_v19 = vld [vmem:[%s8200_s1 + $0x644] sm:$0xf]  ;;  %v3991_v25 = vor.u32 %v5276_v13, %v3988_v14 }
  0x90   :  { %v4244_v22 = vld [vmem:[%s8200_s1 + $0x650] sm:$0xf0]  ;;  %v5376_v23 = vld [vmem:[%s8200_s1 + $0x764] sm:$0xf]  ;;  %v4119_v27 = vor.u32 %v5308_v17, %v4116_v18 }
  0x91   :  { %2688 = vmatpush.bf16.msra.mxu3 %v4295_v53  ;;  %v4388_v24 = vld [vmem:[%s8200_s1 + $0x770] sm:$0xf0]  ;;  %v5272_v28 = vld [vmem:[%s8200_s1 + $0x424] sm:$0xf]  ;;  %v4247_v33 = vor.u32 %v5340_v19, %v4244_v22 }
  0x92   :  { %2700 = vmatpush.bf16.msrb.mxu0 %v4439_v54  ;;  %v3972_v32 = vld [vmem:[%s8200_s1 + $0x430] sm:$0xf0]  ;;  %v4391_v34 = vor.u32 %v5376_v23, %v4388_v24  ;;  %v5304_v36 = vld [vmem:[%s8200_s1 + $0x524] sm:$0xf] }
  0x93   :  { %2663 = vmatpush.bf16.msra.mxu1 %v4023_v61  ;;  %2676 = vmatpush.bf16.msra.mxu2 %v4151_v62  ;;  %v4100_v37 = vld [vmem:[%s8200_s1 + $0x530] sm:$0xf0]  ;;  %v5336_v39 = vld [vmem:[%s8200_s1 + $0x624] sm:$0xf]  ;;  %v3975_v46 = vor.u32 %v5272_v28, %v3972_v32 }
  0x94   :  { %v4228_v40 = vld [vmem:[%s8200_s1 + $0x630] sm:$0xf0]  ;;  %v5372_v43 = vld [vmem:[%s8200_s1 + $0x744] sm:$0xf]  ;;  %v4103_v47 = vor.u32 %v5304_v36, %v4100_v37 }
  0x95   :  { %2689 = vmatpush.bf16.msra.mxu3 %v4279_v1  ;;  %v4372_v45 = vld [vmem:[%s8200_s1 + $0x750] sm:$0xf0]  ;;  %v5268_v48 = vld [vmem:[%s8200_s1 + $0x404] sm:$0xf]  ;;  %v4231_v51 = vor.u32 %v5336_v39, %v4228_v40 }
  0x96   :  { %2701 = vmatpush.bf16.msrb.mxu0 %v4423_v2  ;;  %v3956_v49 = vld [vmem:[%s8200_s1 + $0x410] sm:$0xf0]  ;;  %v5300_v50 = vld [vmem:[%s8200_s1 + $0x504] sm:$0xf]  ;;  %v4375_v52 = vor.u32 %v5372_v43, %v4372_v45 }
  0x97   :  { %2664 = vmatpush.bf16.msra.mxu1 %v4007_v11  ;;  %2677 = vmatpush.bf16.msra.mxu2 %v4135_v12  ;;  %v4084_v53 = vld [vmem:[%s8200_s1 + $0x510] sm:$0xf0]  ;;  %v5332_v54 = vld [vmem:[%s8200_s1 + $0x604] sm:$0xf]  ;;  %v3959_v62 = vor.u32 %v5268_v48, %v3956_v49 }
  0x98   :  { %v4212_v55 = vld [vmem:[%s8200_s1 + $0x610] sm:$0xf0]  ;;  %v5368_v56 = vld [vmem:[%s8200_s1 + $0x724] sm:$0xf]  ;;  %v4087_v63 = vor.u32 %v5300_v50, %v4084_v53 }
  0x99   :  { %2690 = vmatpush.bf16.msra.mxu3 %v4263_v15  ;;  %v4356_v57 = vld [vmem:[%s8200_s1 + $0x730] sm:$0xf0]  ;;  %v5424_v58 = vld [vmem:[%s8200_s1 + $0x8e4] sm:$0xf]  ;;  %v4215_v2 = vor.u32 %v5332_v54, %v4212_v55 }
  0x9a   :  { %2702 = vmatpush.bf16.msrb.mxu0 %v4407_v16  ;;  %v4580_v59 = vld [vmem:[%s8200_s1 + $0x8f0] sm:$0xf0]  ;;  %v5456_v60 = vld [vmem:[%s8200_s1 + $0x9e4] sm:$0xf]  ;;  %v4359_v3 = vor.u32 %v5368_v56, %v4356_v57 }
  0x9b   :  { %2665 = vmatpush.bf16.msra.mxu1 %v3991_v25  ;;  %2678 = vmatpush.bf16.msra.mxu2 %v4119_v27  ;;  %v4708_v61 = vld [vmem:[%s8200_s1 + $0x9f0] sm:$0xf0]  ;;  %v5488_v0 = vld [vmem:[%s8200_s1 + $0xae4] sm:$0xf]  ;;  %v4583_v7 = vor.u32 %v5424_v58, %v4580_v59  ;;  %v6736_v59 = vld [vmem:[%s8202_s2] sm:$0xf] }
  0x9c   :  { %v4836_v1 = vld [vmem:[%s8200_s1 + $0xaf0] sm:$0xf0]  ;;  %v5364_v5 = vld [vmem:[%s8200_s1 + $0x704] sm:$0xf]  ;;  %v4711_v8 = vor.u32 %v5456_v60, %v4708_v61 }
  0x9d   :  { %2691 = vmatpush.bf16.msra.mxu3 %v4247_v33  ;;  %v4340_v9 = vld [vmem:[%s8200_s1 + $0x710] sm:$0xf0]  ;;  %v5420_v10 = vld [vmem:[%s8200_s1 + $0x8c4] sm:$0xf]  ;;  %v4839_v12 = vor.u32 %v5488_v0, %v4836_v1 }
  0x9e   :  { %2703 = vmatpush.bf16.msrb.mxu0 %v4391_v34  ;;  %v4564_v11 = vld [vmem:[%s8200_s1 + $0x8d0] sm:$0xf0]  ;;  %v5452_v13 = vld [vmem:[%s8200_s1 + $0x9c4] sm:$0xf]  ;;  %v4343_v19 = vor.u32 %v5364_v5, %v4340_v9  ;;  %v422_v5 = vperm.slane %v6736_v59, 0 }
  0x9f   :  { %2666 = vmatpush.bf16.msra.mxu1 %v3975_v46  ;;  %2679 = vmatpush.bf16.msra.mxu2 %v4103_v47  ;;  %v4692_v14 = vld [vmem:[%s8200_s1 + $0x9d0] sm:$0xf0]  ;;  %v5484_v15 = vld [vmem:[%s8200_s1 + $0xac4] sm:$0xf]  ;;  %v4567_v22 = vor.u32 %v5420_v10, %v4564_v11 }
  0xa0   :  { %v4820_v16 = vld [vmem:[%s8200_s1 + $0xad0] sm:$0xf0]  ;;  %v5520_v17 = vld [vmem:[%s8200_s1 + $0xbe4] sm:$0xf]  ;;  %v4695_v23 = vor.u32 %v5452_v13, %v4692_v14 }
  0xa1   :  { %2692 = vmatpush.bf16.msra.mxu3 %v4231_v51  ;;  %v4964_v18 = vld [vmem:[%s8200_s1 + $0xbf0] sm:$0xf0]  ;;  %v5416_v24 = vld [vmem:[%s8200_s1 + $0x8a4] sm:$0xf]  ;;  %v4823_v27 = vor.u32 %v5484_v15, %v4820_v16 }
  0xa2   :  { %2704 = vmatpush.bf16.msrb.mxu0 %v4375_v52  ;;  %v4548_v25 = vld [vmem:[%s8200_s1 + $0x8b0] sm:$0xf0]  ;;  %v4967_v28 = vor.u32 %v5520_v17, %v4964_v18  ;;  %v5448_v32 = vld [vmem:[%s8200_s1 + $0x9a4] sm:$0xf] }
  0xa3   :  { %2667 = vmatpush.bf16.msra.mxu1 %v3959_v62  ;;  %2680 = vmatpush.bf16.msra.mxu2 %v4087_v63  ;;  %v4676_v33 = vld [vmem:[%s8200_s1 + $0x9b0] sm:$0xf0]  ;;  %v5480_v34 = vld [vmem:[%s8200_s1 + $0xaa4] sm:$0xf]  ;;  %v4551_v40 = vor.u32 %v5416_v24, %v4548_v25 }
  0xa4   :  { %v4804_v36 = vld [vmem:[%s8200_s1 + $0xab0] sm:$0xf0]  ;;  %v5516_v37 = vld [vmem:[%s8200_s1 + $0xbc4] sm:$0xf]  ;;  %v4679_v43 = vor.u32 %v5448_v32, %v4676_v33 }
  0xa5   :  { %2693 = vmatpush.bf16.msra.mxu3 %v4215_v2  ;;  %v4948_v39 = vld [vmem:[%s8200_s1 + $0xbd0] sm:$0xf0]  ;;  %v5412_v45 = vld [vmem:[%s8200_s1 + $0x884] sm:$0xf]  ;;  %v4807_v47 = vor.u32 %v5480_v34, %v4804_v36 }
  0xa6   :  { %2705 = vmatpush.bf16.msrb.mxu0 %v4359_v3  ;;  %2681 = vmatmul.bf16.vlgmr.msra.gmra.mxu2 %v6058_v44  ;;  %v4532_v46 = vld [vmem:[%s8200_s1 + $0x890] sm:$0xf0]  ;;  %v4951_v48 = vor.u32 %v5516_v37, %v4948_v39  ;;  %v5444_v49 = vld [vmem:[%s8200_s1 + $0x984] sm:$0xf] }
  0xa7   :  { %2712 = vmatpush.bf16.msrb.mxu1 %v4583_v7  ;;  %2725 = vmatpush.bf16.msrb.mxu2 %v4711_v8  ;;  %v4660_v50 = vld [vmem:[%s8200_s1 + $0x990] sm:$0xf0]  ;;  %v5476_v51 = vld [vmem:[%s8200_s1 + $0xa84] sm:$0xf]  ;;  %v4535_v55 = vor.u32 %v5412_v45, %v4532_v46 }
  0xa8   :  { %2694 = vmatmul.bf16.vlgmr.msra.gmra.mxu3 %v6046_v38  ;;  %2668 = vmatmul.bf16.vlgmr.msra.gmra.mxu1 %v6054_v41  ;;  %v4788_v52 = vld [vmem:[%s8200_s1 + $0xa90] sm:$0xf0]  ;;  %v5512_v53 = vld [vmem:[%s8200_s1 + $0xba4] sm:$0xf]  ;;  %v4663_v56 = vor.u32 %v5444_v49, %v4660_v50  ;;  %v2474_v32 = vpop.f32.mrf.mxu2 }
  0xa9   :  { %2738 = vmatpush.bf16.msrb.mxu3 %v4839_v12  ;;  %v4932_v54 = vld [vmem:[%s8200_s1 + $0xbb0] sm:$0xf0]  ;;  %v5408_v57 = vld [vmem:[%s8200_s1 + $0x864] sm:$0xf]  ;;  %v4791_v60 = vor.u32 %v5476_v51, %v4788_v52 }
  0xaa   :  { %2706 = vmatpush.bf16.msrb.mxu0 %v4343_v19  ;;  %v4516_v58 = vld [vmem:[%s8200_s1 + $0x870] sm:$0xf0]  ;;  %v4935_v61 = vor.u32 %v5512_v53, %v4932_v54  ;;  %v5440_v62 = vld [vmem:[%s8200_s1 + $0x964] sm:$0xf] }
  0xab   :  { %2713 = vmatpush.bf16.msrb.mxu1 %v4567_v22  ;;  %2726 = vmatpush.bf16.msrb.mxu2 %v4695_v23  ;;  %v4644_v63 = vld [vmem:[%s8200_s1 + $0x970] sm:$0xf0]  ;;  %v5472_v0 = vld [vmem:[%s8200_s1 + $0xa64] sm:$0xf]  ;;  %v4519_v7 = vor.u32 %v5408_v57, %v4516_v58 }
  0xac   :  { %v4772_v1 = vld [vmem:[%s8200_s1 + $0xa70] sm:$0xf0]  ;;  %v5508_v2 = vld [vmem:[%s8200_s1 + $0xb84] sm:$0xf]  ;;  %v4647_v8 = vor.u32 %v5440_v62, %v4644_v63 }
  0xad   :  { %2739 = vmatpush.bf16.msrb.mxu3 %v4823_v27  ;;  %2707 = vmatmul.bf16.vlgmr.msrb.gmra.mxu0 %v6056_v42  ;;  %v4916_v3 = vld [vmem:[%s8200_s1 + $0xb90] sm:$0xf0]  ;;  %v5404_v9 = vld [vmem:[%s8200_s1 + $0x844] sm:$0xf]  ;;  %v4775_v11 = vor.u32 %v5472_v0, %v4772_v1 }
  0xae   :  { %2751 = vmatpush.bf16.msra.mxu0 %v4967_v28  ;;  %v4500_v10 = vld [vmem:[%s8200_s1 + $0x850] sm:$0xf0]  ;;  %v4919_v12 = vor.u32 %v5508_v2, %v4916_v3  ;;  %v5436_v13 = vld [vmem:[%s8200_s1 + $0x944] sm:$0xf]  ;;  %v3562_v2 = vld [vmem:[%s8200_s1 + $0xe8] sm:$0xf] }
  0xaf   :  { %2714 = vmatpush.bf16.msrb.mxu1 %v4551_v40  ;;  %2727 = vmatpush.bf16.msrb.mxu2 %v4679_v43  ;;  %v4628_v14 = vld [vmem:[%s8200_s1 + $0x950] sm:$0xf0]  ;;  %v5468_v15 = vld [vmem:[%s8200_s1 + $0xa44] sm:$0xf]  ;;  %v2448_v19 = vpop.f32.mrf.mxu0  ;;  %v2461_v23 = vpop.f32.mrf.mxu1  ;;  %v4503_v24 = vor.u32 %v5404_v9, %v4500_v10  ;;  %v5171_v3 = vld [vmem:[%s8200_s1 + $0xf4] sm:$0xf0] }
  0xb0   :  { %v4756_v16 = vld [vmem:[%s8200_s1 + $0xa50] sm:$0xf0]  ;;  %v5504_v17 = vld [vmem:[%s8200_s1 + $0xb64] sm:$0xf]  ;;  %v2449_v22 = vadd.f32 %v2448_v19, %v422_v5  ;;  %v4631_v25 = vor.u32 %v5436_v13, %v4628_v14  ;;  %v2487_v43 = vpop.f32.mrf.mxu3  ;;  %v3690_v9 = vld [vmem:[%s8200_s1 + $0x1e8] sm:$0xf] }
  0xb1   :  { %2740 = vmatpush.bf16.msrb.mxu3 %v4807_v47  ;;  %v4900_v18 = vld [vmem:[%s8200_s1 + $0xb70] sm:$0xf0]  ;;  %v5400_v27 = vld [vmem:[%s8200_s1 + $0x824] sm:$0xf]  ;;  %v4759_v33 = vor.u32 %v5468_v15, %v4756_v16  ;;  %v5203_v10 = vld [vmem:[%s8200_s1 + $0x1f4] sm:$0xf0] }
  0xb2   :  { %2752 = vmatpush.bf16.msra.mxu0 %v4951_v48  ;;  %v4484_v28 = vld [vmem:[%s8200_s1 + $0x830] sm:$0xf0]  ;;  %v4903_v34 = vor.u32 %v5504_v17, %v4900_v18  ;;  %v5432_v36 = vld [vmem:[%s8200_s1 + $0x924] sm:$0xf]  ;;  %v2462_v40 = vadd.f32 %v2461_v23, %v2449_v22  ;;  %v3563_v17 = vor.u32 %v5171_v3, %v3562_v2  ;;  %v3691_v23 = vor.u32 %v5203_v10, %v3690_v9  ;;  %v5227_v2 = vld [vmem:[%s8200_s1 + $0x2b4] sm:$0xf0] }
  0xb3   :  { %2715 = vmatpush.bf16.msrb.mxu1 %v4535_v55  ;;  %2728 = vmatpush.bf16.msrb.mxu2 %v4663_v56  ;;  %v4612_v37 = vld [vmem:[%s8200_s1 + $0x930] sm:$0xf0]  ;;  %v5464_v39 = vld [vmem:[%s8200_s1 + $0xa24] sm:$0xf]  ;;  %v4487_v49 = vor.u32 %v5400_v27, %v4484_v28  ;;  %v3674_v27 = vld [vmem:[%s8200_s1 + $0x1c8] sm:$0xf] }
  0xb4   :  { %v4740_v45 = vld [vmem:[%s8200_s1 + $0xa30] sm:$0xf0]  ;;  %v5500_v46 = vld [vmem:[%s8200_s1 + $0xb44] sm:$0xf]  ;;  %v2475_v48 = vadd.f32 %v2474_v32, %v2462_v40  ;;  %v4615_v50 = vor.u32 %v5432_v36, %v4612_v37  ;;  %v5199_v28 = vld [vmem:[%s8200_s1 + $0x1d4] sm:$0xf0] }
  0xb5   :  { %2741 = vmatpush.bf16.msrb.mxu3 %v4791_v60  ;;  %v4884_v47 = vld [vmem:[%s8200_s1 + $0xb50] sm:$0xf0]  ;;  %v5396_v51 = vld [vmem:[%s8200_s1 + $0x804] sm:$0xf]  ;;  %v4743_v54 = vor.u32 %v5464_v39, %v4740_v45  ;;  %v3818_v32 = vld [vmem:[%s8200_s1 + $0x2e8] sm:$0xf] }
  0xb6   :  { %2753 = vmatpush.bf16.msra.mxu0 %v4935_v61  ;;  %v4468_v52 = vld [vmem:[%s8200_s1 + $0x810] sm:$0xf0]  ;;  %v5428_v53 = vld [vmem:[%s8200_s1 + $0x904] sm:$0xf]  ;;  %v4887_v55 = vor.u32 %v5500_v46, %v4884_v47  ;;  %v6823_v60 = vadd.f32 %v2487_v43, %v2475_v48  ;;  %v3946_v36 = vld [vmem:[%s8200_s1 + $0x3e8] sm:$0xf]  ;;  %v3675_v43 = vor.u32 %v5199_v28, %v3674_v27 }
  0xb7   :  { %2716 = vmatpush.bf16.msrb.mxu1 %v4519_v7  ;;  %2729 = vmatpush.bf16.msrb.mxu2 %v4647_v8  ;;  %v4596_v56 = vld [vmem:[%s8200_s1 + $0x910] sm:$0xf0]  ;;  %v5460_v57 = vld [vmem:[%s8200_s1 + $0xa04] sm:$0xf]  ;;  %v2450_v0 = vpop.f32.mrf.mxu0  ;;  %v2463_v5 = vpop.f32.mrf.mxu1  ;;  %v4471_v7 = vor.u32 %v5396_v51, %v4468_v52  ;;  %v5267_v37 = vld [vmem:[%s8200_s1 + $0x3f4] sm:$0xf0] }
  0xb8   :  { %v4724_v58 = vld [vmem:[%s8200_s1 + $0xa10] sm:$0xf0]  ;;  %v5496_v61 = vld [vmem:[%s8200_s1 + $0xb24] sm:$0xf]  ;;  %v4599_v8 = vor.u32 %v5428_v53, %v4596_v56  ;;  %v2489_v15 = vpop.f32.mrf.mxu3  ;;  %v3530_v46 = vld [vmem:[%s8200_s1 + $0xa8] sm:$0xf] }
  0xb9   :  { %2742 = vmatpush.bf16.msrb.mxu3 %v4775_v11  ;;  %v4868_v62 = vld [vmem:[%s8200_s1 + $0xb30] sm:$0xf0]  ;;  %v5528_v63 = vld [vmem:[%s8200_s1 + $0xc24] sm:$0xf]  ;;  %v2476_v11 = vpop.f32.mrf.mxu2  ;;  %v5163_v47 = vld [vmem:[%s8200_s1 + $0xb4] sm:$0xf0] }
  0xba   :  { %2754 = vmatpush.bf16.msra.mxu0 %v4919_v12  ;;  %v4996_v1 = vld [vmem:[%s8200_s1 + $0xc30] sm:$0xf0]  ;;  %v4727_v12 = vor.u32 %v5460_v57, %v4724_v58  ;;  %v4871_v13 = vor.u32 %v5496_v61, %v4868_v62  ;;  %v5492_v14 = vld [vmem:[%s8200_s1 + $0xb04] sm:$0xf]  ;;  %v3658_v48 = vld [vmem:[%s8200_s1 + $0x1a8] sm:$0xf] }
  0xbb   :  { %2717 = vmatpush.bf16.msrb.mxu1 %v4503_v24  ;;  %2730 = vmatpush.bf16.msrb.mxu2 %v4631_v25  ;;  %v4999_v16 = vor.u32 %v5528_v63, %v4996_v1  ;;  %v4852_v18 = vld [vmem:[%s8200_s1 + $0xb10] sm:$0xf0]  ;;  %v5524_v19 = vld [vmem:[%s8200_s1 + $0xc04] sm:$0xf]  ;;  %v3546_v24 = vld [vmem:[%s8200_s1 + $0xc8] sm:$0xf] }
  0xbc   :  { %v4980_v22 = vld [vmem:[%s8200_s1 + $0xc10] sm:$0xf0]  ;;  %v5167_v25 = vld [vmem:[%s8200_s1 + $0xd4] sm:$0xf0]  ;;  %v3802_v51 = vld [vmem:[%s8200_s1 + $0x2c8] sm:$0xf] }
  0xbd   :  { %2743 = vmatpush.bf16.msrb.mxu3 %v4759_v33  ;;  %v5235_v33 = vld [vmem:[%s8200_s1 + $0x2f4] sm:$0xf0]  ;;  %v4983_v39 = vor.u32 %v5524_v19, %v4980_v22  ;;  %v3547_v40 = vor.u32 %v5167_v25, %v3546_v24  ;;  %v3930_v53 = vld [vmem:[%s8200_s1 + $0x3c8] sm:$0xf] }
  0xbe   :  { %2755 = vmatpush.bf16.msra.mxu0 %v4903_v34  ;;  %v4855_v34 = vor.u32 %v5492_v14, %v4852_v18  ;;  %v3819_v45 = vor.u32 %v5235_v33, %v3818_v32  ;;  %v5231_v52 = vld [vmem:[%s8200_s1 + $0x2d4] sm:$0xf0]  ;;  %v3514_v58 = vld [vmem:[%s8200_s1 + $0x88] sm:$0xf] }
  0xbf   :  { %2718 = vmatpush.bf16.msrb.mxu1 %v4487_v49  ;;  %2731 = vmatpush.bf16.msrb.mxu2 %v4615_v50  ;;  %v3947_v49 = vor.u32 %v5267_v37, %v3946_v36  ;;  %v5195_v50 = vld [vmem:[%s8200_s1 + $0x1b4] sm:$0xf0]  ;;  %v3803_v57 = vor.u32 %v5231_v52, %v3802_v51  ;;  %v3642_v62 = vld [vmem:[%s8200_s1 + $0x188] sm:$0xf] }
  0xc0   :  { %v3659_v56 = vor.u32 %v5195_v50, %v3658_v48  ;;  %v5159_v61 = vld [vmem:[%s8200_s1 + $0x94] sm:$0xf0]  ;;  %v3786_v1 = vld [vmem:[%s8200_s1 + $0x2a8] sm:$0xf] }
  0xc1   :  { %2744 = vmatpush.bf16.msrb.mxu3 %v4743_v54  ;;  %v5263_v54 = vld [vmem:[%s8200_s1 + $0x3d4] sm:$0xf0]  ;;  %v3914_v3 = vld [vmem:[%s8200_s1 + $0x3a8] sm:$0xf] }
  0xc2   :  { %2756 = vmatpush.bf16.msra.mxu0 %v4887_v55  ;;  %v3531_v55 = vor.u32 %v5163_v47, %v3530_v46  ;;  %v3931_v63 = vor.u32 %v5263_v54, %v3930_v53  ;;  %v5191_v0 = vld [vmem:[%s8200_s1 + $0x194] sm:$0xf0]  ;;  %v3626_v15 = vld [vmem:[%s8200_s1 + $0x168] sm:$0xf] }
  0xc3   :  { %2719 = vmatpush.bf16.msrb.mxu1 %v4471_v7  ;;  %2732 = vmatpush.bf16.msrb.mxu2 %v4599_v8  ;;  %v5259_v5 = vld [vmem:[%s8200_s1 + $0x3b4] sm:$0xf0]  ;;  %v2500_v7 = vpop.f32.mrf.mxu0  ;;  %v3515_v8 = vor.u32 %v5159_v61, %v3514_v58  ;;  %v3643_v11 = vor.u32 %v5191_v0, %v3642_v62  ;;  %v3898_v22 = vld [vmem:[%s8200_s1 + $0x388] sm:$0xf] }
  0xc4   :  { %v2501_v9 = vadd.f32 %v2500_v7, %v6823_v60  ;;  %v5155_v14 = vld [vmem:[%s8200_s1 + $0x74] sm:$0xf0]  ;;  %v3482_v32 = vld [vmem:[%s8200_s1 + $0x48] sm:$0xf] }
  0xc5   :  { %2745 = vmatpush.bf16.msrb.mxu3 %v4727_v12  ;;  %v2513_v10 = vpop.f32.mrf.mxu1  ;;  %v3787_v12 = vor.u32 %v5227_v2, %v3786_v1  ;;  %v5187_v60 = vld [vmem:[%s8200_s1 + $0x174] sm:$0xf0]  ;;  %v3882_v46 = vld [vmem:[%s8200_s1 + $0x368] sm:$0xf] }
  0xc6   :  { %2757 = vmatpush.bf16.msra.mxu0 %v4871_v13  ;;  %2720 = vmatmul.bf16.vlgmr.msrb.gmra.mxu1 %v6250_v26  ;;  %v3498_v13 = vld [vmem:[%s8200_s1 + $0x68] sm:$0xf]  ;;  %v5223_v18 = vld [vmem:[%s8200_s1 + $0x294] sm:$0xf0]  ;;  %v2514_v19 = vadd.f32 %v2513_v10, %v2501_v9  ;;  %v3627_v27 = vor.u32 %v5187_v60, %v3626_v15 }
  0xc7   :  { %2770 = vmatpush.bf16.msra.mxu1 %v4999_v16  ;;  %2777 = vmatpush.bf16.msra.mxu2 %v3563_v17  ;;  %v3915_v16 = vor.u32 %v5259_v5, %v3914_v3  ;;  %v3770_v17 = vld [vmem:[%s8200_s1 + $0x288] sm:$0xf]  ;;  %v3499_v24 = vor.u32 %v5155_v14, %v3498_v13  ;;  %v5151_v33 = vld [vmem:[%s8200_s1 + $0x54] sm:$0xf0] }
  0xc8   :  { %2733 = vmatmul.bf16.vlgmr.msrb.gmra.mxu2 %v6263_v31  ;;  %2746 = vmatmul.bf16.vlgmr.msrb.gmra.mxu3 %v6261_v30  ;;  %v3771_v28 = vor.u32 %v5223_v18, %v3770_v17  ;;  %v5251_v47 = vld [vmem:[%s8200_s1 + $0x374] sm:$0xf0]  ;;  %v3483_v50 = vor.u32 %v5151_v33, %v3482_v32  ;;  %v3466_v54 = vld [vmem:[%s8200_s1 + $0x28] sm:$0xf] }
  0xc9   :  { %2790 = vmatpush.bf16.msra.mxu3 %v3691_v23  ;;  %v5255_v23 = vld [vmem:[%s8200_s1 + $0x394] sm:$0xf0]  ;;  %v2526_v25 = vpop.f32.mrf.mxu2  ;;  %v3738_v61 = vld [vmem:[%s8200_s1 + $0x248] sm:$0xf] }
  0xca   :  { %2758 = vmatpush.bf16.msra.mxu0 %v4855_v34  ;;  %v3610_v34 = vld [vmem:[%s8200_s1 + $0x148] sm:$0xf]  ;;  %v2527_v36 = vadd.f32 %v2526_v25, %v2514_v19  ;;  %v5179_v58 = vld [vmem:[%s8200_s1 + $0x134] sm:$0xf0] }
  0xcb   :  { %2771 = vmatpush.bf16.msra.mxu1 %v4983_v39  ;;  %2778 = vmatpush.bf16.msra.mxu2 %v3547_v40  ;;  %v3899_v39 = vor.u32 %v5255_v23, %v3898_v22  ;;  %v5183_v40 = vld [vmem:[%s8200_s1 + $0x154] sm:$0xf0]  ;;  %v3450_v2 = vld [vmem:[%s8200_s1 + $0x8] sm:$0xf] }
  0xcc   :  { %v2539_v37 = vpop.f32.mrf.mxu3  ;;  %v3611_v52 = vor.u32 %v5183_v40, %v3610_v34  ;;  %v5215_v62 = vld [vmem:[%s8200_s1 + $0x254] sm:$0xf0]  ;;  %v3578_v9 = vld [vmem:[%s8200_s1 + $0x108] sm:$0xf] }
  0xcd   :  { %2791 = vmatpush.bf16.msra.mxu3 %v3675_v43  ;;  %2759 = vmatmul.bf16.vlgmr.msra.gmra.mxu0 %v6274_v35  ;;  %v3754_v43 = vld [vmem:[%s8200_s1 + $0x268] sm:$0xf]  ;;  %v6986_v48 = vadd.f32 %v2539_v37, %v2527_v36  ;;  %v2515_v51 = vpop.f32.mrf.mxu1  ;;  %v5247_v0 = vld [vmem:[%s8200_s1 + $0x354] sm:$0xf0]  ;;  %v3739_v7 = vor.u32 %v5215_v62, %v3738_v61 }
  0xce   :  { %2803 = vmatpush.bf16.msrb.mxu0 %v3819_v45  ;;  %v5219_v45 = vld [vmem:[%s8200_s1 + $0x274] sm:$0xf0]  ;;  %v3722_v13 = vld [vmem:[%s8200_s1 + $0x228] sm:$0xf] }
  0xcf   :  { %2816 = vmatpush.bf16.msrb.mxu1 %v3947_v49  ;;  %2779 = vmatpush.bf16.msra.mxu2 %v3531_v55  ;;  %v2502_v49 = vpop.f32.mrf.mxu0  ;;  %v3755_v53 = vor.u32 %v5219_v45, %v3754_v43  ;;  %v5147_v55 = vld [vmem:[%s8200_s1 + $0x34] sm:$0xf0]  ;;  %v3850_v15 = vld [vmem:[%s8200_s1 + $0x328] sm:$0xf] }
  0xd0   :  { %v3467_v1 = vor.u32 %v5147_v55, %v3466_v54  ;;  %v5175_v10 = vld [vmem:[%s8200_s1 + $0x114] sm:$0xf0]  ;;  %v4074_v60 = vld [vmem:[%s8200_s1 + $0x4e8] sm:$0xf] }
  0xd1   :  { %2792 = vmatpush.bf16.msra.mxu3 %v3659_v56  ;;  %v3594_v56 = vld [vmem:[%s8200_s1 + $0x128] sm:$0xf]  ;;  %v2528_v3 = vpop.f32.mrf.mxu2  ;;  %v5211_v14 = vld [vmem:[%s8200_s1 + $0x234] sm:$0xf0]  ;;  %v3579_v23 = vor.u32 %v5175_v10, %v3578_v9 }
  0xd2   :  { %2804 = vmatpush.bf16.msrb.mxu0 %v3803_v57  ;;  %v3883_v57 = vor.u32 %v5251_v47, %v3882_v46  ;;  %v3595_v5 = vor.u32 %v5179_v58, %v3594_v56  ;;  %v5299_v17 = vld [vmem:[%s8200_s1 + $0x4f4] sm:$0xf0]  ;;  %v4202_v19 = vld [vmem:[%s8200_s1 + $0x5e8] sm:$0xf] }
  0xd3   :  { %2817 = vmatpush.bf16.msrb.mxu1 %v3931_v63  ;;  %2780 = vmatpush.bf16.msra.mxu2 %v3515_v8  ;;  %v3866_v63 = vld [vmem:[%s8200_s1 + $0x348] sm:$0xf]  ;;  %v5143_v8 = vld [vmem:[%s8200_s1 + $0x14] sm:$0xf0] }
  0xd4   :  { %v3451_v18 = vor.u32 %v5143_v8, %v3450_v2  ;;  %v5331_v22 = vld [vmem:[%s8200_s1 + $0x5f4] sm:$0xf0]  ;;  %v3706_v25 = vld [vmem:[%s8200_s1 + $0x208] sm:$0xf] }
  0xd5   :  { %2793 = vmatpush.bf16.msra.mxu3 %v3643_v11  ;;  %v2541_v11 = vpop.f32.mrf.mxu3  ;;  %v5207_v32 = vld [vmem:[%s8200_s1 + $0x214] sm:$0xf0]  ;;  %v3834_v33 = vld [vmem:[%s8200_s1 + $0x308] sm:$0xf]  ;;  %v4203_v36 = vor.u32 %v5331_v22, %v4202_v19 }
  0xd6   :  { %2805 = vmatpush.bf16.msrb.mxu0 %v3787_v12  ;;  %5009 = vmatmul.msk.bf16.vlgmr.msra.gmra.mxu1 %vm2435_vm0, %v6370_v29  ;;  %v3867_v12 = vor.u32 %v5247_v0, %v3866_v63  ;;  %v5239_v34 = vld [vmem:[%s8200_s1 + $0x314] sm:$0xf0]  ;;  %v4058_v37 = vld [vmem:[%s8200_s1 + $0x4c8] sm:$0xf]  ;;  %v3707_v47 = vor.u32 %v5207_v32, %v3706_v25 }
  0xd7   :  { %2818 = vmatpush.bf16.msrb.mxu1 %v3915_v16  ;;  %2781 = vmatpush.bf16.msra.mxu2 %v3499_v24  ;;  %v5243_v16 = vld [vmem:[%s8200_s1 + $0x334] sm:$0xf0]  ;;  %v3723_v24 = vor.u32 %v5211_v14, %v3722_v13  ;;  %v4186_v40 = vld [vmem:[%s8200_s1 + $0x5c8] sm:$0xf]  ;;  %v3835_v51 = vor.u32 %v5239_v34, %v3834_v33 }
  0xd8   :  { %v5327_v43 = vld [vmem:[%s8200_s1 + $0x5d4] sm:$0xf0]  ;;  %v4330_v45 = vld [vmem:[%s8200_s1 + $0x6e8] sm:$0xf] }
  0xd9   :  { %2794 = vmatpush.bf16.msra.mxu3 %v3627_v27  ;;  %v3851_v27 = vor.u32 %v5243_v16, %v3850_v15  ;;  %v5363_v46 = vld [vmem:[%s8200_s1 + $0x6f4] sm:$0xf0]  ;;  %v4458_v49 = vld [vmem:[%s8200_s1 + $0x7e8] sm:$0xf] }
  0xda   :  { %2806 = vmatpush.bf16.msrb.mxu0 %v3771_v28  ;;  %v4075_v28 = vor.u32 %v5299_v17, %v4074_v60  ;;  %v4331_v54 = vor.u32 %v5363_v46, %v4330_v45  ;;  %v4042_v55 = vld [vmem:[%s8200_s1 + $0x4a8] sm:$0xf]  ;;  %v5291_v56 = vld [vmem:[%s8200_s1 + $0x4b4] sm:$0xf0] }
  0xdb   :  { %2819 = vmatpush.bf16.msrb.mxu1 %v3899_v39  ;;  %2782 = vmatpush.bf16.msra.mxu2 %v3483_v50  ;;  %v5295_v39 = vld [vmem:[%s8200_s1 + $0x4d4] sm:$0xf0]  ;;  %v4314_v62 = vld [vmem:[%s8200_s1 + $0x6c8] sm:$0xf]  ;;  %v4043_v2 = vor.u32 %v5291_v56, %v4042_v55 }
  0xdc   :  { %v5395_v50 = vld [vmem:[%s8200_s1 + $0x7f4] sm:$0xf0]  ;;  %v4442_v0 = vld [vmem:[%s8200_s1 + $0x7c8] sm:$0xf] }
  0xdd   :  { %2795 = vmatpush.bf16.msra.mxu3 %v3611_v52  ;;  %v4059_v52 = vor.u32 %v5295_v39, %v4058_v37  ;;  %v4459_v58 = vor.u32 %v5395_v50, %v4458_v49  ;;  %v5323_v61 = vld [vmem:[%s8200_s1 + $0x5b4] sm:$0xf0]  ;;  %v4154_v9 = vld [vmem:[%s8200_s1 + $0x588] sm:$0xf] }
  0xde   :  { %2807 = vmatpush.bf16.msrb.mxu0 %v3755_v53  ;;  %v4187_v53 = vor.u32 %v5327_v43, %v4186_v40  ;;  %v5359_v63 = vld [vmem:[%s8200_s1 + $0x6d4] sm:$0xf0]  ;;  %v4298_v13 = vld [vmem:[%s8200_s1 + $0x6a8] sm:$0xf] }
  0xdf   :  { %2820 = vmatpush.bf16.msrb.mxu1 %v3883_v57  ;;  %2783 = vmatpush.bf16.msra.mxu2 %v3467_v1  ;;  %v4170_v57 = vld [vmem:[%s8200_s1 + $0x5a8] sm:$0xf]  ;;  %v5391_v1 = vld [vmem:[%s8200_s1 + $0x7d4] sm:$0xf0] }
  0xe0   :  { %v4171_v3 = vor.u32 %v5323_v61, %v4170_v57  ;;  %v5287_v8 = vld [vmem:[%s8200_s1 + $0x494] sm:$0xf0]  ;;  %v4443_v10 = vor.u32 %v5391_v1, %v4442_v0  ;;  %v4426_v60 = vld [vmem:[%s8200_s1 + $0x7a8] sm:$0xf] }
  0xe1   :  { %2796 = vmatpush.bf16.msra.mxu3 %v3595_v5  ;;  %v4315_v5 = vor.u32 %v5359_v63, %v4314_v62  ;;  %v5355_v14 = vld [vmem:[%s8200_s1 + $0x6b4] sm:$0xf0]  ;;  %v4138_v25 = vld [vmem:[%s8200_s1 + $0x568] sm:$0xf] }
  0xe2   :  { %2808 = vmatpush.bf16.msrb.mxu0 %v3739_v7  ;;  %v4026_v7 = vld [vmem:[%s8200_s1 + $0x488] sm:$0xf]  ;;  %v5387_v17 = vld [vmem:[%s8200_s1 + $0x7b4] sm:$0xf0] }
  0xe3   :  { %2821 = vmatpush.bf16.msrb.mxu1 %v3867_v12  ;;  %2784 = vmatpush.bf16.msra.mxu2 %v3451_v18  ;;  %v5319_v12 = vld [vmem:[%s8200_s1 + $0x594] sm:$0xf0]  ;;  %v4027_v18 = vor.u32 %v5287_v8, %v4026_v7  ;;  %v4282_v32 = vld [vmem:[%s8200_s1 + $0x688] sm:$0xf] }
  0xe4   :  { %v4155_v19 = vor.u32 %v5319_v12, %v4154_v9  ;;  %v5351_v33 = vld [vmem:[%s8200_s1 + $0x694] sm:$0xf0]  ;;  %v4410_v34 = vld [vmem:[%s8200_s1 + $0x788] sm:$0xf] }
  0xe5   :  { %2797 = vmatpush.bf16.msra.mxu3 %v3579_v23  ;;  %v2552_v11 = vpop.f32.mrf.mxu0  ;;  %v2565_v16 = vpop.f32.mrf.mxu1  ;;  %v4299_v23 = vor.u32 %v5355_v14, %v4298_v13  ;;  %v4283_v43 = vor.u32 %v5351_v33, %v4282_v32  ;;  %v3994_v45 = vld [vmem:[%s8200_s1 + $0x448] sm:$0xf]  ;;  %v5279_v46 = vld [vmem:[%s8200_s1 + $0x454] sm:$0xf0] }
  0xe6   :  { %2809 = vmatpush.bf16.msrb.mxu0 %v3723_v24  ;;  %2785 = vmatmul.bf16.vlgmr.msra.gmra.mxu2 %v5895_v20  ;;  %v2553_v15 = vadd.f32 %v2552_v11, %v6986_v48  ;;  %v4010_v48 = vld [vmem:[%s8200_s1 + $0x468] sm:$0xf]  ;;  %v5283_v24 = vld [vmem:[%s8200_s1 + $0x474] sm:$0xf0]  ;;  %v3995_v62 = vor.u32 %v5279_v46, %v3994_v45 }
  0xe7   :  { %2822 = vmatpush.bf16.msrb.mxu1 %v3851_v27  ;;  %2829 = vmatpush.bf16.msrb.mxu2 %v4075_v28  ;;  %v4427_v27 = vor.u32 %v5387_v17, %v4426_v60  ;;  %v5315_v28 = vld [vmem:[%s8200_s1 + $0x574] sm:$0xf0]  ;;  %v4011_v37 = vor.u32 %v5283_v24, %v4010_v48  ;;  %v4394_v56 = vld [vmem:[%s8200_s1 + $0x768] sm:$0xf] }
  0xe8   :  { %2798 = vmatmul.bf16.vlgmr.msra.gmra.mxu3 %v5898_v21  ;;  %v2566_v22 = vadd.f32 %v2565_v16, %v2553_v15  ;;  %v4139_v39 = vor.u32 %v5315_v28, %v4138_v25  ;;  %v5347_v55 = vld [vmem:[%s8200_s1 + $0x674] sm:$0xf0]  ;;  %v3978_v1 = vld [vmem:[%s8200_s1 + $0x428] sm:$0xf] }
  0xe9   :  { %2842 = vmatpush.bf16.msrb.mxu3 %v4203_v36  ;;  %v5383_v36 = vld [vmem:[%s8200_s1 + $0x794] sm:$0xf0]  ;;  %v2578_v40 = vpop.f32.mrf.mxu2  ;;  %v4250_v8 = vld [vmem:[%s8200_s1 + $0x648] sm:$0xf] }
  0xea   :  { %2810 = vmatpush.bf16.msrb.mxu0 %v3707_v47  ;;  %v4122_v47 = vld [vmem:[%s8200_s1 + $0x548] sm:$0xf]  ;;  %v2579_v49 = vadd.f32 %v2578_v40, %v2566_v22  ;;  %v4411_v50 = vor.u32 %v5383_v36, %v4410_v34  ;;  %v5379_v57 = vld [vmem:[%s8200_s1 + $0x774] sm:$0xf0] }
  0xeb   :  { %2823 = vmatpush.bf16.msrb.mxu1 %v3835_v51  ;;  %2830 = vmatpush.bf16.msrb.mxu2 %v4059_v52  ;;  %v5307_v7 = vld [vmem:[%s8200_s1 + $0x534] sm:$0xf0]  ;;  %v3962_v13 = vld [vmem:[%s8200_s1 + $0x408] sm:$0xf] }
  0xec   :  { %v5343_v9 = vld [vmem:[%s8200_s1 + $0x654] sm:$0xf0]  ;;  %v4090_v60 = vld [vmem:[%s8200_s1 + $0x508] sm:$0xf] }
  0xed   :  { %2843 = vmatpush.bf16.msrb.mxu3 %v4187_v53  ;;  %2811 = vmatmul.bf16.vlgmr.msrb.gmra.mxu0 %v5863_v4  ;;  %v2554_v51 = vpop.f32.mrf.mxu0  ;;  %v2591_v52 = vpop.f32.mrf.mxu3  ;;  %v5311_v53 = vld [vmem:[%s8200_s1 + $0x554] sm:$0xf0]  ;;  %v4251_v15 = vor.u32 %v5343_v9, %v4250_v8  ;;  %v4234_v22 = vld [vmem:[%s8200_s1 + $0x628] sm:$0xf] }
  0xee   :  { %2855 = vmatpush.bf16.msra.mxu0 %v4331_v54  ;;  %2824 = vmatmul.bf16.vlgmr.msrb.gmra.mxu1 %v5868_v6  ;;  %v4266_v54 = vld [vmem:[%s8200_s1 + $0x668] sm:$0xf]  ;;  %v2592_v61 = vadd.f32 %v2591_v52, %v2579_v49  ;;  %v4123_v63 = vor.u32 %v5311_v53, %v4122_v47  ;;  %v5375_v11 = vld [vmem:[%s8200_s1 + $0x754] sm:$0xf0] }
  0xef   :  { %2868 = vmatpush.bf16.msra.mxu1 %v4459_v58  ;;  %2831 = vmatpush.bf16.msrb.mxu2 %v4043_v2  ;;  %v2567_v58 = vpop.f32.mrf.mxu1  ;;  %v4267_v0 = vor.u32 %v5347_v55, %v4266_v54  ;;  %v5275_v2 = vld [vmem:[%s8200_s1 + $0x434] sm:$0xf0]  ;;  %v4362_v48 = vld [vmem:[%s8200_s1 + $0x728] sm:$0xf] }
  0xf0   :  { %v3979_v12 = vor.u32 %v5275_v2, %v3978_v1  ;;  %v5271_v16 = vld [vmem:[%s8200_s1 + $0x414] sm:$0xf0]  ;;  %v4586_v28 = vld [vmem:[%s8200_s1 + $0x8e8] sm:$0xf] }
  0xf1   :  { %2844 = vmatpush.bf16.msrb.mxu3 %v4171_v3  ;;  %v4106_v3 = vld [vmem:[%s8200_s1 + $0x528] sm:$0xf]  ;;  %v5303_v17 = vld [vmem:[%s8200_s1 + $0x514] sm:$0xf0]  ;;  %v3963_v34 = vor.u32 %v5271_v16, %v3962_v13 }
  0xf2   :  { %2856 = vmatpush.bf16.msra.mxu0 %v4315_v5  ;;  %v4395_v5 = vor.u32 %v5379_v57, %v4394_v56  ;;  %v4107_v14 = vor.u32 %v5307_v7, %v4106_v3  ;;  %v5427_v32 = vld [vmem:[%s8200_s1 + $0x8f4] sm:$0xf0]  ;;  %v4714_v36 = vld [vmem:[%s8200_s1 + $0x9e8] sm:$0xf] }
  0xf3   :  { %2869 = vmatpush.bf16.msra.mxu1 %v4443_v10  ;;  %2832 = vmatpush.bf16.msrb.mxu2 %v4027_v18  ;;  %v4378_v10 = vld [vmem:[%s8200_s1 + $0x748] sm:$0xf]  ;;  %v2580_v18 = vpop.f32.mrf.mxu2  ;;  %v4587_v46 = vor.u32 %v5427_v32, %v4586_v28  ;;  %v5335_v47 = vld [vmem:[%s8200_s1 + $0x614] sm:$0xf0] }
  0xf4   :  { %v4346_v49 = vld [vmem:[%s8200_s1 + $0x708] sm:$0xf]  ;;  %v5423_v53 = vld [vmem:[%s8200_s1 + $0x8d4] sm:$0xf0] }
  0xf5   :  { %2845 = vmatpush.bf16.msrb.mxu3 %v4155_v19  ;;  %v4379_v19 = vor.u32 %v5375_v11, %v4378_v10  ;;  %v2593_v24 = vpop.f32.mrf.mxu3  ;;  %v2604_v25 = vpop.f32.mrf.mxu0  ;;  %v4570_v52 = vld [vmem:[%s8200_s1 + $0x8c8] sm:$0xf]  ;;  %v5455_v55 = vld [vmem:[%s8200_s1 + $0x9d4] sm:$0xf0] }
  0xf6   :  { %2857 = vmatpush.bf16.msra.mxu0 %v4299_v23  ;;  %v5339_v23 = vld [vmem:[%s8200_s1 + $0x634] sm:$0xf0]  ;;  %v7241_v33 = vadd.f32 %v2604_v25, %v2592_v61  ;;  %v4698_v54 = vld [vmem:[%s8200_s1 + $0x9c8] sm:$0xf] }
  0xf7   :  { %2870 = vmatpush.bf16.msra.mxu1 %v4427_v27  ;;  %2833 = vmatpush.bf16.msrb.mxu2 %v4011_v37  ;;  %v5371_v27 = vld [vmem:[%s8200_s1 + $0x734] sm:$0xf0]  ;;  %v4235_v40 = vor.u32 %v5339_v23, %v4234_v22  ;;  %v4842_v56 = vld [vmem:[%s8200_s1 + $0xae8] sm:$0xf]  ;;  %v4699_v1 = vor.u32 %v5455_v55, %v4698_v54  ;;  %v423_v22 = vperm.slane %v6736_v59, 1 }
  0xf8   :  { %v5459_v37 = vld [vmem:[%s8200_s1 + $0x9f4] sm:$0xf0]  ;;  %v4363_v45 = vor.u32 %v5371_v27, %v4362_v48  ;;  %v4970_v61 = vld [vmem:[%s8200_s1 + $0xbe8] sm:$0xf] }
  0xf9   :  { %2846 = vmatpush.bf16.msrb.mxu3 %v4139_v39  ;;  %v4091_v39 = vor.u32 %v5303_v17, %v4090_v60  ;;  %v4715_v51 = vor.u32 %v5459_v37, %v4714_v36  ;;  %v5491_v57 = vld [vmem:[%s8200_s1 + $0xaf4] sm:$0xf0]  ;;  %v4554_v3 = vld [vmem:[%s8200_s1 + $0x8a8] sm:$0xf] }
  0xfa   :  { %2858 = vmatpush.bf16.msra.mxu0 %v4283_v43  ;;  %v4218_v43 = vld [vmem:[%s8200_s1 + $0x608] sm:$0xf]  ;;  %v4843_v2 = vor.u32 %v5491_v57, %v4842_v56  ;;  %v5451_v10 = vld [vmem:[%s8200_s1 + $0x9b4] sm:$0xf0] }
  0xfb   :  { %2871 = vmatpush.bf16.msra.mxu1 %v4411_v50  ;;  %2834 = vmatpush.bf16.msrb.mxu2 %v3995_v62  ;;  %v5367_v50 = vld [vmem:[%s8200_s1 + $0x714] sm:$0xf0]  ;;  %v4219_v58 = vor.u32 %v5335_v47, %v4218_v43  ;;  %v4682_v7 = vld [vmem:[%s8200_s1 + $0x9a8] sm:$0xf] }
  0xfc   :  { %v5523_v62 = vld [vmem:[%s8200_s1 + $0xbf4] sm:$0xf0]  ;;  %v4826_v11 = vld [vmem:[%s8200_s1 + $0xac8] sm:$0xf]  ;;  %v4683_v60 = vor.u32 %v5451_v10, %v4682_v7 }
  0xfd   :  { %2847 = vmatpush.bf16.msrb.mxu3 %v4123_v63  ;;  %v4347_v63 = vor.u32 %v5367_v50, %v4346_v49  ;;  %v2606_v8 = vpop.f32.mrf.mxu0  ;;  %v4971_v9 = vor.u32 %v5523_v62, %v4970_v61  ;;  %v4954_v13 = vld [vmem:[%s8200_s1 + $0xbc8] sm:$0xf]  ;;  %v5415_v18 = vld [vmem:[%s8200_s1 + $0x894] sm:$0xf0] }
  0xfe   :  { %2859 = vmatpush.bf16.msra.mxu0 %v4267_v0  ;;  %v4571_v0 = vor.u32 %v5423_v53, %v4570_v52  ;;  %v4538_v16 = vld [vmem:[%s8200_s1 + $0x888] sm:$0xf]  ;;  %v5447_v48 = vld [vmem:[%s8200_s1 + $0x994] sm:$0xf0] }
  0xff   :  { %2872 = vmatpush.bf16.msra.mxu1 %v4395_v5  ;;  %2835 = vmatpush.bf16.msrb.mxu2 %v3979_v12  ;;  %v5419_v5 = vld [vmem:[%s8200_s1 + $0x8b4] sm:$0xf0]  ;;  %v4810_v24 = vld [vmem:[%s8200_s1 + $0xaa8] sm:$0xf]  ;;  %v4539_v32 = vor.u32 %v5415_v18, %v4538_v16 }
 0x100   :  { %v5487_v12 = vld [vmem:[%s8200_s1 + $0xad4] sm:$0xf0]  ;;  %v4938_v59 = vld [vmem:[%s8200_s1 + $0xba8] sm:$0xf] }
 0x101   :  { %2848 = vmatpush.bf16.msrb.mxu3 %v4107_v14  ;;  %v5519_v14 = vld [vmem:[%s8200_s1 + $0xbd4] sm:$0xf0]  ;;  %v4827_v17 = vor.u32 %v5487_v12, %v4826_v11  ;;  %v4522_v37 = vld [vmem:[%s8200_s1 + $0x868] sm:$0xf] }
 0x102   :  { %2860 = vmatpush.bf16.msra.mxu0 %v4251_v15  ;;  %v4555_v15 = vor.u32 %v5419_v5, %v4554_v3  ;;  %v4955_v23 = vor.u32 %v5519_v14, %v4954_v13  ;;  %v5483_v25 = vld [vmem:[%s8200_s1 + $0xab4] sm:$0xf0]  ;;  %v4794_v47 = vld [vmem:[%s8200_s1 + $0xa88] sm:$0xf] }
 0x103   :  { %2873 = vmatpush.bf16.msra.mxu1 %v4379_v19  ;;  %2836 = vmatpush.bf16.msrb.mxu2 %v3963_v34  ;;  %v4666_v19 = vld [vmem:[%s8200_s1 + $0x988] sm:$0xf]  ;;  %v5515_v27 = vld [vmem:[%s8200_s1 + $0xbb4] sm:$0xf0]  ;;  %v4811_v36 = vor.u32 %v5483_v25, %v4810_v24 }
 0x104   :  { %v4667_v34 = vor.u32 %v5447_v48, %v4666_v19  ;;  %v5479_v49 = vld [vmem:[%s8200_s1 + $0xa94] sm:$0xf0]  ;;  %v4922_v50 = vld [vmem:[%s8200_s1 + $0xb88] sm:$0xf] }
 0x105   :  { %2849 = vmatpush.bf16.msrb.mxu3 %v4091_v39  ;;  %v2617_v28 = vpop.f32.mrf.mxu1  ;;  %v5411_v39 = vld [vmem:[%s8200_s1 + $0x874] sm:$0xf0]  ;;  %v4795_v56 = vor.u32 %v5479_v49, %v4794_v47  ;;  %v4506_v57 = vld [vmem:[%s8200_s1 + $0x848] sm:$0xf]  ;;  %v5169_v47 = vld [vmem:[%s8200_s1 + $0xec] sm:$0xf] }
 0x106   :  { %2861 = vmatpush.bf16.msra.mxu0 %v4235_v40  ;;  %2837 = vmatmul.bf16.vlgmr.msrb.gmra.mxu2 %v6054_v41  ;;  %v4650_v40 = vld [vmem:[%s8200_s1 + $0x968] sm:$0xf]  ;;  %v2618_v43 = vadd.f32 %v2617_v28, %v423_v22  ;;  %v4523_v53 = vor.u32 %v5411_v39, %v4522_v37  ;;  %v5475_v3 = vld [vmem:[%s8200_s1 + $0xa74] sm:$0xf0]  ;;  %v3564_v49 = vld [vmem:[%s8200_s1 + $0xf8] sm:$0xf0] }
 0x107   :  { %2874 = vmatpush.bf16.msra.mxu1 %v4363_v45  ;;  %2881 = vmatpush.bf16.msra.mxu2 %v4587_v46  ;;  %v4939_v45 = vor.u32 %v5515_v27, %v4938_v59  ;;  %v5443_v46 = vld [vmem:[%s8200_s1 + $0x974] sm:$0xf0]  ;;  %v4634_v61 = vld [vmem:[%s8200_s1 + $0x948] sm:$0xf] }
 0x108   :  { %2850 = vmatmul.bf16.vlgmr.msrb.gmra.mxu3 %v6058_v44  ;;  %v4651_v55 = vor.u32 %v5443_v46, %v4650_v40  ;;  %v4906_v5 = vld [vmem:[%s8200_s1 + $0xb68] sm:$0xf]  ;;  %v5507_v7 = vld [vmem:[%s8200_s1 + $0xb74] sm:$0xf0] }
 0x109   :  { %2894 = vmatpush.bf16.msra.mxu3 %v4715_v51  ;;  %v5511_v51 = vld [vmem:[%s8200_s1 + $0xb94] sm:$0xf0]  ;;  %v2630_v54 = vpop.f32.mrf.mxu2  ;;  %v4490_v13 = vld [vmem:[%s8200_s1 + $0x828] sm:$0xf] }
 0x10a   :  { %2862 = vmatpush.bf16.msra.mxu0 %v4219_v58  ;;  %v2656_v52 = vpop.f32.mrf.mxu0  ;;  %v5407_v58 = vld [vmem:[%s8200_s1 + $0x854] sm:$0xf0]  ;;  %v2631_v62 = vadd.f32 %v2630_v54, %v2618_v43  ;;  %v4762_v18 = vld [vmem:[%s8200_s1 + $0xa48] sm:$0xf] }
 0x10b   :  { %2875 = vmatpush.bf16.msra.mxu1 %v4347_v63  ;;  %2882 = vmatpush.bf16.msra.mxu2 %v4571_v0  ;;  %v2643_v63 = vpop.f32.mrf.mxu3  ;;  %v4923_v0 = vor.u32 %v5511_v51, %v4922_v50  ;;  %v4507_v10 = vor.u32 %v5407_v58, %v4506_v57  ;;  %v5403_v14 = vld [vmem:[%s8200_s1 + $0x834] sm:$0xf0]  ;;  %v4890_v22 = vld [vmem:[%s8200_s1 + $0xb48] sm:$0xf]  ;;  %v3567_v58 = vor.u32 %v5169_v47, %v3564_v49  ;;  %v5257_v47 = vld [vmem:[%s8200_s1 + $0x3ac] sm:$0xf] }
 0x10c   :  { %v2644_v8 = vadd.f32 %v2643_v63, %v2631_v62  ;;  %v5471_v19 = vld [vmem:[%s8200_s1 + $0xa54] sm:$0xf0]  ;;  %v4491_v24 = vor.u32 %v5403_v14, %v4490_v13  ;;  %v4474_v25 = vld [vmem:[%s8200_s1 + $0x808] sm:$0xf]  ;;  %v5165_v63 = vld [vmem:[%s8200_s1 + $0xcc] sm:$0xf] }
 0x10d   :  { %2895 = vmatpush.bf16.msra.mxu3 %v4699_v1  ;;  %2863 = vmatmul.bf16.vlgmr.msra.gmra.mxu0 %v6046_v38  ;;  %v5439_v1 = vld [vmem:[%s8200_s1 + $0x954] sm:$0xf0]  ;;  %v4763_v28 = vor.u32 %v5471_v19, %v4762_v18  ;;  %v4746_v40 = vld [vmem:[%s8200_s1 + $0xa28] sm:$0xf]  ;;  %v3532_v18 = vld [vmem:[%s8200_s1 + $0xb8] sm:$0xf0] }
 0x10e   :  { %2907 = vmatpush.bf16.msrb.mxu0 %v4843_v2  ;;  %2876 = vmatmul.bf16.vlgmr.msra.gmra.mxu1 %v6056_v42  ;;  %v4778_v2 = vld [vmem:[%s8200_s1 + $0xa68] sm:$0xf]  ;;  %v4635_v11 = vor.u32 %v5439_v1, %v4634_v61  ;;  %v7395_v16 = vadd.f32 %v2656_v52, %v2644_v8  ;;  %v5467_v43 = vld [vmem:[%s8200_s1 + $0xa34] sm:$0xf0]  ;;  %v3548_v1 = vld [vmem:[%s8200_s1 + $0xd8] sm:$0xf0] }
 0x10f   :  { %2920 = vmatpush.bf16.msrb.mxu1 %v4971_v9  ;;  %2883 = vmatpush.bf16.msra.mxu2 %v4555_v15  ;;  %v2619_v9 = vpop.f32.mrf.mxu1  ;;  %v4779_v12 = vor.u32 %v5475_v3, %v4778_v2  ;;  %v4618_v15 = vld [vmem:[%s8200_s1 + $0x928] sm:$0xf]  ;;  %v5499_v46 = vld [vmem:[%s8200_s1 + $0xb34] sm:$0xf0]  ;;  %v4747_v54 = vor.u32 %v5467_v43, %v4746_v40  ;;  %v5233_v8 = vld [vmem:[%s8200_s1 + $0x2ec] sm:$0xf]  ;;  %v3551_v14 = vor.u32 %v5165_v63, %v3548_v1 }
 0x110   :  { %v5002_v51 = vld [vmem:[%s8200_s1 + $0xc28] sm:$0xf]  ;;  %v5531_v52 = vld [vmem:[%s8200_s1 + $0xc34] sm:$0xf0]  ;;  %v5193_v40 = vld [vmem:[%s8200_s1 + $0x1ac] sm:$0xf] }
 0x111   :  { %2896 = vmatpush.bf16.msra.mxu3 %v4683_v60  ;;  %v4907_v60 = vor.u32 %v5507_v7, %v4906_v5  ;;  %v2632_v59 = vpop.f32.mrf.mxu2  ;;  %v4858_v61 = vld [vmem:[%s8200_s1 + $0xb08] sm:$0xf]  ;;  %v5495_v62 = vld [vmem:[%s8200_s1 + $0xb14] sm:$0xf0]  ;;  %v5201_v5 = vld [vmem:[%s8200_s1 + $0x1ec] sm:$0xf] }
 0x112   :  { %2908 = vmatpush.bf16.msrb.mxu0 %v4827_v17  ;;  %v5435_v17 = vld [vmem:[%s8200_s1 + $0x934] sm:$0xf0]  ;;  %v2658_v48 = vpop.f32.mrf.mxu0  ;;  %v4986_v2 = vld [vmem:[%s8200_s1 + $0xc08] sm:$0xf]  ;;  %v3692_v7 = vld [vmem:[%s8200_s1 + $0x1f8] sm:$0xf0]  ;;  %v4859_v13 = vor.u32 %v5495_v62, %v4858_v61 }
 0x113   :  { %2921 = vmatpush.bf16.msrb.mxu1 %v4955_v23  ;;  %2884 = vmatpush.bf16.msra.mxu2 %v4539_v32  ;;  %v5503_v23 = vld [vmem:[%s8200_s1 + $0xb54] sm:$0xf0]  ;;  %v4619_v27 = vor.u32 %v5435_v17, %v4618_v15  ;;  %v2645_v37 = vpop.f32.mrf.mxu3  ;;  %v5161_v17 = vld [vmem:[%s8200_s1 + $0xac] sm:$0xf]  ;;  %v3676_v48 = vld [vmem:[%s8200_s1 + $0x1d8] sm:$0xf0] }
 0x114   :  { %v5399_v32 = vld [vmem:[%s8200_s1 + $0x814] sm:$0xf0]  ;;  %v4891_v39 = vor.u32 %v5503_v23, %v4890_v22  ;;  %v5197_v23 = vld [vmem:[%s8200_s1 + $0x1cc] sm:$0xf]  ;;  %v3660_v43 = vld [vmem:[%s8200_s1 + $0x1b8] sm:$0xf0] }
 0x115   :  { %2897 = vmatpush.bf16.msra.mxu3 %v4667_v34  ;;  %v4602_v34 = vld [vmem:[%s8200_s1 + $0x908] sm:$0xf]  ;;  %v4475_v50 = vor.u32 %v5399_v32, %v4474_v25  ;;  %v5527_v3 = vld [vmem:[%s8200_s1 + $0xc14] sm:$0xf0]  ;;  %v3804_v25 = vld [vmem:[%s8200_s1 + $0x2d8] sm:$0xf0]  ;;  %v3679_v32 = vor.u32 %v5197_v23, %v3676_v48 }
 0x116   :  { %2909 = vmatpush.bf16.msrb.mxu0 %v4811_v36  ;;  %v5431_v36 = vld [vmem:[%s8200_s1 + $0x914] sm:$0xf0]  ;;  %v4987_v15 = vor.u32 %v5527_v3, %v4986_v2  ;;  %v5261_v59 = vld [vmem:[%s8200_s1 + $0x3cc] sm:$0xf]  ;;  %v3916_v49 = vld [vmem:[%s8200_s1 + $0x3b8] sm:$0xf0] }
 0x117   :  { %2922 = vmatpush.bf16.msrb.mxu1 %v4939_v45  ;;  %2885 = vmatpush.bf16.msra.mxu2 %v4523_v53  ;;  %v4874_v45 = vld [vmem:[%s8200_s1 + $0xb28] sm:$0xf]  ;;  %v4603_v53 = vor.u32 %v5431_v36, %v4602_v34  ;;  %v5157_v34 = vld [vmem:[%s8200_s1 + $0x8c] sm:$0xf]  ;;  %v3516_v36 = vld [vmem:[%s8200_s1 + $0x98] sm:$0xf0] }
 0x118   :  { %v4875_v57 = vor.u32 %v5499_v46, %v4874_v45  ;;  %v5225_v45 = vld [vmem:[%s8200_s1 + $0x2ac] sm:$0xf]  ;;  %v3788_v46 = vld [vmem:[%s8200_s1 + $0x2b8] sm:$0xf0] }
 0x119   :  { %2898 = vmatpush.bf16.msra.mxu3 %v4651_v55  ;;  %v4730_v55 = vld [vmem:[%s8200_s1 + $0xa08] sm:$0xf]  ;;  %v5221_v61 = vld [vmem:[%s8200_s1 + $0x28c] sm:$0xf]  ;;  %v3772_v62 = vld [vmem:[%s8200_s1 + $0x298] sm:$0xf0] }
 0x11a   :  { %2910 = vmatpush.bf16.msrb.mxu0 %v4795_v56  ;;  %v5463_v56 = vld [vmem:[%s8200_s1 + $0xa14] sm:$0xf0]  ;;  %v5253_v1 = vld [vmem:[%s8200_s1 + $0x38c] sm:$0xf]  ;;  %v3900_v2 = vld [vmem:[%s8200_s1 + $0x398] sm:$0xf0] }
 0x11b   :  { %2923 = vmatpush.bf16.msrb.mxu1 %v4923_v0  ;;  %2886 = vmatpush.bf16.msra.mxu2 %v4507_v10  ;;  %v5003_v0 = vor.u32 %v5531_v52, %v5002_v51  ;;  %v4731_v9 = vor.u32 %v5463_v56, %v4730_v55  ;;  %v3820_v10 = vld [vmem:[%s8200_s1 + $0x2f8] sm:$0xf0]  ;;  %v3519_v51 = vor.u32 %v5157_v34, %v3516_v36  ;;  %v5213_v36 = vld [vmem:[%s8200_s1 + $0x24c] sm:$0xf] }
 0x11c   :  { %v3823_v19 = vor.u32 %v5233_v8, %v3820_v10  ;;  %v3500_v55 = vld [vmem:[%s8200_s1 + $0x78] sm:$0xf0]  ;;  %v3791_v56 = vor.u32 %v5225_v45, %v3788_v46 }
 0x11d   :  { %2899 = vmatpush.bf16.msra.mxu3 %v4635_v11  ;;  %v5265_v11 = vld [vmem:[%s8200_s1 + $0x3ec] sm:$0xf]  ;;  %v3484_v8 = vld [vmem:[%s8200_s1 + $0x58] sm:$0xf0] }
 0x11e   :  { %2911 = vmatpush.bf16.msrb.mxu0 %v4779_v12  ;;  %v3948_v12 = vld [vmem:[%s8200_s1 + $0x3f8] sm:$0xf0] }
 0x11f   :  { %2924 = vmatpush.bf16.msrb.mxu1 %v4907_v60  ;;  %2887 = vmatpush.bf16.msra.mxu2 %v4491_v24  ;;  %v3695_v60 = vor.u32 %v5201_v5, %v3692_v7  ;;  %v3951_v22 = vor.u32 %v5265_v11, %v3948_v12  ;;  %v5229_v24 = vld [vmem:[%s8200_s1 + $0x2cc] sm:$0xf]  ;;  %v3775_v11 = vor.u32 %v5221_v61, %v3772_v62  ;;  %v3884_v23 = vld [vmem:[%s8200_s1 + $0x378] sm:$0xf0] }
 0x120   :  { %v3807_v37 = vor.u32 %v5229_v24, %v3804_v25  ;;  %v5149_v7 = vld [vmem:[%s8200_s1 + $0x4c] sm:$0xf]  ;;  %v3468_v25 = vld [vmem:[%s8200_s1 + $0x38] sm:$0xf0] }
 0x121   :  { %2900 = vmatpush.bf16.msra.mxu3 %v4619_v27  ;;  %v3932_v27 = vld [vmem:[%s8200_s1 + $0x3d8] sm:$0xf0]  ;;  %v5185_v12 = vld [vmem:[%s8200_s1 + $0x16c] sm:$0xf] }
 0x122   :  { %2912 = vmatpush.bf16.msrb.mxu0 %v4763_v28  ;;  %v3535_v28 = vor.u32 %v5161_v17, %v3532_v18  ;;  %v5145_v24 = vld [vmem:[%s8200_s1 + $0x2c] sm:$0xf]  ;;  %v3868_v45 = vld [vmem:[%s8200_s1 + $0x358] sm:$0xf0] }
 0x123   :  { %2925 = vmatpush.bf16.msrb.mxu1 %v4891_v39  ;;  %2888 = vmatpush.bf16.msra.mxu2 %v4475_v50  ;;  %v3935_v39 = vor.u32 %v5261_v59, %v3932_v27  ;;  %v5241_v62 = vld [vmem:[%s8200_s1 + $0x32c] sm:$0xf] }
 0x125   :  { %2901 = vmatpush.bf16.msra.mxu3 %v4603_v53  ;;  %v2669_v50 = vpop.f32.mrf.mxu1  ;;  %v3663_v53 = vor.u32 %v5193_v40, %v3660_v43  ;;  %v3471_v40 = vor.u32 %v5145_v24, %v3468_v25  ;;  %v5245_v43 = vld [vmem:[%s8200_s1 + $0x34c] sm:$0xf] }
 0x126   :  { %2913 = vmatpush.bf16.msrb.mxu0 %v4747_v54  ;;  %2889 = vmatmul.bf16.vlgmr.msra.gmra.mxu2 %v6250_v26  ;;  %v2670_v52 = vadd.f32 %v2669_v50, %v7395_v16  ;;  %v5153_v54 = vld [vmem:[%s8200_s1 + $0x6c] sm:$0xf]  ;;  %v3644_v16 = vld [vmem:[%s8200_s1 + $0x198] sm:$0xf0] }
 0x127   :  { %2926 = vmatpush.bf16.msrb.mxu1 %v4875_v57  ;;  %2939 = vmatpush.bf16.msrb.mxu2 %v5003_v0  ;;  %v3919_v57 = vor.u32 %v5257_v47, %v3916_v49  ;;  %v3503_v0 = vor.u32 %v5153_v54, %v3500_v55  ;;  %v5141_v49 = vld [vmem:[%s8200_s1 + $0xc] sm:$0xf]  ;;  %v3452_v50 = vld [vmem:[%s8200_s1 + $0x18] sm:$0xf0] }
 0x128   :  { %2902 = vmatmul.bf16.vlgmr.msra.gmra.mxu3 %v6263_v31  ;;  %v3596_v54 = vld [vmem:[%s8200_s1 + $0x138] sm:$0xf0]  ;;  %v5297_v55 = vld [vmem:[%s8200_s1 + $0x4ec] sm:$0xf]  ;;  %v3455_v61 = vor.u32 %v5141_v49, %v3452_v50 }
 0x129   :  { %2946 = vmatpush.bf16.msrb.mxu3 %v3567_v58  ;;  %v5189_v58 = vld [vmem:[%s8200_s1 + $0x18c] sm:$0xf]  ;;  %v2682_v3 = vpop.f32.mrf.mxu2  ;;  %v4028_v49 = vld [vmem:[%s8200_s1 + $0x498] sm:$0xf0] }
 0x12a   :  { %2914 = vmatpush.bf16.msrb.mxu0 %v4731_v9  ;;  %v2708_v63 = vpop.f32.mrf.mxu0  ;;  %v3647_v5 = vor.u32 %v5189_v58, %v3644_v16  ;;  %v2683_v9 = vadd.f32 %v2682_v3, %v2670_v52  ;;  %v5209_v58 = vld [vmem:[%s8200_s1 + $0x22c] sm:$0xf]  ;;  %v3724_v16 = vld [vmem:[%s8200_s1 + $0x238] sm:$0xf0] }
 0x12b   :  { %2927 = vmatpush.bf16.msrb.mxu1 %v4859_v13  ;;  %2940 = vmatpush.bf16.msrb.mxu2 %v4987_v15  ;;  %v2695_v10 = vpop.f32.mrf.mxu3  ;;  %v3628_v13 = vld [vmem:[%s8200_s1 + $0x178] sm:$0xf0]  ;;  %v5217_v15 = vld [vmem:[%s8200_s1 + $0x26c] sm:$0xf] }
 0x12c   :  { %v2696_v17 = vadd.f32 %v2695_v10, %v2683_v9  ;;  %v3631_v48 = vor.u32 %v5185_v12, %v3628_v13  ;;  %v3580_v3 = vld [vmem:[%s8200_s1 + $0x118] sm:$0xf0]  ;;  %v5293_v9 = vld [vmem:[%s8200_s1 + $0x4cc] sm:$0xf] }
 0x12d   :  { %2947 = vmatpush.bf16.msrb.mxu3 %v3551_v14  ;;  %2915 = vmatmul.bf16.vlgmr.msrb.gmra.mxu0 %v6261_v30  ;;  %v3903_v14 = vor.u32 %v5253_v1, %v3900_v2  ;;  %v2671_v18 = vpop.f32.mrf.mxu1  ;;  %v5173_v2 = vld [vmem:[%s8200_s1 + $0x10c] sm:$0xf]  ;;  %v4060_v10 = vld [vmem:[%s8200_s1 + $0x4d8] sm:$0xf0] }
 0x12e   :  { %2959 = vmatpush.bf16.msra.mxu0 %v3695_v60  ;;  %2928 = vmatmul.bf16.vlgmr.msrb.gmra.mxu1 %v6274_v35  ;;  %v3756_v60 = vld [vmem:[%s8200_s1 + $0x278] sm:$0xf0]  ;;  %v7597_v59 = vadd.f32 %v2708_v63, %v2696_v17  ;;  %v5237_v12 = vld [vmem:[%s8200_s1 + $0x30c] sm:$0xf]  ;;  %v3583_v18 = vor.u32 %v5173_v2, %v3580_v3 }
 0x12f   :  { %2972 = vmatpush.bf16.msra.mxu1 %v3823_v19  ;;  %2985 = vmatpush.bf16.msra.mxu2 %v3951_v22  ;;  %v3487_v19 = vor.u32 %v5149_v7, %v3484_v8  ;;  %v5249_v22 = vld [vmem:[%s8200_s1 + $0x36c] sm:$0xf]  ;;  %v3759_v27 = vor.u32 %v5217_v15, %v3756_v60  ;;  %v3852_v63 = vld [vmem:[%s8200_s1 + $0x338] sm:$0xf0]  ;;  %v3727_v7 = vor.u32 %v5209_v58, %v3724_v16 }
 0x130   :  { %v3887_v34 = vor.u32 %v5249_v22, %v3884_v23  ;;  %v3708_v8 = vld [vmem:[%s8200_s1 + $0x218] sm:$0xf0]  ;;  %v5329_v13 = vld [vmem:[%s8200_s1 + $0x5ec] sm:$0xf] }
 0x131   :  { %2948 = vmatpush.bf16.msrb.mxu3 %v3535_v28  ;;  %v5181_v28 = vld [vmem:[%s8200_s1 + $0x14c] sm:$0xf]  ;;  %v2684_v46 = vpop.f32.mrf.mxu2  ;;  %v3836_v15 = vld [vmem:[%s8200_s1 + $0x318] sm:$0xf0] }
 0x132   :  { %2960 = vmatpush.bf16.msra.mxu0 %v3679_v32  ;;  %v3612_v32 = vld [vmem:[%s8200_s1 + $0x158] sm:$0xf0]  ;;  %v5361_v60 = vld [vmem:[%s8200_s1 + $0x6ec] sm:$0xf] }
 0x133   :  { %2973 = vmatpush.bf16.msra.mxu1 %v3807_v37  ;;  %2986 = vmatpush.bf16.msra.mxu2 %v3935_v39  ;;  %v3740_v37 = vld [vmem:[%s8200_s1 + $0x258] sm:$0xf0]  ;;  %v2710_v39 = vpop.f32.mrf.mxu0  ;;  %v3615_v47 = vor.u32 %v5181_v28, %v3612_v32  ;;  %v2697_v52 = vpop.f32.mrf.mxu3  ;;  %v5393_v22 = vld [vmem:[%s8200_s1 + $0x7ec] sm:$0xf]  ;;  %v3839_v28 = vor.u32 %v5237_v12, %v3836_v15 }
 0x134   :  { %v4332_v17 = vld [vmem:[%s8200_s1 + $0x6f8] sm:$0xf0]  ;;  %v5289_v25 = vld [vmem:[%s8200_s1 + $0x4ac] sm:$0xf] }
 0x135   :  { %2949 = vmatpush.bf16.msrb.mxu3 %v3519_v51  ;;  %v5177_v51 = vld [vmem:[%s8200_s1 + $0x12c] sm:$0xf]  ;;  %v4460_v23 = vld [vmem:[%s8200_s1 + $0x7f8] sm:$0xf0]  ;;  %v4335_v32 = vor.u32 %v5361_v60, %v4332_v17 }
 0x136   :  { %2961 = vmatpush.bf16.msra.mxu0 %v3663_v53  ;;  %5010 = vmatmul.msk.bf16.vlgmr.msrb.gmra.mxu2 %vm2435_vm0, %v6370_v29  ;;  %v3743_v53 = vor.u32 %v5213_v36, %v3740_v37  ;;  %v4188_v36 = vld [vmem:[%s8200_s1 + $0x5d8] sm:$0xf0]  ;;  %v4463_v37 = vor.u32 %v5393_v22, %v4460_v23  ;;  %v5357_v39 = vld [vmem:[%s8200_s1 + $0x6cc] sm:$0xf] }
 0x137   :  { %2974 = vmatpush.bf16.msra.mxu1 %v3791_v56  ;;  %2987 = vmatpush.bf16.msra.mxu2 %v3919_v57  ;;  %v4076_v56 = vld [vmem:[%s8200_s1 + $0x4f8] sm:$0xf0]  ;;  %v3871_v57 = vor.u32 %v5245_v43, %v3868_v45  ;;  %v5389_v45 = vld [vmem:[%s8200_s1 + $0x7cc] sm:$0xf] }
 0x138   :  { %v4079_v1 = vor.u32 %v5297_v55, %v4076_v56  ;;  %v4172_v52 = vld [vmem:[%s8200_s1 + $0x5b8] sm:$0xf0]  ;;  %v5353_v55 = vld [vmem:[%s8200_s1 + $0x6ac] sm:$0xf] }
 0x139   :  { %2950 = vmatpush.bf16.msrb.mxu3 %v3503_v0  ;;  %v3599_v0 = vor.u32 %v5177_v51, %v3596_v54  ;;  %v5321_v51 = vld [vmem:[%s8200_s1 + $0x5ac] sm:$0xf]  ;;  %v4300_v56 = vld [vmem:[%s8200_s1 + $0x6b8] sm:$0xf0] }
 0x13a   :  { %2962 = vmatpush.bf16.msra.mxu0 %v3647_v5  ;;  %v5205_v5 = vld [vmem:[%s8200_s1 + $0x20c] sm:$0xf]  ;;  %v4140_v60 = vld [vmem:[%s8200_s1 + $0x578] sm:$0xf0] }
 0x13b   :  { %2975 = vmatpush.bf16.msra.mxu1 %v3775_v11  ;;  %2988 = vmatpush.bf16.msra.mxu2 %v3903_v14  ;;  %v3855_v11 = vor.u32 %v5241_v62, %v3852_v63  ;;  %v4204_v14 = vld [vmem:[%s8200_s1 + $0x5f8] sm:$0xf0]  ;;  %v5385_v16 = vld [vmem:[%s8200_s1 + $0x7ac] sm:$0xf]  ;;  %v4175_v62 = vor.u32 %v5321_v51, %v4172_v52  ;;  %v4303_v63 = vor.u32 %v5353_v55, %v4300_v56 }
 0x13c   :  { %v4207_v24 = vor.u32 %v5329_v13, %v4204_v14  ;;  %v5349_v2 = vld [vmem:[%s8200_s1 + $0x68c] sm:$0xf]  ;;  %v4268_v23 = vld [vmem:[%s8200_s1 + $0x678] sm:$0xf0] }
 0x13d   :  { %2951 = vmatpush.bf16.msrb.mxu3 %v3487_v19  ;;  %v4063_v19 = vor.u32 %v5293_v9, %v4060_v10  ;;  %v5277_v10 = vld [vmem:[%s8200_s1 + $0x44c] sm:$0xf]  ;;  %v4108_v56 = vld [vmem:[%s8200_s1 + $0x538] sm:$0xf0] }
 0x13e   :  { %2963 = vmatpush.bf16.msra.mxu0 %v3631_v48  ;;  %v3711_v48 = vor.u32 %v5205_v5, %v3708_v8  ;;  %v5381_v5 = vld [vmem:[%s8200_s1 + $0x78c] sm:$0xf] }
 0x13f   :  { %2976 = vmatpush.bf16.msra.mxu1 %v3759_v27  ;;  %2989 = vmatpush.bf16.msra.mxu2 %v3887_v34  ;;  %v4044_v27 = vld [vmem:[%s8200_s1 + $0x4b8] sm:$0xf0]  ;;  %v5325_v34 = vld [vmem:[%s8200_s1 + $0x5cc] sm:$0xf] }
 0x140   :  { %v4047_v43 = vor.u32 %v5289_v25, %v4044_v27  ;;  %v4191_v46 = vor.u32 %v5325_v34, %v4188_v36  ;;  %v5313_v15 = vld [vmem:[%s8200_s1 + $0x56c] sm:$0xf]  ;;  %v4396_v25 = vld [vmem:[%s8200_s1 + $0x778] sm:$0xf0] }
 0x141   :  { %2952 = vmatpush.bf16.msrb.mxu3 %v3471_v40  ;;  %v4316_v40 = vld [vmem:[%s8200_s1 + $0x6d8] sm:$0xf0]  ;;  %v5345_v22 = vld [vmem:[%s8200_s1 + $0x66c] sm:$0xf] }
 0x142   :  { %2964 = vmatpush.bf16.msra.mxu0 %v3615_v47  ;;  %v5285_v47 = vld [vmem:[%s8200_s1 + $0x48c] sm:$0xf]  ;;  %v4319_v50 = vor.u32 %v5357_v39, %v4316_v40  ;;  %v3980_v34 = vld [vmem:[%s8200_s1 + $0x438] sm:$0xf0]  ;;  %v4271_v36 = vor.u32 %v5345_v22, %v4268_v23 }
 0x143   :  { %2977 = vmatpush.bf16.msra.mxu1 %v3743_v53  ;;  %2990 = vmatpush.bf16.msra.mxu2 %v3871_v57  ;;  %v2721_v54 = vpop.f32.mrf.mxu1  ;;  %v4031_v58 = vor.u32 %v5285_v47, %v4028_v49  ;;  %v4124_v39 = vld [vmem:[%s8200_s1 + $0x558] sm:$0xf0]  ;;  %v5373_v47 = vld [vmem:[%s8200_s1 + $0x74c] sm:$0xf] }
 0x144   :  { %v2722_v57 = vadd.f32 %v2721_v54, %v7597_v59  ;;  %v4012_v59 = vld [vmem:[%s8200_s1 + $0x478] sm:$0xf0]  ;;  %v5269_v52 = vld [vmem:[%s8200_s1 + $0x40c] sm:$0xf] }
 0x145   :  { %2953 = vmatpush.bf16.msrb.mxu3 %v3455_v61  ;;  %v4428_v61 = vld [vmem:[%s8200_s1 + $0x7b8] sm:$0xf0]  ;;  %v5305_v54 = vld [vmem:[%s8200_s1 + $0x52c] sm:$0xf] }
 0x146   :  { %2965 = vmatpush.bf16.msra.mxu0 %v3599_v0  ;;  %v5317_v0 = vld [vmem:[%s8200_s1 + $0x58c] sm:$0xf]  ;;  %v4380_v49 = vld [vmem:[%s8200_s1 + $0x758] sm:$0xf0] }
 0x147   :  { %2978 = vmatpush.bf16.msra.mxu1 %v3727_v7  ;;  %2991 = vmatpush.bf16.msra.mxu2 %v3855_v11  ;;  %v4412_v7 = vld [vmem:[%s8200_s1 + $0x798] sm:$0xf0]  ;;  %v5521_v23 = vld [vmem:[%s8200_s1 + $0xbec] sm:$0xf] }
 0x148   :  { %2954 = vmatmul.bf16.vlgmr.msrb.gmra.mxu3 %v5895_v20  ;;  %v4444_v20 = vld [vmem:[%s8200_s1 + $0x7d8] sm:$0xf0] }
 0x149   :  { %2998 = vmatpush.bf16.msra.mxu3 %v4079_v1  ;;  %v4447_v53 = vor.u32 %v5389_v45, %v4444_v20  ;;  %v4431_v1 = vor.u32 %v5385_v16, %v4428_v61  ;;  %v3996_v11 = vld [vmem:[%s8200_s1 + $0x458] sm:$0xf0]  ;;  %v5341_v45 = vld [vmem:[%s8200_s1 + $0x64c] sm:$0xf] }
 0x14a   :  { %2966 = vmatpush.bf16.msra.mxu0 %v3583_v18  ;;  %v2760_v8 = vpop.f32.mrf.mxu0  ;;  %v4415_v18 = vor.u32 %v5381_v5, %v4412_v7  ;;  %v4252_v20 = vld [vmem:[%s8200_s1 + $0x658] sm:$0xf0]  ;;  %v5333_v7 = vld [vmem:[%s8200_s1 + $0x60c] sm:$0xf] }
 0x14b   :  { %2979 = vmatpush.bf16.msra.mxu1 %v3711_v48  ;;  %2992 = vmatpush.bf16.msra.mxu2 %v3839_v28  ;;  %v2734_v12 = vpop.f32.mrf.mxu2  ;;  %v2747_v14 = vpop.f32.mrf.mxu3  ;;  %v3999_v48 = vor.u32 %v5277_v10, %v3996_v11  ;;  %v4143_v28 = vor.u32 %v5313_v15, %v4140_v60  ;;  %v4255_v55 = vor.u32 %v5341_v45, %v4252_v20  ;;  %v4092_v5 = vld [vmem:[%s8200_s1 + $0x518] sm:$0xf0]  ;;  %v5421_v10 = vld [vmem:[%s8200_s1 + $0x8cc] sm:$0xf] }
 0x14c   :  { %v2735_v17 = vadd.f32 %v2734_v12, %v2722_v57  ;;  %v5425_v57 = vld [vmem:[%s8200_s1 + $0x8ec] sm:$0xf]  ;;  %v4572_v11 = vld [vmem:[%s8200_s1 + $0x8d8] sm:$0xf0] }
 0x14d   :  { %2999 = vmatpush.bf16.msra.mxu3 %v4063_v19  ;;  %2967 = vmatmul.bf16.vlgmr.msra.gmra.mxu0 %v5898_v21  ;;  %v5281_v21 = vld [vmem:[%s8200_s1 + $0x46c] sm:$0xf]  ;;  %v2723_v19 = vpop.f32.mrf.mxu1  ;;  %v4716_v15 = vld [vmem:[%s8200_s1 + $0x9f8] sm:$0xf0]  ;;  %v4575_v22 = vor.u32 %v5421_v10, %v4572_v11 }
 0x14e   :  { %3011 = vmatpush.bf16.msrb.mxu0 %v4207_v24  ;;  %2980 = vmatmul.bf16.vlgmr.msra.gmra.mxu1 %v5863_v4  ;;  %v4156_v4 = vld [vmem:[%s8200_s1 + $0x598] sm:$0xf0]  ;;  %v4015_v3 = vor.u32 %v5281_v21, %v4012_v59  ;;  %v5377_v24 = vld [vmem:[%s8200_s1 + $0x76c] sm:$0xf]  ;;  %v2748_v27 = vadd.f32 %v2747_v14, %v2735_v17 }
 0x14f   :  { %3024 = vmatpush.bf16.msrb.mxu1 %v4335_v32  ;;  %3037 = vmatpush.bf16.msrb.mxu2 %v4463_v37  ;;  %v4159_v9 = vor.u32 %v5317_v0, %v4156_v4  ;;  %v5273_v32 = vld [vmem:[%s8200_s1 + $0x42c] sm:$0xf]  ;;  %v4236_v59 = vld [vmem:[%s8200_s1 + $0x638] sm:$0xf0] }
 0x150   :  { %2993 = vmatmul.bf16.vlgmr.msra.gmra.mxu2 %v5868_v6  ;;  %v4284_v6 = vld [vmem:[%s8200_s1 + $0x698] sm:$0xf0]  ;;  %v5309_v37 = vld [vmem:[%s8200_s1 + $0x54c] sm:$0xf]  ;;  %v7804_v40 = vadd.f32 %v2760_v8, %v2748_v27 }
 0x151   :  { %3000 = vmatpush.bf16.msra.mxu3 %v4047_v43  ;;  %v4287_v13 = vor.u32 %v5349_v2, %v4284_v6  ;;  %v4399_v43 = vor.u32 %v5377_v24, %v4396_v25  ;;  %v4127_v51 = vor.u32 %v5309_v37, %v4124_v39  ;;  %v5337_v21 = vld [vmem:[%s8200_s1 + $0x62c] sm:$0xf]  ;;  %v4364_v4 = vld [vmem:[%s8200_s1 + $0x738] sm:$0xf0]  ;;  %v4111_v2 = vor.u32 %v5305_v54, %v4108_v56 }
 0x152   :  { %3012 = vmatpush.bf16.msrb.mxu0 %v4191_v46  ;;  %v3983_v46 = vor.u32 %v5273_v32, %v3980_v34  ;;  %v5369_v0 = vld [vmem:[%s8200_s1 + $0x72c] sm:$0xf]  ;;  %v4239_v8 = vor.u32 %v5337_v21, %v4236_v59  ;;  %v4348_v60 = vld [vmem:[%s8200_s1 + $0x718] sm:$0xf0] }
 0x153   :  { %3025 = vmatpush.bf16.msrb.mxu1 %v4319_v50  ;;  %3038 = vmatpush.bf16.msrb.mxu2 %v4447_v53  ;;  %v2762_v50 = vpop.f32.mrf.mxu0  ;;  %v3964_v53 = vld [vmem:[%s8200_s1 + $0x418] sm:$0xf0]  ;;  %v2749_v16 = vpop.f32.mrf.mxu3  ;;  %v4367_v12 = vor.u32 %v5369_v0, %v4364_v4  ;;  %v5457_v14 = vld [vmem:[%s8200_s1 + $0x9ec] sm:$0xf] }
 0x154   :  { %v2736_v61 = vpop.f32.mrf.mxu2  ;;  %v5489_v17 = vld [vmem:[%s8200_s1 + $0xaec] sm:$0xf]  ;;  %v4719_v25 = vor.u32 %v5457_v14, %v4716_v15  ;;  %v4700_v37 = vld [vmem:[%s8200_s1 + $0x9d8] sm:$0xf0] }
 0x155   :  { %3001 = vmatpush.bf16.msra.mxu3 %v4031_v58  ;;  %v4588_v58 = vld [vmem:[%s8200_s1 + $0x8f8] sm:$0xf0]  ;;  %v5417_v27 = vld [vmem:[%s8200_s1 + $0x8ac] sm:$0xf] }
 0x156   :  { %3013 = vmatpush.bf16.msrb.mxu0 %v4175_v62  ;;  %v4383_v62 = vor.u32 %v5373_v47, %v4380_v49  ;;  %v4591_v6 = vor.u32 %v5425_v57, %v4588_v58  ;;  %v4828_v45 = vld [vmem:[%s8200_s1 + $0xad8] sm:$0xf0]  ;;  %v5517_v20 = vld [vmem:[%s8200_s1 + $0xbcc] sm:$0xf] }
 0x157   :  { %3026 = vmatpush.bf16.msrb.mxu1 %v4303_v63  ;;  %3039 = vmatpush.bf16.msrb.mxu2 %v4431_v1  ;;  %v3967_v63 = vor.u32 %v5269_v52, %v3964_v53  ;;  %v7848_v1 = vpop.f32.mrf.mxu1  ;;  %v5413_v50 = vld [vmem:[%s8200_s1 + $0x88c] sm:$0xf]  ;;  %v4684_v54 = vld [vmem:[%s8200_s1 + $0x9b8] sm:$0xf0] }
 0x158   :  { %v5449_v53 = vld [vmem:[%s8200_s1 + $0x9ac] sm:$0xf]  ;;  %v4812_v57 = vld [vmem:[%s8200_s1 + $0xab8] sm:$0xf0] }
 0x159   :  { %3002 = vmatpush.bf16.msra.mxu3 %v4015_v3  ;;  %v5301_v3 = vld [vmem:[%s8200_s1 + $0x50c] sm:$0xf]  ;;  %v4940_v61 = vld [vmem:[%s8200_s1 + $0xbb8] sm:$0xf0] }
 0x15a   :  { %3014 = vmatpush.bf16.msrb.mxu0 %v4159_v9  ;;  %v4220_v9 = vld [vmem:[%s8200_s1 + $0x618] sm:$0xf0]  ;;  %v4095_v19 = vor.u32 %v5301_v3, %v4092_v5  ;;  %v5481_v56 = vld [vmem:[%s8200_s1 + $0xaac] sm:$0xf] }
 0x15b   :  { %3027 = vmatpush.bf16.msrb.mxu1 %v4287_v13  ;;  %3040 = vmatpush.bf16.msrb.mxu2 %v4415_v18  ;;  %v5365_v13 = vld [vmem:[%s8200_s1 + $0x70c] sm:$0xf]  ;;  %v4844_v18 = vld [vmem:[%s8200_s1 + $0xaf8] sm:$0xf0]  ;;  %v4223_v24 = vor.u32 %v5333_v7, %v4220_v9  ;;  %v4815_v59 = vor.u32 %v5481_v56, %v4812_v57 }
 0x15c   :  { %v4351_v32 = vor.u32 %v5365_v13, %v4348_v60  ;;  %v4847_v34 = vor.u32 %v5489_v17, %v4844_v18  ;;  %v5513_v16 = vld [vmem:[%s8200_s1 + $0xbac] sm:$0xf]  ;;  %v4524_v21 = vld [vmem:[%s8200_s1 + $0x878] sm:$0xf0] }
 0x15d   :  { %3003 = vmatpush.bf16.msra.mxu3 %v3999_v48  ;;  %v4972_v48 = vld [vmem:[%s8200_s1 + $0xbf8] sm:$0xf0]  ;;  %v5477_v0 = vld [vmem:[%s8200_s1 + $0xa8c] sm:$0xf] }
 0x15e   :  { %3015 = vmatpush.bf16.msrb.mxu0 %v4143_v28  ;;  %v4556_v28 = vld [vmem:[%s8200_s1 + $0x8b8] sm:$0xf0]  ;;  %v4975_v39 = vor.u32 %v5521_v23, %v4972_v48  ;;  %v5405_v7 = vld [vmem:[%s8200_s1 + $0x84c] sm:$0xf] }
 0x15f   :  { %3028 = vmatpush.bf16.msrb.mxu1 %v4271_v36  ;;  %3041 = vmatpush.bf16.msrb.mxu2 %v4399_v43  ;;  %v5453_v36 = vld [vmem:[%s8200_s1 + $0x9cc] sm:$0xf]  ;;  %v2775_v47 = vpop.f32.mrf.mxu1  ;;  %v4796_v4 = vld [vmem:[%s8200_s1 + $0xa98] sm:$0xf0] }
 0x160   :  { %v5485_v43 = vld [vmem:[%s8200_s1 + $0xacc] sm:$0xf]  ;;  %v4703_v49 = vor.u32 %v5453_v36, %v4700_v37  ;;  %v4924_v3 = vld [vmem:[%s8200_s1 + $0xb98] sm:$0xf0]  ;;  %v4799_v10 = vor.u32 %v5477_v0, %v4796_v4 }
 0x161   :  { %3004 = vmatpush.bf16.msra.mxu3 %v3983_v46  ;;  %v4956_v46 = vld [vmem:[%s8200_s1 + $0xbd8] sm:$0xf0]  ;;  %v4831_v52 = vor.u32 %v5485_v43, %v4828_v45  ;;  %v5441_v11 = vld [vmem:[%s8200_s1 + $0x96c] sm:$0xf] }
 0x162   :  { %3016 = vmatpush.bf16.msrb.mxu0 %v4127_v51  ;;  %v4540_v51 = vld [vmem:[%s8200_s1 + $0x898] sm:$0xf0]  ;;  %v5473_v60 = vld [vmem:[%s8200_s1 + $0xa6c] sm:$0xf] }
 0x163   :  { %3029 = vmatpush.bf16.msrb.mxu1 %v4255_v55  ;;  %3042 = vmatpush.bf16.msrb.mxu2 %v4383_v62  ;;  %v4959_v55 = vor.u32 %v5517_v20, %v4956_v46  ;;  %v4543_v58 = vor.u32 %v5413_v50, %v4540_v51  ;;  %v4687_v62 = vor.u32 %v5449_v53, %v4684_v54  ;;  %v4780_v17 = vld [vmem:[%s8200_s1 + $0xa78] sm:$0xf0]  ;;  %v5469_v36 = vld [vmem:[%s8200_s1 + $0xa4c] sm:$0xf] }
 0x164   :  { %v4908_v23 = vld [vmem:[%s8200_s1 + $0xb78] sm:$0xf0]  ;;  %v5501_v43 = vld [vmem:[%s8200_s1 + $0xb4c] sm:$0xf] }
 0x165   :  { %3005 = vmatpush.bf16.msra.mxu3 %v3967_v63  ;;  %v5445_v63 = vld [vmem:[%s8200_s1 + $0x98c] sm:$0xf]  ;;  %v4764_v37 = vld [vmem:[%s8200_s1 + $0xa58] sm:$0xf0] }
 0x166   :  { %3017 = vmatpush.bf16.msrb.mxu0 %v4111_v2  ;;  %v4892_v45 = vld [vmem:[%s8200_s1 + $0xb58] sm:$0xf0]  ;;  %v5397_v20 = vld [vmem:[%s8200_s1 + $0x80c] sm:$0xf]  ;;  %v4767_v50 = vor.u32 %v5469_v36, %v4764_v37  ;;  %v5552_v37 = vld [vmem:[%s8203_s3 + $0xa0] sm:$0xff] }
 0x167   :  { %3030 = vmatpush.bf16.msrb.mxu1 %v4239_v8  ;;  %3043 = vmatpush.bf16.msrb.mxu2 %v4367_v12  ;;  %v4508_v8 = vld [vmem:[%s8200_s1 + $0x858] sm:$0xf0]  ;;  %v5433_v47 = vld [vmem:[%s8200_s1 + $0x92c] sm:$0xf]  ;;  %v4895_v56 = vor.u32 %v5501_v43, %v4892_v45  ;;  %v5534_v45 = vld [vmem:[%s8203_s3 + $0x10] sm:$0xff] }
 0x168   :  { %3006 = vmatmul.bf16.vlgmr.msra.gmra.mxu3 %v6054_v41  ;;  %v4559_v41 = vor.u32 %v5417_v27, %v4556_v28  ;;  %v4652_v12 = vld [vmem:[%s8200_s1 + $0x978] sm:$0xf0]  ;;  %v4783_v27 = vor.u32 %v5473_v60, %v4780_v17  ;;  %v5437_v28 = vld [vmem:[%s8200_s1 + $0x94c] sm:$0xf]  ;;  %v5538_v17 = vld [vmem:[%s8203_s3 + $0x30] sm:$0xff] }
 0x169   :  { %3050 = vmatpush.bf16.msrb.mxu3 %v4591_v6  ;;  %v5509_v6 = vld [vmem:[%s8200_s1 + $0xb8c] sm:$0xf]  ;;  %v7982_v13 = vpop.f32.mrf.mxu2  ;;  %v4655_v48 = vor.u32 %v5441_v11, %v4652_v12  ;;  %v4476_v46 = vld [vmem:[%s8200_s1 + $0x818] sm:$0xf0] }
 0x16a   :  { %3018 = vmatpush.bf16.msrb.mxu0 %v4095_v19  ;;  %v7974_v9 = vpop.f32.mrf.mxu0  ;;  %v4927_v15 = vor.u32 %v5509_v6, %v4924_v3  ;;  %v4511_v19 = vor.u32 %v5405_v7, %v4508_v8  ;;  %v4620_v51 = vld [vmem:[%s8200_s1 + $0x938] sm:$0xf0]  ;;  %v5465_v57 = vld [vmem:[%s8200_s1 + $0xa2c] sm:$0xf] }
 0x16b   :  { %3031 = vmatpush.bf16.msrb.mxu1 %v4223_v24  ;;  %3044 = vmatpush.bf16.msrb.mxu2 %v4351_v32  ;;  %v7984_v14 = vpop.f32.mrf.mxu1  ;;  %v7992_v18 = vpop.f32.mrf.mxu3  ;;  %v5401_v24 = vld [vmem:[%s8200_s1 + $0x82c] sm:$0xf]  ;;  %v4636_v32 = vld [vmem:[%s8200_s1 + $0x958] sm:$0xf0] }
 0x16c   :  { %v5004_v53 = vld [vmem:[%s8200_s1 + $0xc38] sm:$0xf0]  ;;  %v5525_v0 = vld [vmem:[%s8200_s1 + $0xc0c] sm:$0xf] }
 0x16d   :  { %3051 = vmatpush.bf16.msrb.mxu3 %v4575_v22  ;;  %3019 = vmatmul.bf16.vlgmr.msrb.gmra.mxu0 %v6058_v44  ;;  %v5409_v44 = vld [vmem:[%s8200_s1 + $0x86c] sm:$0xf]  ;;  %v4988_v4 = vld [vmem:[%s8200_s1 + $0xc18] sm:$0xf0] }
 0x16e   :  { %3063 = vmatpush.bf16.msra.mxu0 %v4719_v25  ;;  %3032 = vmatmul.bf16.vlgmr.msrb.gmra.mxu1 %v6046_v38  ;;  %v4668_v38 = vld [vmem:[%s8200_s1 + $0x998] sm:$0xf0]  ;;  %v4527_v2 = vor.u32 %v5409_v44, %v4524_v21  ;;  %v5505_v22 = vld [vmem:[%s8200_s1 + $0xb6c] sm:$0xf]  ;;  %v4623_v21 = vor.u32 %v5433_v47, %v4620_v51 }
 0x16f   :  { %3076 = vmatpush.bf16.msra.mxu1 %v4847_v34  ;;  %3089 = vmatpush.bf16.msra.mxu2 %v4975_v39  ;;  %v4671_v5 = vor.u32 %v5445_v63, %v4668_v38  ;;  %v4492_v25 = vld [vmem:[%s8200_s1 + $0x838] sm:$0xf0]  ;;  %v4911_v34 = vor.u32 %v5505_v22, %v4908_v23  ;;  %v5429_v63 = vld [vmem:[%s8200_s1 + $0x90c] sm:$0xf]  ;;  %v5554_v22 = vld [vmem:[%s8203_s3 + $0xb0] sm:$0xff] }
 0x170   :  { %3045 = vmatmul.bf16.vlgmr.msrb.gmra.mxu2 %v6056_v42  ;;  %v4943_v42 = vor.u32 %v5513_v16, %v4940_v61  ;;  %v4495_v39 = vor.u32 %v5401_v24, %v4492_v25  ;;  %v4479_v61 = vor.u32 %v5397_v20, %v4476_v46  ;;  %v4876_v44 = vld [vmem:[%s8200_s1 + $0xb38] sm:$0xf0]  ;;  %v5461_v6 = vld [vmem:[%s8200_s1 + $0xa0c] sm:$0xf]  ;;  %v8118_v25 = vld [vmem:[%s8202_s2] sm:$0xf] }
 0x171   :  { %3052 = vmatpush.bf16.msrb.mxu3 %v4559_v41  ;;  %v4639_v41 = vor.u32 %v5437_v28, %v4636_v32  ;;  %v2788_v54 = vpop.f32.mrf.mxu2  ;;  %v4732_v3 = vld [vmem:[%s8200_s1 + $0xa18] sm:$0xf0]  ;;  %v5537_v23 = vld [vmem:[%s8203_s3 + $0x28] sm:$0xff] }
 0x172   :  { %3064 = vmatpush.bf16.msra.mxu0 %v4703_v49  ;;  %v2814_v49 = vpop.f32.mrf.mxu0  ;;  %v4860_v7 = vld [vmem:[%s8200_s1 + $0xb18] sm:$0xf0]  ;;  %v4735_v11 = vor.u32 %v5461_v6, %v4732_v3  ;;  %v5533_v51 = vld [vmem:[%s8203_s3 + $0x8] sm:$0xff]  ;;  %v5532_v54 = vld [vmem:[%s8203_s3] sm:$0xff] }
 0x173   :  { %3077 = vmatpush.bf16.msra.mxu1 %v4831_v52  ;;  %3090 = vmatpush.bf16.msra.mxu2 %v4959_v55  ;;  %v5529_v52 = vld [vmem:[%s8200_s1 + $0xc2c] sm:$0xf]  ;;  %v2827_v55 = vpop.f32.mrf.mxu1  ;;  %v2801_v16 = vpop.f32.mrf.mxu3  ;;  %v5539_v12 = vld [vmem:[%s8203_s3 + $0x38] sm:$0xff]  ;;  %v5550_v49 = vld [vmem:[%s8203_s3 + $0x90] sm:$0xff] }
 0x174   :  { %v5547_v60 = vld [vmem:[%s8203_s3 + $0x78] sm:$0xff]  ;;  %v5549_v55 = vld [vmem:[%s8203_s3 + $0x88] sm:$0xff] }
 0x175   :  { %3053 = vmatpush.bf16.msrb.mxu3 %v4543_v58  ;;  %v4748_v58 = vld [vmem:[%s8200_s1 + $0xa38] sm:$0xf0] }
 0x176   :  { %3065 = vmatpush.bf16.msra.mxu0 %v4687_v62  ;;  %v5497_v62 = vld [vmem:[%s8200_s1 + $0xb2c] sm:$0xf]  ;;  %v4751_v38 = vor.u32 %v5465_v57, %v4748_v58  ;;  %v5535_v36 = vld [vmem:[%s8203_s3 + $0x18] sm:$0xff]  ;;  %v5540_v57 = vld [vmem:[%s8203_s3 + $0x40] sm:$0xff] }
 0x177   :  { %3078 = vmatpush.bf16.msra.mxu1 %v4815_v59  ;;  %3091 = vmatpush.bf16.msra.mxu2 %v4943_v42  ;;  %v5007_v59 = vor.u32 %v5529_v52, %v5004_v53  ;;  %v4604_v42 = vld [vmem:[%s8200_s1 + $0x918] sm:$0xf0]  ;;  %v5541_v52 = vld [vmem:[%s8203_s3 + $0x48] sm:$0xff] }
 0x178   :  { %v4607_v8 = vor.u32 %v5429_v63, %v4604_v42 }
 0x179   :  { %3054 = vmatpush.bf16.msrb.mxu3 %v4527_v2  ;;  %v4879_v2 = vor.u32 %v5497_v62, %v4876_v44 }
 0x17a   :  { %3066 = vmatpush.bf16.msra.mxu0 %v4671_v5  ;;  %v5493_v5 = vld [vmem:[%s8200_s1 + $0xb0c] sm:$0xf] }
 0x17b   :  { %3079 = vmatpush.bf16.msra.mxu1 %v4799_v10  ;;  %3092 = vmatpush.bf16.msra.mxu2 %v4927_v15  ;;  %v4991_v10 = vor.u32 %v5525_v0, %v4988_v4  ;;  %v4863_v15 = vor.u32 %v5493_v5, %v4860_v7 }
 0x17d   :  { %3055 = vmatpush.bf16.msrb.mxu3 %v4511_v19  ;;  %v5555_v19 = vld [vmem:[%s8203_s3 + $0xb8] sm:$0xff] }
 0x17e   :  { %3067 = vmatpush.bf16.msra.mxu0 %v4655_v48  ;;  %v5545_v48 = vld [vmem:[%s8203_s3 + $0x68] sm:$0xff] }
 0x17f   :  { %3080 = vmatpush.bf16.msra.mxu1 %v4783_v27  ;;  %3093 = vmatpush.bf16.msra.mxu2 %v4911_v34  ;;  %v424_v27 = vperm.slane %v8118_v25, 2 }
 0x181   :  { %3056 = vmatpush.bf16.msrb.mxu3 %v4495_v39  ;;  %v5543_v39 = vld [vmem:[%s8203_s3 + $0x58] sm:$0xff]  ;;  %v2787_v43 = vadd.f32 %v7982_v13, %v424_v27 }
 0x182   :  { %3068 = vmatpush.bf16.msra.mxu0 %v4639_v41  ;;  %v5551_v41 = vld [vmem:[%s8203_s3 + $0x98] sm:$0xff] }
 0x183   :  { %3081 = vmatpush.bf16.msra.mxu1 %v4767_v50  ;;  %3094 = vmatpush.bf16.msra.mxu2 %v4895_v56  ;;  %v2800_v46 = vadd.f32 %v7992_v18, %v2787_v43  ;;  %v2774_v18 = vadd.f32 %v7848_v1, %v7804_v40  ;;  %v3115_v56 = vmax.f32 %v7241_v33, 0.0 }
 0x185   :  { %3057 = vmatpush.bf16.msrb.mxu3 %v4479_v61  ;;  %v2813_v53 = vadd.f32 %v7974_v9, %v2800_v46  ;;  %v3116_v40 = vmax.f32 %v2774_v18, 0.0  ;;  %v5548_v9 = vld [vmem:[%s8203_s3 + $0x80] sm:$0xff]  ;;  %v3119_v58 = vpack.c.bf16 %v3115_v56, %v3115_v56  ;;  %v5557_v46 = vld [vmem:[%s8203_s3 + $0xc8] sm:$0xff] }
 0x186   :  { %3069 = vmatpush.bf16.msra.mxu0 %v4623_v21 }
 0x187   :  { %3082 = vmatpush.bf16.msra.mxu1 %v4751_v38  ;;  %3095 = vmatpush.bf16.msra.mxu2 %v4879_v2  ;;  %v2826_v1 = vadd.f32 %v7984_v14, %v2813_v53  ;;  %v3120_v16 = vpack.c.bf16 %v3116_v40, %v3116_v40 }
 0x188   :  { %3058 = vmatmul.bf16.vlgmr.msrb.gmra.mxu3 %v6250_v26  ;;  %v5546_v26 = vld [vmem:[%s8203_s3 + $0x70] sm:$0xff] }
 0x189   :  { %3108 = vmatpush.bf16.msra.mxu3 %v5007_v59  ;;  %v2838_v28 = vpop.f32.mrf.mxu2 }
 0x18a   :  { %3070 = vmatpush.bf16.msra.mxu0 %v4607_v8  ;;  %v2864_v24 = vpop.f32.mrf.mxu0  ;;  %v2839_v61 = vadd.f32 %v2838_v28, %v2826_v1 }
 0x18b   :  { %3083 = vmatpush.bf16.msra.mxu1 %v4735_v11  ;;  %3096 = vmatpush.bf16.msra.mxu2 %v4863_v15  ;;  %v2877_v32 = vpop.f32.mrf.mxu1  ;;  %v2851_v34 = vpop.f32.mrf.mxu3 }
 0x18c   :  { %v2852_v33 = vadd.f32 %v2851_v34, %v2839_v61  ;;  %v5560_v34 = vld [vmem:[%s8203_s3 + $0xe0] sm:$0xff] }
 0x18d   :  { %3109 = vmatpush.bf16.msra.mxu3 %v4991_v10  ;;  %3071 = vmatmul.bf16.vlgmr.msra.gmra.mxu0 %v6263_v31  ;;  %v5536_v31 = vld [vmem:[%s8203_s3 + $0x20] sm:$0xff] }
 0x18e   :  { %3383 = vmatpush.bf16.msrb.mxu0 %v5539_v12  ;;  %3084 = vmatmul.bf16.vlgmr.msra.gmra.mxu1 %v6261_v30  ;;  %v5553_v30 = vld [vmem:[%s8203_s3 + $0xa8] sm:$0xff]  ;;  %v2865_v62 = vadd.f32 %v2864_v24, %v2852_v33  ;;  %v425_v24 = vperm.slane %v8118_v25, 3  ;;  %v5558_v25 = vld [vmem:[%s8203_s3 + $0xd0] sm:$0xff] }
 0x18f   :  { %3396 = vmatpush.bf16.msrb.mxu1 %v5547_v60  ;;  %3409 = vmatpush.bf16.msrb.mxu2 %v5555_v19  ;;  %v5563_v19 = vld [vmem:[%s8203_s3 + $0xf8] sm:$0xff] }
 0x190   :  { %3097 = vmatmul.bf16.vlgmr.msra.gmra.mxu2 %v6274_v35  ;;  %v5544_v35 = vld [vmem:[%s8203_s3 + $0x60] sm:$0xff]  ;;  %v2878_v14 = vadd.f32 %v2877_v32, %v2865_v62 }
 0x191   :  { %v2840_v47 = vpop.f32.mrf.mxu2  ;;  %3422 = vmatpush.bf16.msrb.mxu3 %v5563_v19 }
 0x192   :  { %3384 = vmatpush.bf16.msrb.mxu0 %v5538_v17  ;;  %v2866_v20 = vpop.f32.mrf.mxu0 }
 0x193   :  { %3397 = vmatpush.bf16.msrb.mxu1 %v5546_v26  ;;  %3410 = vmatpush.bf16.msrb.mxu2 %v5554_v22  ;;  %v2879_v13 = vpop.f32.mrf.mxu1  ;;  %v2853_v50 = vpop.f32.mrf.mxu3 }
 0x196   :  { %3385 = vmatpush.bf16.msrb.mxu0 %v5537_v23  ;;  %v5562_v23 = vld [vmem:[%s8203_s3 + $0xf0] sm:$0xff] }
 0x197   :  { %3398 = vmatpush.bf16.msrb.mxu1 %v5545_v48  ;;  %3411 = vmatpush.bf16.msrb.mxu2 %v5553_v30 }
 0x198   :  { %5011 = vmatmul.msk.bf16.vlgmr.msra.gmra.mxu3 %vm2435_vm0, %v6370_v29  ;;  %v5542_v29 = vld [vmem:[%s8203_s3 + $0x50] sm:$0xff] }
 0x199   :  { %3423 = vmatpush.bf16.msrb.mxu3 %v5562_v23 }
 0x19a   :  { %3386 = vmatpush.bf16.msrb.mxu0 %v5536_v31 }
 0x19b   :  { %3399 = vmatpush.bf16.msrb.mxu1 %v5544_v35  ;;  %3412 = vmatpush.bf16.msrb.mxu2 %v5552_v37  ;;  %v5561_v35 = vld [vmem:[%s8203_s3 + $0xe8] sm:$0xff]  ;;  %v5559_v37 = vld [vmem:[%s8203_s3 + $0xd8] sm:$0xff] }
 0x19d   :  { %3424 = vmatpush.bf16.msrb.mxu3 %v5561_v35 }
 0x19e   :  { %3387 = vmatpush.bf16.msrb.mxu0 %v5535_v36 }
 0x19f   :  { %3400 = vmatpush.bf16.msrb.mxu1 %v5543_v39  ;;  %3413 = vmatpush.bf16.msrb.mxu2 %v5551_v41 }
 0x1a1   :  { %3425 = vmatpush.bf16.msrb.mxu3 %v5560_v34 }
 0x1a2   :  { %3388 = vmatpush.bf16.msrb.mxu0 %v5534_v45 }
 0x1a3   :  { %3401 = vmatpush.bf16.msrb.mxu1 %v5542_v29  ;;  %3414 = vmatpush.bf16.msrb.mxu2 %v5550_v49  ;;  %v5556_v49 = vld [vmem:[%s8203_s3 + $0xc0] sm:$0xff] }
 0x1a5   :  { %3426 = vmatpush.bf16.msrb.mxu3 %v5559_v37 }
 0x1a6   :  { %3389 = vmatpush.bf16.msrb.mxu0 %v5533_v51 }
 0x1a7   :  { %3402 = vmatpush.bf16.msrb.mxu1 %v5541_v52  ;;  %3415 = vmatpush.bf16.msrb.mxu2 %v5549_v55 }
 0x1a9   :  { %v2890_v59 = vpop.f32.mrf.mxu2  ;;  %3427 = vmatpush.bf16.msrb.mxu3 %v5558_v25 }
 0x1aa   :  { %3390 = vmatpush.bf16.msrb.mxu0 %v5532_v54  ;;  %v2916_v44 = vpop.f32.mrf.mxu0  ;;  %v2891_v38 = vadd.f32 %v2890_v59, %v2878_v14  ;;  %v5564_v14 = vld [vmem:[%s8204_s4] ss:$0 sm:$0xff] }
 0x1ab   :  { %3403 = vmatpush.bf16.msrb.mxu1 %v5540_v57  ;;  %3416 = vmatpush.bf16.msrb.mxu2 %v5548_v9  ;;  %v2929_v21 = vpop.f32.mrf.mxu1  ;;  %v2903_v63 = vpop.f32.mrf.mxu3 }
 0x1ac   :  { %v2904_v42 = vadd.f32 %v2903_v63, %v2891_v38 }
 0x1ad   :  { %3391 = vmatmul.bf16.vlgmr.msrb.gmra.mxu0 %v3119_v58  ;;  %3428 = vmatpush.bf16.msrb.mxu3 %v5557_v46 }
 0x1ae   :  { %3404 = vmatmul.bf16.vlgmr.msrb.gmra.mxu1 %v3120_v16  ;;  %v2917_v3 = vadd.f32 %v2916_v44, %v2904_v42 }
 0x1b0   :  { %v2930_v5 = vadd.f32 %v2929_v21, %v2917_v3 }
 0x1b1   :  { %v2892_v2 = vpop.f32.mrf.mxu2  ;;  %3429 = vmatpush.bf16.msrb.mxu3 %v5556_v49 }
 0x1b2   :  { %v2918_v0 = vpop.f32.mrf.mxu0 }
 0x1b3   :  { %v2931_v4 = vpop.f32.mrf.mxu1  ;;  %v2905_v6 = vpop.f32.mrf.mxu3 }
 0x1b9   :  { %v2942_v7 = vpop.f32.mrf.mxu2 }
 0x1ba   :  { %v2943_v8 = vadd.f32 %v2942_v7, %v2930_v5 }
 0x1bc   :  { %v3117_v10 = vmax.f32 %v2943_v8, 0.0 }
 0x1be   :  { %v3121_v11 = vpack.c.bf16 %v3117_v10, %v3117_v10 }
 0x1c0   :  { %3417 = vmatmul.bf16.vlgmr.msrb.gmra.mxu2 %v3121_v11 }
 0x1c1   :  { %v2944_v12 = vpop.f32.mrf.mxu2 }
 0x1ca   :  { %v2968_v15 = vpop.f32.mrf.mxu0 }
 0x1cb   :  { %v2955_v60 = vpop.f32.mrf.mxu3  ;;  %v2981_v17 = vpop.f32.mrf.mxu1 }
 0x1cc   :  { %v2956_v36 = vadd.f32 %v2955_v60, %v425_v24 }
 0x1ce   :  { %v2969_v39 = vadd.f32 %v2968_v15, %v2956_v36 }
 0x1d0   :  { %v2982_v20 = vadd.f32 %v2981_v17, %v2969_v39 }
 0x1d2   :  { %v2970_v22 = vpop.f32.mrf.mxu0 }
 0x1d3   :  { %v2994_v26 = vpop.f32.mrf.mxu2  ;;  %v2957_v48 = vpop.f32.mrf.mxu3 }
 0x1d4   :  { %v2983_v31 = vpop.f32.mrf.mxu1  ;;  %v2995_v47 = vadd.f32 %v2994_v26, %v2982_v20 }
 0x1db   :  { %v2996_v30 = vpop.f32.mrf.mxu2 }
 0x1ea   :  { %v3020_v27 = vpop.f32.mrf.mxu0 }
 0x1eb   :  { %v3007_v28 = vpop.f32.mrf.mxu3  ;;  %v3033_v32 = vpop.f32.mrf.mxu1 }
 0x1ec   :  { %v3008_v50 = vadd.f32 %v3007_v28, %v2995_v47 }
 0x1ee   :  { %v3021_v51 = vadd.f32 %v3020_v27, %v3008_v50 }
 0x1f0   :  { %v3034_v52 = vadd.f32 %v3033_v32, %v3021_v51 }
 0x1f2   :  { %v3022_v45 = vpop.f32.mrf.mxu0 }
 0x1f3   :  { %v3046_v43 = vpop.f32.mrf.mxu2  ;;  %v3009_v41 = vpop.f32.mrf.mxu3 }
 0x1f4   :  { %v3035_v29 = vpop.f32.mrf.mxu1  ;;  %v3047_v55 = vadd.f32 %v3046_v43, %v3034_v52 }
 0x1fb   :  { %v3048_v13 = vpop.f32.mrf.mxu2 }
 0x20a   :  { %v3072_v18 = vpop.f32.mrf.mxu0 }
 0x20b   :  { %v3059_v53 = vpop.f32.mrf.mxu3  ;;  %v3085_v54 = vpop.f32.mrf.mxu1 }
 0x20c   :  { %v3060_v56 = vadd.f32 %v3059_v53, %v3047_v55 }
 0x20e   :  { %v3073_v57 = vadd.f32 %v3072_v18, %v3060_v56 }
 0x210   :  { %v3086_v16 = vadd.f32 %v3085_v54, %v3073_v57 }
 0x212   :  { %v3074_v1 = vpop.f32.mrf.mxu0 }
 0x213   :  { %v3098_v40 = vpop.f32.mrf.mxu2  ;;  %v3061_v9 = vpop.f32.mrf.mxu3 }
 0x214   :  { %v3087_v58 = vpop.f32.mrf.mxu1  ;;  %v3099_v61 = vadd.f32 %v3098_v40, %v3086_v16 }
 0x21b   :  { %v3100_v33 = vpop.f32.mrf.mxu2  ;;  %v3111_v62 = vpop.f32.mrf.mxu3 }
 0x21c   :  { %v3112_v44 = vadd.f32 %v3111_v62, %v3099_v61 }
 0x21e   :  { %v3118_v21 = vmax.f32 %v3112_v44, 0.0 }
 0x220   :  { %v3122_v59 = vpack.c.bf16 %v3118_v21, %v3118_v21 }
 0x222   :  { %3430 = vmatmul.bf16.vlgmr.msrb.gmra.mxu3 %v3122_v59 }
 0x223   :  { %v3113_v63 = vpop.f32.mrf.mxu3 }
 0x22a   :  { %v3392_v38 = vpop.f32.mrf.mxu0 }
 0x22b   :  { %v3393_v42 = vadd.f32 %v5564_v14, %v3392_v38  ;;  %v3405_v0 = vpop.f32.mrf.mxu1 }
 0x22d   :  { %v3406_v4 = vadd.f32 %v3405_v0, %v3393_v42 }
 0x232   :  { %v3394_v2 = vpop.f32.mrf.mxu0 }
 0x233   :  { %v3407_v6 = vpop.f32.mrf.mxu1 }
 0x243   :  { %v3418_v3 = vpop.f32.mrf.mxu2 }
 0x244   :  { %v3419_v5 = vadd.f32 %v3418_v3, %v3406_v4 }
 0x24b   :  { %v3420_v7 = vpop.f32.mrf.mxu2 }
 0x2a5   :  { %v3431_v8 = vpop.f32.mrf.mxu3 }
 0x2a6   :  { %v3432_v10 = vadd.f32 %v3431_v8, %v3419_v5 }
 0x2a8   :  { %3435 = vst [vmem:[%s8205_s5] sm:$0xff] %v3432_v10 }
 0x2ad   :  { %v3433_v11 = vpop.f32.mrf.mxu3 }

</bundles_post_ra>
